<compile_context>
chip_gen: v6e
topology: v6e:2x2x1
jax: 0.10.0
libtpu: 0.0.40
codegen_flags: <defaults>
</compile_context>

<pallas_src>
import functools

import numpy as np
import jax
import jax.numpy as jnp
from jax.experimental import pallas as pl
from jax.experimental.pallas import tpu as pltpu


def _round_up(n, m):
    return ((n + m - 1) // m) * m


# ----------------------------------------------------------------------------
# Fused Pallas kernel
# ----------------------------------------------------------------------------
def _encoder_kernel(x_ref, w1_ref, b1_ref, w2_ref, b2_ref, w3_ref, b3_ref,
                    wfc_ref, bfc_ref, out_ref, a1, a2, *, n_pad, rows):
    # x_ref  : (2*M + D0*N_pad, L0)  bf16, rows=(z, n_pad), lanes=(y,x,c),
    #          with M zero rows at the top and bottom (z zero-padding).
    # wK_ref : (3, K, n_q*Lq)        bf16 block-Toeplitz conv weights
    #          (n_q = 4 pool quarters merged along lanes, or 1 if no pool).
    # bK_ref : (1, Lq)               f32 bias tiled over the output (y,x) grid.
    # wfc_ref: (D_out, L3, 128)      bf16 permuted + concatenated FC weights.
    # bfc_ref: (1, 128)              f32 [mu_b | logvar_b | 0 pad].
    # out_ref: (N_pad, 128)          f32 [mu | log_var | 0 pad].
    # a1/a2  : zero-margined bf16 VMEM scratch holding z-padded activations.
    M = n_pad
    R0, R1, R2 = rows

    def conv_block(src_ref, w_ref, b_ref, rows_in, pool):
        # src_ref holds data rows at [M, M + rows_in); margins are zero.
        lq = b_ref.shape[1]
        n_q = w_ref.shape[2] // lq
        acc = jnp.zeros((rows_in, w_ref.shape[2]), jnp.float32)
        for tz in range(3):                       # z taps = shifted row windows
            lo = M + (tz - 1) * n_pad             # multiples of 16 -> aligned
            lhs = src_ref[lo:lo + rows_in, :]
            acc = acc + jnp.dot(lhs, w_ref[tz],
                                preferred_element_type=jnp.float32)
        # 2x2 (y,x) max pool = elementwise max of 128-aligned column slices.
        y = acc[:, :lq]
        for q in range(1, n_q):
            y = jnp.maximum(y, acc[:, q * lq:(q + 1) * lq])
        if pool:                                  # z max pool over row pairs
            y = y.reshape(rows_in // (2 * n_pad), 2, n_pad, lq)
            y = jnp.maximum(y[:, 0], y[:, 1]).reshape(rows_in // 2, lq)
        # bias + ReLU (both commute with the max pool).
        return jnp.maximum(y + b_ref[...], 0.0)

    # Zero only the z-padding margins; data rows are written right below.
    a1[:M, :] = jnp.zeros((M, a1.shape[1]), a1.dtype)
    a1[M + R1:2 * M + R1, :] = jnp.zeros((M, a1.shape[1]), a1.dtype)
    a2[:M, :] = jnp.zeros((M, a2.shape[1]), a2.dtype)
    a2[M + R2:2 * M + R2, :] = jnp.zeros((M, a2.shape[1]), a2.dtype)

    h1 = conv_block(x_ref, w1_ref, b1_ref, R0, pool=True)     # (R1, L1) f32
    a1[M:M + R1, :] = h1.astype(a1.dtype)
    h2 = conv_block(a1, w2_ref, b2_ref, R1, pool=True)        # (R2, L2) f32
    a2[M:M + R2, :] = h2.astype(a2.dtype)
    h3 = conv_block(a2, w3_ref, b3_ref, R2, pool=False)       # (R2, L3) f32

    # Flatten (torch NCDHW order baked into wfc) + both FC heads.
    d_out = wfc_ref.shape[0]
    h3b = h3.astype(wfc_ref.dtype).reshape(d_out, n_pad, h3.shape[1])
    acc = jnp.zeros((n_pad, out_ref.shape[1]), jnp.float32)
    for z in range(d_out):
        acc = acc + jnp.dot(h3b[z], wfc_ref[z],
                            preferred_element_type=jnp.float32)
    out_ref[...] = (acc + bfc_ref[...]).astype(out_ref.dtype)


# ----------------------------------------------------------------------------
# Parameter folding (done once, outside the hot path)
# ----------------------------------------------------------------------------
def _fold_conv_weights(w, hs, ws, cin_lanes, pool):
    """Fold a (3,3,3,Cin,Cout) DHWIO conv kernel (padding=1) into block-Toeplitz
    matrices acting on lane-folded rows: lanes_in=(y,x,ci) -> lanes_out=(yo,xo,co).
    y/x zero padding is absorbed (out-of-range taps dropped). pool=True merges
    the four (y%2, x%2) quarters along the output-lane axis, each quarter padded
    to a multiple of 128 lanes so the pool-max is a vreg-aligned column max."""
    w = np.asarray(w, np.float32)
    cin, cout = w.shape[3], w.shape[4]
    if pool:
        assert hs % 2 == 0 and ws % 2 == 0
        ho, wo = hs // 2, ws // 2
        quarters = [(0, 0), (0, 1), (1, 0), (1, 1)]
    else:
        ho, wo = hs, ws
        quarters = [(0, 0)]
    lq = _round_up(ho * wo * cout, 128)
    out = np.zeros((3, cin_lanes, len(quarters) * lq), np.float32)
    for tz in range(3):
        for qi, (ylo, xlo) in enumerate(quarters):
            base = qi * lq
            for yo in range(ho):
                for xo in range(wo):
                    yc = (2 * yo + ylo) if pool else yo    # pre-pool output pos
                    xc = (2 * xo + xlo) if pool else xo
                    col = base + (yo * wo + xo) * cout
                    for ty in range(3):
                        yi = yc + ty - 1
                        if yi < 0 or yi >= hs:
                            continue
                        for tx in range(3):
                            xi = xc + tx - 1
                            if xi < 0 or xi >= ws:
                                continue
                            row = (yi * ws + xi) * cin
                            out[tz, row:row + cin, col:col + cout] = w[tz, ty, tx]
    return jnp.asarray(out, dtype=jnp.bfloat16), lq


def _fold_bias(b, ho, wo, lq):
    b = np.asarray(b, np.float32)
    tiled = np.tile(b, ho * wo)
    out = np.zeros((1, lq), np.float32)
    out[0, :tiled.size] = tiled
    return jnp.asarray(out)


def _fold_fc_weights(w_mu, w_lv, d, h, w, c, lin_lanes, out_lanes):
    """Concatenate the two FC heads, permute rows from torch NCDHW-flatten order
    to the kernel's (z-slab, (y,x,c)-lane) layout, zero-pad columns to 128."""
    wcat = np.concatenate([np.asarray(w_mu, np.float32),
                           np.asarray(w_lv, np.float32)], axis=1)   # (flat, 2L)
    out = np.zeros((d, lin_lanes, out_lanes), np.float32)
    for z in range(d):
        for y in range(h):
            for x in range(w):
                for ci in range(c):
                    src = ((ci * d + z) * h + y) * w + x            # torch order
                    out[z, (y * w + x) * c + ci, :wcat.shape[1]] = wcat[src]
    return jnp.asarray(out, dtype=jnp.bfloat16)


def prepare_kernel_params(params, Nt, Ny, Nx):
    D0, H0, W0 = Nt, Ny, Nx
    H1, W1 = H0 // 2, W0 // 2
    D2, H2, W2 = D0 // 4, H0 // 4, W0 // 4
    c0 = params["w1"].shape[3]
    c1 = params["w1"].shape[4]
    c2 = params["w2"].shape[4]
    c3 = params["w3"].shape[4]
    latent = params["fc_mu_w"].shape[1]

    L0 = _round_up(H0 * W0 * c0, 128)
    w1, L1 = _fold_conv_weights(params["w1"], H0, W0, L0, pool=True)
    w2, L2 = _fold_conv_weights(params["w2"], H1, W1, L1, pool=True)
    w3, L3 = _fold_conv_weights(params["w3"], H2, W2, L2, pool=False)
    Lout = _round_up(2 * latent, 128)

    bfc = np.zeros((1, Lout), np.float32)
    bfc[0, :latent] = np.asarray(params["fc_mu_b"], np.float32)
    bfc[0, latent:2 * latent] = np.asarray(params["fc_lv_b"], np.float32)

    return dict(
        w1=w1, b1=_fold_bias(params["b1"], H1, W1, L1),
        w2=w2, b2=_fold_bias(params["b2"], H2, W2, L2),
        w3=w3, b3=_fold_bias(params["b3"], H2, W2, L3),
        wfc=_fold_fc_weights(params["fc_mu_w"], params["fc_lv_w"],
                             D2, H2, W2, c3, L3, Lout),
        bfc=jnp.asarray(bfc),
        dims=dict(L0=L0, L1=L1, L2=L2, L3=L3, Lout=Lout, latent=latent),
    )


# ----------------------------------------------------------------------------
# Forward wrapper
# ----------------------------------------------------------------------------
def state_encoder_forward(x_ncdhw, kparams):
    N, C0, D0, H0, W0 = x_ncdhw.shape
    assert D0 % 4 == 0 and H0 % 4 == 0 and W0 % 4 == 0
    dims = kparams["dims"]
    L0, L1, L2 = dims["L0"], dims["L1"], dims["L2"]
    Lout, latent = dims["Lout"], dims["latent"]

    # Rows = (z, n_pad) with n_pad a multiple of 16 (bf16 sublane packing);
    # lanes = (y, x, c) zero-padded to a multiple of 128.
    n_pad = max(16, _round_up(N, 16))
    M = n_pad
    R0, R1, R2 = D0 * n_pad, (D0 // 2) * n_pad, (D0 // 4) * n_pad

    x2d = jnp.transpose(x_ncdhw, (2, 0, 3, 4, 1)).reshape(D0, N, H0 * W0 * C0)
    x2d = jnp.pad(x2d, ((0, 0), (0, n_pad - N), (0, L0 - H0 * W0 * C0)))
    x2d = x2d.reshape(D0 * n_pad, L0)
    x2d = jnp.pad(x2d, ((M, M), (0, 0))).astype(jnp.bfloat16)   # z zero margins

    kernel = functools.partial(_encoder_kernel, n_pad=n_pad, rows=(R0, R1, R2))
    out = pl.pallas_call(
        kernel,
        out_shape=jax.ShapeDtypeStruct((n_pad, Lout), jnp.float32),
        scratch_shapes=[
            pltpu.VMEM((2 * M + R1, L1), jnp.bfloat16),
            pltpu.VMEM((2 * M + R2, L2), jnp.bfloat16),
        ],
        compiler_params=pltpu.CompilerParams(vmem_limit_bytes=64 * 1024 * 1024),
    )(x2d, kparams["w1"], kparams["b1"], kparams["w2"], kparams["b2"],
      kparams["w3"], kparams["b3"], kparams["wfc"], kparams["bfc"])
    return out[:N, :latent], out[:N, latent:2 * latent]


# ----------------------------------------------------------------------------
# Deterministic synthetic parameters (DHWIO conv weights, (flat, L) FC weights)
# ----------------------------------------------------------------------------
def init_params(key, Nchannel, cbc, Nt, Ny, Nx, latent_dim, dtype=jnp.float32):
    ks = jax.random.split(key, 4)

    def conv(k, cin, cout):
        k1, k2 = jax.random.split(k)
        bound = 1.0 / np.sqrt(cin * 27)
        return (jax.random.uniform(k1, (3, 3, 3, cin, cout), dtype, -bound, bound),
                jax.random.uniform(k2, (cout,), dtype, -bound, bound))

    w1, b1 = conv(ks[0], Nchannel, cbc)
    w2, b2 = conv(ks[1], cbc, cbc * 2)
    w3, b3 = conv(ks[2], cbc * 2, cbc * 4)
    flat = (Nt // 4) * (Ny // 4) * (Nx // 4) * cbc * 4
    bf = 1.0 / np.sqrt(flat)
    kf = jax.random.split(ks[3], 4)
    return dict(
        w1=w1, b1=b1, w2=w2, b2=b2, w3=w3, b3=b3,
        fc_mu_w=jax.random.uniform(kf[0], (flat, latent_dim), dtype, -bf, bf),
        fc_mu_b=jax.random.uniform(kf[1], (latent_dim,), dtype, -bf, bf),
        fc_lv_w=jax.random.uniform(kf[2], (flat, latent_dim), dtype, -bf, bf),
        fc_lv_b=jax.random.uniform(kf[3], (latent_dim,), dtype, -bf, bf),
    )


# ----------------------------------------------------------------------------
# Pure-JAX reference (sanity check only)
# ----------------------------------------------------------------------------
def reference_forward(x_ncdhw, params):
    x = jnp.transpose(x_ncdhw, (0, 2, 3, 4, 1))            # NCDHW -> NDHWC
    dn = ("NDHWC", "DHWIO", "NDHWC")

    def block(x, w, b):
        y = jax.lax.conv_general_dilated(x, w, (1, 1, 1), "SAME",
                                         dimension_numbers=dn) + b
        return jnp.maximum(y, 0.0)                         # ReLU, no batch-norm

    def pool(y):
        n, d, h, w, c = y.shape
        return y.reshape(n, d // 2, 2, h // 2, 2, w // 2, 2, c).max(axis=(2, 4, 6))

    y = pool(block(x, params["w1"], params["b1"]))
    y = pool(block(y, params["w2"], params["b2"]))
    y = block(y, params["w3"], params["b3"])
    flat = jnp.transpose(y, (0, 4, 1, 2, 3)).reshape(y.shape[0], -1)   # NCDHW view
    mu = flat @ params["fc_mu_w"] + params["fc_mu_b"]
    lv = flat @ params["fc_lv_w"] + params["fc_lv_b"]
    return mu, lv


# ----------------------------------------------------------------------------
if __name__ == "__main__":
    Nt = Ny = Nx = 8
    Nchannel = 4
    conv_base_channel = 8
    latent_dim = 16
    N = 2

    key = jax.random.PRNGKey(0)
    kx, kp = jax.random.split(key)
    x = jax.random.normal(kx, (N, Nchannel, Nt, Ny, Nx), jnp.float32)
    params = init_params(kp, Nchannel, conv_base_channel, Nt, Ny, Nx, latent_dim)
    kparams = prepare_kernel_params(params, Nt, Ny, Nx)

    z_mu, z_log_var = state_encoder_forward(x, kparams)
    jax.block_until_ready((z_mu, z_log_var))

    mu_ref, lv_ref = reference_forward(x, params)

    def rel_err(a, b):
        return float(jnp.max(jnp.abs(a - b)) / (jnp.max(jnp.abs(b)) + 1e-6))

    assert z_mu.shape == (N, latent_dim) and z_log_var.shape == (N, latent_dim)
    # bf16 operands / f32 accumulation path -> loose tolerance.
    assert rel_err(z_mu, mu_ref) < 3e-2, rel_err(z_mu, mu_ref)
    assert rel_err(z_log_var, lv_ref) < 3e-2, rel_err(z_log_var, lv_ref)
    print("KERNEL_OK")
</pallas_src>

<mosaic_0001>
module attributes {stable_mosaic.version = 11 : i64} {
  func.func @_encoder_kernel(%arg0: memref<160x256xbf16, #tpu.memory_space<vmem>>, %arg1: memref<3x256x512xbf16, #tpu.memory_space<vmem>>, %arg2: memref<1x128xf32, #tpu.memory_space<vmem>>, %arg3: memref<3x128x512xbf16, #tpu.memory_space<vmem>>, %arg4: memref<1x128xf32, #tpu.memory_space<vmem>>, %arg5: memref<3x128x128xbf16, #tpu.memory_space<vmem>>, %arg6: memref<1x128xf32, #tpu.memory_space<vmem>>, %arg7: memref<2x128x128xbf16, #tpu.memory_space<vmem>>, %arg8: memref<1x128xf32, #tpu.memory_space<vmem>>, %arg9: memref<16x128xf32, #tpu.memory_space<vmem>>, %arg10: memref<96x128xbf16, #tpu.memory_space<vmem>>, %arg11: memref<64x128xbf16, #tpu.memory_space<vmem>>) attributes {dimension_semantics = [], scalar_prefetch = 0 : i64, scratch_operands = 2 : i64, tpu.core_type = #tpu.core_type<tc>} {
    %cst = arith.constant 0.000000e+00 : bf16
    %0 = vector.broadcast %cst : bf16 to vector<16x128xbf16>
    %c0 = arith.constant 0 : index
    %c0_0 = arith.constant 0 : index
    %1 = vector.load %arg10[%c0, %c0_0] : memref<96x128xbf16, #tpu.memory_space<vmem>>, vector<16x128xbf16>
    tpu.vector_store %arg10[%c0, %c0_0], %0 {strides = array<i32>} : memref<96x128xbf16, #tpu.memory_space<vmem>>, vector<16x128xbf16>,
    %cst_1 = arith.constant 0.000000e+00 : bf16
    %2 = vector.broadcast %cst_1 : bf16 to vector<16x128xbf16>
    %c80 = arith.constant 80 : index
    %c0_2 = arith.constant 0 : index
    %3 = vector.load %arg10[%c80, %c0_2] : memref<96x128xbf16, #tpu.memory_space<vmem>>, vector<16x128xbf16>
    tpu.vector_store %arg10[%c80, %c0_2], %2 {strides = array<i32>} : memref<96x128xbf16, #tpu.memory_space<vmem>>, vector<16x128xbf16>,
    %cst_3 = arith.constant 0.000000e+00 : bf16
    %4 = vector.broadcast %cst_3 : bf16 to vector<16x128xbf16>
    %c0_4 = arith.constant 0 : index
    %c0_5 = arith.constant 0 : index
    %5 = vector.load %arg11[%c0_4, %c0_5] : memref<64x128xbf16, #tpu.memory_space<vmem>>, vector<16x128xbf16>
    tpu.vector_store %arg11[%c0_4, %c0_5], %4 {strides = array<i32>} : memref<64x128xbf16, #tpu.memory_space<vmem>>, vector<16x128xbf16>,
    %cst_6 = arith.constant 0.000000e+00 : bf16
    %6 = vector.broadcast %cst_6 : bf16 to vector<16x128xbf16>
    %c48 = arith.constant 48 : index
    %c0_7 = arith.constant 0 : index
    %7 = vector.load %arg11[%c48, %c0_7] : memref<64x128xbf16, #tpu.memory_space<vmem>>, vector<16x128xbf16>
    tpu.vector_store %arg11[%c48, %c0_7], %6 {strides = array<i32>} : memref<64x128xbf16, #tpu.memory_space<vmem>>, vector<16x128xbf16>,
    %cst_8 = arith.constant 0.000000e+00 : f32
    %8 = vector.broadcast %cst_8 : f32 to vector<128x512xf32>
    %c0_9 = arith.constant 0 : index
    %c0_10 = arith.constant 0 : index
    %9 = vector.load %arg0[%c0_9, %c0_10] : memref<160x256xbf16, #tpu.memory_space<vmem>>, vector<128x256xbf16>
    %c0_11 = arith.constant 0 : index
    %c0_12 = arith.constant 0 : index
    %c0_13 = arith.constant 0 : index
    %10 = vector.load %arg1[%c0_11, %c0_12, %c0_13] : memref<3x256x512xbf16, #tpu.memory_space<vmem>>, vector<1x256x512xbf16>
    %11 = vector.shape_cast %10 : vector<1x256x512xbf16> to vector<256x512xbf16>
    %cst_14 = arith.constant dense<0.000000e+00> : vector<128x512xf32>
    %12 = tpu.matmul %9, %11, %cst_14 {dimension_numbers = #tpu.dot_dimension_numbers<[1], [0], [0], [1], [0, 0, 1, 1], [], []>} : vector<128x256xbf16>, vector<256x512xbf16>, vector<128x512xf32> -> vector<128x512xf32>
    %13 = arith.addf %8, %12 : vector<128x512xf32>
    %c16 = arith.constant 16 : index
    %c0_15 = arith.constant 0 : index
    %14 = vector.load %arg0[%c16, %c0_15] : memref<160x256xbf16, #tpu.memory_space<vmem>>, vector<128x256xbf16>
    %c1 = arith.constant 1 : index
    %c0_16 = arith.constant 0 : index
    %c0_17 = arith.constant 0 : index
    %15 = vector.load %arg1[%c1, %c0_16, %c0_17] : memref<3x256x512xbf16, #tpu.memory_space<vmem>>, vector<1x256x512xbf16>
    %16 = vector.shape_cast %15 : vector<1x256x512xbf16> to vector<256x512xbf16>
    %cst_18 = arith.constant dense<0.000000e+00> : vector<128x512xf32>
    %17 = tpu.matmul %14, %16, %cst_18 {dimension_numbers = #tpu.dot_dimension_numbers<[1], [0], [0], [1], [0, 0, 1, 1], [], []>} : vector<128x256xbf16>, vector<256x512xbf16>, vector<128x512xf32> -> vector<128x512xf32>
    %18 = arith.addf %13, %17 : vector<128x512xf32>
    %c32 = arith.constant 32 : index
    %c0_19 = arith.constant 0 : index
    %19 = vector.load %arg0[%c32, %c0_19] : memref<160x256xbf16, #tpu.memory_space<vmem>>, vector<128x256xbf16>
    %c2 = arith.constant 2 : index
    %c0_20 = arith.constant 0 : index
    %c0_21 = arith.constant 0 : index
    %20 = vector.load %arg1[%c2, %c0_20, %c0_21] : memref<3x256x512xbf16, #tpu.memory_space<vmem>>, vector<1x256x512xbf16>
    %21 = vector.shape_cast %20 : vector<1x256x512xbf16> to vector<256x512xbf16>
    %cst_22 = arith.constant dense<0.000000e+00> : vector<128x512xf32>
    %22 = tpu.matmul %19, %21, %cst_22 {dimension_numbers = #tpu.dot_dimension_numbers<[1], [0], [0], [1], [0, 0, 1, 1], [], []>} : vector<128x256xbf16>, vector<256x512xbf16>, vector<128x512xf32> -> vector<128x512xf32>
    %23 = arith.addf %18, %22 : vector<128x512xf32>
    %24 = vector.extract_strided_slice %23 {offsets = [0, 0], sizes = [128, 128], strides = [1, 1]} : vector<128x512xf32> to vector<128x128xf32>
    %25 = vector.extract_strided_slice %23 {offsets = [0, 128], sizes = [128, 128], strides = [1, 1]} : vector<128x512xf32> to vector<128x128xf32>
    %26 = arith.maximumf %24, %25 : vector<128x128xf32>
    %27 = vector.extract_strided_slice %23 {offsets = [0, 256], sizes = [128, 128], strides = [1, 1]} : vector<128x512xf32> to vector<128x128xf32>
    %28 = arith.maximumf %26, %27 : vector<128x128xf32>
    %29 = vector.extract_strided_slice %23 {offsets = [0, 384], sizes = [128, 128], strides = [1, 1]} : vector<128x512xf32> to vector<128x128xf32>
    %30 = arith.maximumf %28, %29 : vector<128x128xf32>
    %31 = vector.shape_cast %30 : vector<128x128xf32> to vector<4x2x16x128xf32>
    %32 = vector.extract_strided_slice %31 {offsets = [0, 0, 0, 0], sizes = [4, 1, 16, 128], strides = [1, 1, 1, 1]} : vector<4x2x16x128xf32> to vector<4x1x16x128xf32>
    %33 = vector.shape_cast %32 : vector<4x1x16x128xf32> to vector<4x16x128xf32>
    %34 = vector.extract_strided_slice %31 {offsets = [0, 1, 0, 0], sizes = [4, 1, 16, 128], strides = [1, 1, 1, 1]} : vector<4x2x16x128xf32> to vector<4x1x16x128xf32>
    %35 = vector.shape_cast %34 : vector<4x1x16x128xf32> to vector<4x16x128xf32>
    %36 = arith.maximumf %33, %35 : vector<4x16x128xf32>
    %37 = vector.shape_cast %36 : vector<4x16x128xf32> to vector<64x128xf32>
    %c0_23 = arith.constant 0 : index
    %c0_24 = arith.constant 0 : index
    %38 = vector.load %arg2[%c0_23, %c0_24] : memref<1x128xf32, #tpu.memory_space<vmem>>, vector<1x128xf32>
    %39 = vector.broadcast %38 : vector<1x128xf32> to vector<64x128xf32>
    %40 = arith.addf %37, %39 : vector<64x128xf32>
    %cst_25 = arith.constant 0.000000e+00 : f32
    %41 = vector.broadcast %cst_25 : f32 to vector<64x128xf32>
    %42 = arith.maximumf %40, %41 : vector<64x128xf32>
    %43 = arith.truncf %42 : vector<64x128xf32> to vector<64x128xbf16>
    %c16_26 = arith.constant 16 : index
    %c0_27 = arith.constant 0 : index
    %44 = vector.load %arg10[%c16_26, %c0_27] : memref<96x128xbf16, #tpu.memory_space<vmem>>, vector<64x128xbf16>
    tpu.vector_store %arg10[%c16_26, %c0_27], %43 {strides = array<i32>} : memref<96x128xbf16, #tpu.memory_space<vmem>>, vector<64x128xbf16>,
    %cst_28 = arith.constant 0.000000e+00 : f32
    %45 = vector.broadcast %cst_28 : f32 to vector<64x512xf32>
    %c0_29 = arith.constant 0 : index
    %c0_30 = arith.constant 0 : index
    %46 = vector.load %arg10[%c0_29, %c0_30] : memref<96x128xbf16, #tpu.memory_space<vmem>>, vector<64x128xbf16>
    %c0_31 = arith.constant 0 : index
    %c0_32 = arith.constant 0 : index
    %c0_33 = arith.constant 0 : index
    %47 = vector.load %arg3[%c0_31, %c0_32, %c0_33] : memref<3x128x512xbf16, #tpu.memory_space<vmem>>, vector<1x128x512xbf16>
    %48 = vector.shape_cast %47 : vector<1x128x512xbf16> to vector<128x512xbf16>
    %cst_34 = arith.constant dense<0.000000e+00> : vector<64x512xf32>
    %49 = tpu.matmul %46, %48, %cst_34 {dimension_numbers = #tpu.dot_dimension_numbers<[1], [0], [0], [1], [0, 0, 1, 1], [], []>} : vector<64x128xbf16>, vector<128x512xbf16>, vector<64x512xf32> -> vector<64x512xf32>
    %50 = arith.addf %45, %49 : vector<64x512xf32>
    %c16_35 = arith.constant 16 : index
    %c0_36 = arith.constant 0 : index
    %51 = vector.load %arg10[%c16_35, %c0_36] : memref<96x128xbf16, #tpu.memory_space<vmem>>, vector<64x128xbf16>
    %c1_37 = arith.constant 1 : index
    %c0_38 = arith.constant 0 : index
    %c0_39 = arith.constant 0 : index
    %52 = vector.load %arg3[%c1_37, %c0_38, %c0_39] : memref<3x128x512xbf16, #tpu.memory_space<vmem>>, vector<1x128x512xbf16>
    %53 = vector.shape_cast %52 : vector<1x128x512xbf16> to vector<128x512xbf16>
    %cst_40 = arith.constant dense<0.000000e+00> : vector<64x512xf32>
    %54 = tpu.matmul %51, %53, %cst_40 {dimension_numbers = #tpu.dot_dimension_numbers<[1], [0], [0], [1], [0, 0, 1, 1], [], []>} : vector<64x128xbf16>, vector<128x512xbf16>, vector<64x512xf32> -> vector<64x512xf32>
    %55 = arith.addf %50, %54 : vector<64x512xf32>
    %c32_41 = arith.constant 32 : index
    %c0_42 = arith.constant 0 : index
    %56 = vector.load %arg10[%c32_41, %c0_42] : memref<96x128xbf16, #tpu.memory_space<vmem>>, vector<64x128xbf16>
    %c2_43 = arith.constant 2 : index
    %c0_44 = arith.constant 0 : index
    %c0_45 = arith.constant 0 : index
    %57 = vector.load %arg3[%c2_43, %c0_44, %c0_45] : memref<3x128x512xbf16, #tpu.memory_space<vmem>>, vector<1x128x512xbf16>
    %58 = vector.shape_cast %57 : vector<1x128x512xbf16> to vector<128x512xbf16>
    %cst_46 = arith.constant dense<0.000000e+00> : vector<64x512xf32>
    %59 = tpu.matmul %56, %58, %cst_46 {dimension_numbers = #tpu.dot_dimension_numbers<[1], [0], [0], [1], [0, 0, 1, 1], [], []>} : vector<64x128xbf16>, vector<128x512xbf16>, vector<64x512xf32> -> vector<64x512xf32>
    %60 = arith.addf %55, %59 : vector<64x512xf32>
    %61 = vector.extract_strided_slice %60 {offsets = [0, 0], sizes = [64, 128], strides = [1, 1]} : vector<64x512xf32> to vector<64x128xf32>
    %62 = vector.extract_strided_slice %60 {offsets = [0, 128], sizes = [64, 128], strides = [1, 1]} : vector<64x512xf32> to vector<64x128xf32>
    %63 = arith.maximumf %61, %62 : vector<64x128xf32>
    %64 = vector.extract_strided_slice %60 {offsets = [0, 256], sizes = [64, 128], strides = [1, 1]} : vector<64x512xf32> to vector<64x128xf32>
    %65 = arith.maximumf %63, %64 : vector<64x128xf32>
    %66 = vector.extract_strided_slice %60 {offsets = [0, 384], sizes = [64, 128], strides = [1, 1]} : vector<64x512xf32> to vector<64x128xf32>
    %67 = arith.maximumf %65, %66 : vector<64x128xf32>
    %68 = vector.shape_cast %67 : vector<64x128xf32> to vector<2x2x16x128xf32>
    %69 = vector.extract_strided_slice %68 {offsets = [0, 0, 0, 0], sizes = [2, 1, 16, 128], strides = [1, 1, 1, 1]} : vector<2x2x16x128xf32> to vector<2x1x16x128xf32>
    %70 = vector.shape_cast %69 : vector<2x1x16x128xf32> to vector<2x16x128xf32>
    %71 = vector.extract_strided_slice %68 {offsets = [0, 1, 0, 0], sizes = [2, 1, 16, 128], strides = [1, 1, 1, 1]} : vector<2x2x16x128xf32> to vector<2x1x16x128xf32>
    %72 = vector.shape_cast %71 : vector<2x1x16x128xf32> to vector<2x16x128xf32>
    %73 = arith.maximumf %70, %72 : vector<2x16x128xf32>
    %74 = vector.shape_cast %73 : vector<2x16x128xf32> to vector<32x128xf32>
    %c0_47 = arith.constant 0 : index
    %c0_48 = arith.constant 0 : index
    %75 = vector.load %arg4[%c0_47, %c0_48] : memref<1x128xf32, #tpu.memory_space<vmem>>, vector<1x128xf32>
    %76 = vector.broadcast %75 : vector<1x128xf32> to vector<32x128xf32>
    %77 = arith.addf %74, %76 : vector<32x128xf32>
    %cst_49 = arith.constant 0.000000e+00 : f32
    %78 = vector.broadcast %cst_49 : f32 to vector<32x128xf32>
    %79 = arith.maximumf %77, %78 : vector<32x128xf32>
    %80 = arith.truncf %79 : vector<32x128xf32> to vector<32x128xbf16>
    %c16_50 = arith.constant 16 : index
    %c0_51 = arith.constant 0 : index
    %81 = vector.load %arg11[%c16_50, %c0_51] : memref<64x128xbf16, #tpu.memory_space<vmem>>, vector<32x128xbf16>
    tpu.vector_store %arg11[%c16_50, %c0_51], %80 {strides = array<i32>} : memref<64x128xbf16, #tpu.memory_space<vmem>>, vector<32x128xbf16>,
    %cst_52 = arith.constant 0.000000e+00 : f32
    %82 = vector.broadcast %cst_52 : f32 to vector<32x128xf32>
    %c0_53 = arith.constant 0 : index
    %c0_54 = arith.constant 0 : index
    %83 = vector.load %arg11[%c0_53, %c0_54] : memref<64x128xbf16, #tpu.memory_space<vmem>>, vector<32x128xbf16>
    %c0_55 = arith.constant 0 : index
    %c0_56 = arith.constant 0 : index
    %c0_57 = arith.constant 0 : index
    %84 = vector.load %arg5[%c0_55, %c0_56, %c0_57] : memref<3x128x128xbf16, #tpu.memory_space<vmem>>, vector<1x128x128xbf16>
    %85 = vector.shape_cast %84 : vector<1x128x128xbf16> to vector<128x128xbf16>
    %cst_58 = arith.constant dense<0.000000e+00> : vector<32x128xf32>
    %86 = tpu.matmul %83, %85, %cst_58 {dimension_numbers = #tpu.dot_dimension_numbers<[1], [0], [0], [1], [0, 0, 1, 1], [], []>} : vector<32x128xbf16>, vector<128x128xbf16>, vector<32x128xf32> -> vector<32x128xf32>
    %87 = arith.addf %82, %86 : vector<32x128xf32>
    %c16_59 = arith.constant 16 : index
    %c0_60 = arith.constant 0 : index
    %88 = vector.load %arg11[%c16_59, %c0_60] : memref<64x128xbf16, #tpu.memory_space<vmem>>, vector<32x128xbf16>
    %c1_61 = arith.constant 1 : index
    %c0_62 = arith.constant 0 : index
    %c0_63 = arith.constant 0 : index
    %89 = vector.load %arg5[%c1_61, %c0_62, %c0_63] : memref<3x128x128xbf16, #tpu.memory_space<vmem>>, vector<1x128x128xbf16>
    %90 = vector.shape_cast %89 : vector<1x128x128xbf16> to vector<128x128xbf16>
    %cst_64 = arith.constant dense<0.000000e+00> : vector<32x128xf32>
    %91 = tpu.matmul %88, %90, %cst_64 {dimension_numbers = #tpu.dot_dimension_numbers<[1], [0], [0], [1], [0, 0, 1, 1], [], []>} : vector<32x128xbf16>, vector<128x128xbf16>, vector<32x128xf32> -> vector<32x128xf32>
    %92 = arith.addf %87, %91 : vector<32x128xf32>
    %c32_65 = arith.constant 32 : index
    %c0_66 = arith.constant 0 : index
    %93 = vector.load %arg11[%c32_65, %c0_66] : memref<64x128xbf16, #tpu.memory_space<vmem>>, vector<32x128xbf16>
    %c2_67 = arith.constant 2 : index
    %c0_68 = arith.constant 0 : index
    %c0_69 = arith.constant 0 : index
    %94 = vector.load %arg5[%c2_67, %c0_68, %c0_69] : memref<3x128x128xbf16, #tpu.memory_space<vmem>>, vector<1x128x128xbf16>
    %95 = vector.shape_cast %94 : vector<1x128x128xbf16> to vector<128x128xbf16>
    %cst_70 = arith.constant dense<0.000000e+00> : vector<32x128xf32>
    %96 = tpu.matmul %93, %95, %cst_70 {dimension_numbers = #tpu.dot_dimension_numbers<[1], [0], [0], [1], [0, 0, 1, 1], [], []>} : vector<32x128xbf16>, vector<128x128xbf16>, vector<32x128xf32> -> vector<32x128xf32>
    %97 = arith.addf %92, %96 : vector<32x128xf32>
    %c0_71 = arith.constant 0 : index
    %c0_72 = arith.constant 0 : index
    %98 = vector.load %arg6[%c0_71, %c0_72] : memref<1x128xf32, #tpu.memory_space<vmem>>, vector<1x128xf32>
    %99 = vector.broadcast %98 : vector<1x128xf32> to vector<32x128xf32>
    %100 = arith.addf %97, %99 : vector<32x128xf32>
    %cst_73 = arith.constant 0.000000e+00 : f32
    %101 = vector.broadcast %cst_73 : f32 to vector<32x128xf32>
    %102 = arith.maximumf %100, %101 : vector<32x128xf32>
    %103 = arith.truncf %102 : vector<32x128xf32> to vector<32x128xbf16>
    %104 = vector.shape_cast %103 : vector<32x128xbf16> to vector<2x16x128xbf16>
    %cst_74 = arith.constant 0.000000e+00 : f32
    %105 = vector.broadcast %cst_74 : f32 to vector<16x128xf32>
    %106 = vector.extract_strided_slice %104 {offsets = [0, 0, 0], sizes = [1, 16, 128], strides = [1, 1, 1]} : vector<2x16x128xbf16> to vector<1x16x128xbf16>
    %107 = vector.shape_cast %106 : vector<1x16x128xbf16> to vector<16x128xbf16>
    %c0_75 = arith.constant 0 : index
    %c0_76 = arith.constant 0 : index
    %c0_77 = arith.constant 0 : index
    %108 = vector.load %arg7[%c0_75, %c0_76, %c0_77] : memref<2x128x128xbf16, #tpu.memory_space<vmem>>, vector<1x128x128xbf16>
    %109 = vector.shape_cast %108 : vector<1x128x128xbf16> to vector<128x128xbf16>
    %cst_78 = arith.constant dense<0.000000e+00> : vector<16x128xf32>
    %110 = tpu.matmul %107, %109, %cst_78 {dimension_numbers = #tpu.dot_dimension_numbers<[1], [0], [0], [1], [0, 0, 1, 1], [], []>} : vector<16x128xbf16>, vector<128x128xbf16>, vector<16x128xf32> -> vector<16x128xf32>
    %111 = arith.addf %105, %110 : vector<16x128xf32>
    %112 = vector.extract_strided_slice %104 {offsets = [1, 0, 0], sizes = [1, 16, 128], strides = [1, 1, 1]} : vector<2x16x128xbf16> to vector<1x16x128xbf16>
    %113 = vector.shape_cast %112 : vector<1x16x128xbf16> to vector<16x128xbf16>
    %c1_79 = arith.constant 1 : index
    %c0_80 = arith.constant 0 : index
    %c0_81 = arith.constant 0 : index
    %114 = vector.load %arg7[%c1_79, %c0_80, %c0_81] : memref<2x128x128xbf16, #tpu.memory_space<vmem>>, vector<1x128x128xbf16>
    %115 = vector.shape_cast %114 : vector<1x128x128xbf16> to vector<128x128xbf16>
    %cst_82 = arith.constant dense<0.000000e+00> : vector<16x128xf32>
    %116 = tpu.matmul %113, %115, %cst_82 {dimension_numbers = #tpu.dot_dimension_numbers<[1], [0], [0], [1], [0, 0, 1, 1], [], []>} : vector<16x128xbf16>, vector<128x128xbf16>, vector<16x128xf32> -> vector<16x128xf32>
    %117 = arith.addf %111, %116 : vector<16x128xf32>
    %c0_83 = arith.constant 0 : index
    %c0_84 = arith.constant 0 : index
    %118 = vector.load %arg8[%c0_83, %c0_84] : memref<1x128xf32, #tpu.memory_space<vmem>>, vector<1x128xf32>
    %119 = vector.broadcast %118 : vector<1x128xf32> to vector<16x128xf32>
    %120 = arith.addf %117, %119 : vector<16x128xf32>
    %c0_85 = arith.constant 0 : index
    %c0_86 = arith.constant 0 : index
    %121 = vector.load %arg9[%c0_85, %c0_86] : memref<16x128xf32, #tpu.memory_space<vmem>>, vector<16x128xf32>
    tpu.vector_store %arg9[%c0_85, %c0_86], %120 {strides = array<i32>} : memref<16x128xf32, #tpu.memory_space<vmem>>, vector<16x128xf32>,
    return
  }
}

</mosaic_0001>

<bundles_post_ra>
// kernel: tpu_custom_call.1
= control target key start
LH: loop header
LB: loop body
LE: loop exit
PB: predicated region body
PF: predicated region fallthrough
CT: control target
= control target key end

     0   :  { %14 = vsyncpa [#allocation5], 0  ;;  %s6250_s0 = inlined_call_operand.hbm [shape: bf16[160,256], index: 0, kind: input, shape index: {}]   ;;  %s6251_s1 = inlined_call_operand.hbm [shape: bf16[3,256,512], index: 1, kind: input, shape index: {}]   ;;  %s6252_s2 = inlined_call_operand.vmem [shape: f32[1,128], index: 2, kind: input, shape index: {}]   ;;  %s6253_s3 = inlined_call_operand.hbm [shape: bf16[3,128,512], index: 3, kind: input, shape index: {}]   ;;  %s6254_s4 = inlined_call_operand.vmem [shape: f32[1,128], index: 4, kind: input, shape index: {}]   ;;  %s6255_s5 = inlined_call_operand.hbm [shape: bf16[3,128,128], index: 5, kind: input, shape index: {}]   ;;  %s6256_s6 = inlined_call_operand.vmem [shape: f32[1,128], index: 6, kind: input, shape index: {}]   ;;  %s6257_s7 = inlined_call_operand.hbm [shape: bf16[2,128,128], index: 7, kind: input, shape index: {}]   ;;  %s6258_s8 = inlined_call_operand.vmem [shape: f32[1,128], index: 8, kind: input, shape index: {}]   ;;  %s6259_s9 = inlined_call_operand.hbm [shape: f32[16,128], index: 9, kind: output, shape index: {}]  }
   0x1   :  { %15 = vsyncpa [#allocation8], 0 }
   0x2   :  { %16 = vsyncpa [#allocation11], 0 }
   0x3   :  { %17 = vsyncpa [#allocation6], 0  ;;  %s5409_s30 = smov [#allocation7]  }
   0x4   :  { %s35_s10 = sshll.u32 %s5409_s30, 4  ;;  %s36_s10 = int_to_ptr.vmem [resolvable:$true] %s35_s10 }
   0x5   :  { %s5289_s11 = scalar_lea.vmem %s36_s10, 24576  ;;  %p5294_p1 = scmp.lt.s32.totalorder %s36_s10, %s36_s10 }
   0x6   :  { %p5290_p0 = scmp.ne.s32.totalorder %s36_s10, %s5289_s11  ;;  %p5295_p2 = scmp.lt.s32.totalorder %s5289_s11, %s5289_s11 }
   0x8   :  { %p5296_p3 = por %p5295_p2, %p5294_p1 }
   0xa   :  { %p5297_p4 = pnand %p5296_p3, %p5290_p0 }
   0xc   :  { %5300 = shalt.err (!%p5297_p4)
}
   0xd   :  { %s5410_s12 = smov 256   ;;  %s5411_s13 = smov 16  }
   0xe   :  { %41 = dma.hbm_to_vmem [thread:$0]  %s6251_s1, 24576, %s36_s10, [#allocation8], %s5410_s12, %s5410_s12, %s5411_s13  }
   0xf   :  { %s5412_s16 = smov [#allocation10]  }
  0x10   :  { %s63_s17 = sshll.u32 %s5412_s16, 4  ;;  %s64_s17 = int_to_ptr.vmem [resolvable:$true] %s63_s17 }
  0x11   :  { %s5309_s18 = scalar_lea.vmem %s64_s17, 3072  ;;  %p5314_p6 = scmp.lt.s32.totalorder %s64_s17, %s64_s17 }
  0x12   :  { %p5310_p5 = scmp.ne.s32.totalorder %s64_s17, %s5309_s18  ;;  %p5315_p7 = scmp.lt.s32.totalorder %s5309_s18, %s5309_s18 }
  0x14   :  { %p5316_p8 = por %p5315_p7, %p5314_p6 }
  0x16   :  { %p5317_p9 = pnand %p5316_p8, %p5310_p5 }
  0x18   :  { %5320 = shalt.err (!%p5317_p9)
}
  0x19   :  { %s5413_s19 = smov 64   ;;  %s5414_s20 = smov 4  }
  0x1a   :  { %69 = dma.hbm_to_vmem [thread:$0]  %s6255_s5, 3072, %s64_s17, [#allocation11], %s5413_s19, %s5413_s19, %s5414_s20  }
  0x1b   :  { %s5415_s1 = smov [#allocation4]  }
  0x1c   :  { %s23_s23 = sshll.u32 %s5415_s1, 4  ;;  %s24_s23 = int_to_ptr.vmem [resolvable:$true] %s23_s23 }
  0x1d   :  { %s5329_s24 = scalar_lea.vmem %s24_s23, 2560  ;;  %p5334_p11 = scmp.lt.s32.totalorder %s24_s23, %s24_s23 }
  0x1e   :  { %p5330_p10 = scmp.ne.s32.totalorder %s24_s23, %s5329_s24  ;;  %p5335_p12 = scmp.lt.s32.totalorder %s5329_s24, %s5329_s24 }
  0x20   :  { %p5336_p13 = por %p5335_p12, %p5334_p11 }
  0x22   :  { %p5337_p0 = pnand %p5336_p13, %p5330_p10 }
  0x24   :  { %5340 = shalt.err (!%p5337_p0)
}
  0x25   :  { %s5416_s25 = smov 128   ;;  %s5417_s26 = smov 8  }
  0x26   :  { %29 = dma.hbm_to_vmem [thread:$0]  %s6250_s0, 2560, %s24_s23, [#allocation5], %s5416_s25, %s5416_s25, %s5417_s26  }
  0x27   :  { %s5418_s5 = smov [#allocation9]   ;;  %s5419_s30 = smov [#allocation12]  }
  0x28   :  { %s49_s29 = sshll.u32 %s5418_s5, 4  ;;  %s77_s10 = sshll.u32 %s5419_s30, 4  ;;  %s50_s29 = int_to_ptr.vmem [resolvable:$true] %s49_s29  ;;  %s78_s10 = int_to_ptr.vmem [resolvable:$true] %s77_s10 }
  0x29   :  { %s5349_s11 = scalar_lea.vmem %s50_s29, 12288  ;;  %p5354_p2 = scmp.lt.s32.totalorder %s50_s29, %s50_s29 }
  0x2a   :  { %p5350_p1 = scmp.ne.s32.totalorder %s50_s29, %s5349_s11  ;;  %p5355_p3 = scmp.lt.s32.totalorder %s5349_s11, %s5349_s11 }
  0x2c   :  { %p5356_p4 = por %p5355_p3, %p5354_p2 }
  0x2e   :  { %p5357_p5 = pnand %p5356_p4, %p5350_p1 }
  0x30   :  { %5360 = shalt.err (!%p5357_p5)
}
  0x31   :  { %55 = dma.hbm_to_vmem [thread:$0]  %s6253_s3, 12288, %s50_s29, [#allocation8], %s5410_s12, %s5410_s12, %s5411_s13  }
  0x32   :  { %s5369_s0 = scalar_lea.vmem %s78_s10, 2048  ;;  %p5374_p7 = scmp.lt.s32.totalorder %s78_s10, %s78_s10 }
  0x33   :  { %p5370_p6 = scmp.ne.s32.totalorder %s78_s10, %s5369_s0  ;;  %p5375_p8 = scmp.lt.s32.totalorder %s5369_s0, %s5369_s0 }
  0x35   :  { %p5376_p9 = por %p5375_p8, %p5374_p7 }
  0x37   :  { %p5377_p10 = pnand %p5376_p9, %p5370_p6 }
  0x39   :  { %5380 = shalt.err (!%p5377_p10)
}
  0x3a   :  { %83 = dma.hbm_to_vmem [thread:$0]  %s6257_s7, 2048, %s78_s10, [#allocation11], %s5413_s19, %s5413_s19, %s5414_s20  }
  0x3b   :  { %5401 = dma.done.wait [#allocation5], 2560  }
  0x3c   :  { %5402 = vsyncadd [#allocation5], 4294964736 }
  0x3d   :  { %5403 = dma.done.wait [#allocation8], 36864  }
  0x3e   :  { %5404 = vsyncadd [#allocation8], 4294930432 }
  0x3f   :  { %5405 = dma.done.wait [#allocation11], 5120  }
  0x40   :  { %5406 = vsyncadd [#allocation11], 4294962176  ;;  %v4758_v0 = vld [vmem:[#allocation7 + $0x2e4] ss:$16 sps:$4 sm:$0xff]   ;;  %v4760_v1 = vld [vmem:[#allocation7 + $0x2ec] ss:$16 sps:$4 sm:$0xff]  }
  0x41   :  { %657 = vmatprep.subr.bf16.mxu0 %v4758_v0  ;;  %v4762_v2 = vld [vmem:[#allocation7 + $0x2e0] ss:$16 sps:$4 sm:$0xff]   ;;  %v4763_v3 = vld [vmem:[#allocation7 + $0x2e8] ss:$16 sps:$4 sm:$0xff]   ;;  %770 = vmatprep.subr.bf16.mxu1 %v4760_v1  ;;  %v4764_v4 = vld [vmem:[#allocation7 + $0x2c4] ss:$16 sps:$4 sm:$0xff]  }
  0x42   :  { %658 = vmatpush1.bf16.msra.mxu0 %v4762_v2  ;;  %771 = vmatpush1.bf16.msra.mxu1 %v4763_v3  ;;  %v4766_v5 = vld [vmem:[#allocation7 + $0x2cc] ss:$16 sps:$4 sm:$0xff]   ;;  %v4768_v6 = vld [vmem:[#allocation7 + $0x2c0] ss:$16 sps:$4 sm:$0xff]   ;;  %v4769_v7 = vld [vmem:[#allocation7 + $0x2c8] ss:$16 sps:$4 sm:$0xff]  }
  0x43   :  { %659 = vmatprep.subr.bf16.mxu0 %v4764_v4  ;;  %772 = vmatprep.subr.bf16.mxu1 %v4766_v5  ;;  %v4770_v8 = vld [vmem:[#allocation7 + $0x2a4] ss:$16 sps:$4 sm:$0xff]   ;;  %v4772_v9 = vld [vmem:[#allocation7 + $0x2ac] ss:$16 sps:$4 sm:$0xff]   ;;  %v4774_v10 = vld [vmem:[#allocation7 + $0x2a0] ss:$16 sps:$4 sm:$0xff]  }
  0x44   :  { %v4775_v11 = vld [vmem:[#allocation7 + $0x2a8] ss:$16 sps:$4 sm:$0xff]   ;;  %v4776_v12 = vld [vmem:[#allocation7 + $0x284] ss:$16 sps:$4 sm:$0xff]   ;;  %v4778_v13 = vld [vmem:[#allocation7 + $0x28c] ss:$16 sps:$4 sm:$0xff]  }
  0x45   :  { %v4780_v14 = vld [vmem:[#allocation7 + $0x280] ss:$16 sps:$4 sm:$0xff]   ;;  %v4781_v15 = vld [vmem:[#allocation7 + $0x288] ss:$16 sps:$4 sm:$0xff]   ;;  %v4782_v16 = vld [vmem:[#allocation7 + $0x264] ss:$16 sps:$4 sm:$0xff]  }
  0x46   :  { %660 = vmatpush1.bf16.msra.mxu0 %v4768_v6  ;;  %773 = vmatpush1.bf16.msra.mxu1 %v4769_v7  ;;  %v4784_v17 = vld [vmem:[#allocation7 + $0x26c] ss:$16 sps:$4 sm:$0xff]   ;;  %v4786_v18 = vld [vmem:[#allocation7 + $0x260] ss:$16 sps:$4 sm:$0xff]   ;;  %v4787_v19 = vld [vmem:[#allocation7 + $0x268] ss:$16 sps:$4 sm:$0xff]  }
  0x47   :  { %661 = vmatprep.subr.bf16.mxu0 %v4770_v8  ;;  %774 = vmatprep.subr.bf16.mxu1 %v4772_v9  ;;  %v4788_v20 = vld [vmem:[#allocation7 + $0x244] ss:$16 sps:$4 sm:$0xff]   ;;  %v4790_v21 = vld [vmem:[#allocation7 + $0x24c] ss:$16 sps:$4 sm:$0xff]   ;;  %v4792_v22 = vld [vmem:[#allocation7 + $0x240] ss:$16 sps:$4 sm:$0xff]  }
  0x48   :  { %v4793_v23 = vld [vmem:[#allocation7 + $0x248] ss:$16 sps:$4 sm:$0xff]   ;;  %v4794_v24 = vld [vmem:[#allocation7 + $0x224] ss:$16 sps:$4 sm:$0xff]   ;;  %v4796_v25 = vld [vmem:[#allocation7 + $0x22c] ss:$16 sps:$4 sm:$0xff]  }
  0x49   :  { %v4798_v26 = vld [vmem:[#allocation7 + $0x220] ss:$16 sps:$4 sm:$0xff]   ;;  %v4799_v27 = vld [vmem:[#allocation7 + $0x228] ss:$16 sps:$4 sm:$0xff]   ;;  %v4800_v28 = vld [vmem:[#allocation7 + $0x204] ss:$16 sps:$4 sm:$0xff]  }
  0x4a   :  { %662 = vmatpush1.bf16.msra.mxu0 %v4774_v10  ;;  %775 = vmatpush1.bf16.msra.mxu1 %v4775_v11  ;;  %v4802_v29 = vld [vmem:[#allocation7 + $0x20c] ss:$16 sps:$4 sm:$0xff]   ;;  %v4804_v30 = vld [vmem:[#allocation7 + $0x200] ss:$16 sps:$4 sm:$0xff]   ;;  %v4805_v31 = vld [vmem:[#allocation7 + $0x208] ss:$16 sps:$4 sm:$0xff]  }
  0x4b   :  { %663 = vmatprep.subr.bf16.mxu0 %v4776_v12  ;;  %776 = vmatprep.subr.bf16.mxu1 %v4778_v13  ;;  %v4806_v32 = vld [vmem:[#allocation7 + $0x3e4] ss:$16 sps:$4 sm:$0xff]   ;;  %v4808_v33 = vld [vmem:[#allocation7 + $0x3ec] ss:$16 sps:$4 sm:$0xff]   ;;  %v4810_v34 = vld [vmem:[#allocation7 + $0x3e0] ss:$16 sps:$4 sm:$0xff]  }
  0x4c   :  { %v4811_v35 = vld [vmem:[#allocation7 + $0x3e8] ss:$16 sps:$4 sm:$0xff]   ;;  %v4812_v36 = vld [vmem:[#allocation7 + $0x3c4] ss:$16 sps:$4 sm:$0xff]   ;;  %v4814_v37 = vld [vmem:[#allocation7 + $0x3cc] ss:$16 sps:$4 sm:$0xff]  }
  0x4d   :  { %v4816_v38 = vld [vmem:[#allocation7 + $0x3c0] ss:$16 sps:$4 sm:$0xff]   ;;  %v4817_v39 = vld [vmem:[#allocation7 + $0x3c8] ss:$16 sps:$4 sm:$0xff]   ;;  %v4818_v40 = vld [vmem:[#allocation7 + $0x3a4] ss:$16 sps:$4 sm:$0xff]  }
  0x4e   :  { %664 = vmatpush1.bf16.msra.mxu0 %v4780_v14  ;;  %777 = vmatpush1.bf16.msra.mxu1 %v4781_v15  ;;  %v4820_v41 = vld [vmem:[#allocation7 + $0x3ac] ss:$16 sps:$4 sm:$0xff]   ;;  %v4822_v42 = vld [vmem:[#allocation7 + $0x3a0] ss:$16 sps:$4 sm:$0xff]   ;;  %v4823_v43 = vld [vmem:[#allocation7 + $0x3a8] ss:$16 sps:$4 sm:$0xff]  }
  0x4f   :  { %665 = vmatprep.subr.bf16.mxu0 %v4782_v16  ;;  %778 = vmatprep.subr.bf16.mxu1 %v4784_v17  ;;  %v4824_v44 = vld [vmem:[#allocation7 + $0x384] ss:$16 sps:$4 sm:$0xff]   ;;  %v4826_v45 = vld [vmem:[#allocation7 + $0x38c] ss:$16 sps:$4 sm:$0xff]   ;;  %v4828_v46 = vld [vmem:[#allocation7 + $0x380] ss:$16 sps:$4 sm:$0xff]  }
  0x50   :  { %v4829_v47 = vld [vmem:[#allocation7 + $0x388] ss:$16 sps:$4 sm:$0xff]   ;;  %v5504_v48 = vld [vmem:[#allocation4 + $0x14] ss:$8 sps:$4 sm:$0xff]   ;;  %v4834_v51 = vld [vmem:[#allocation7 + $0x360] ss:$16 sps:$4 sm:$0xff]  }
  0x51   :  { %v4830_v49 = vld [vmem:[#allocation7 + $0x364] ss:$16 sps:$4 sm:$0xff]   ;;  %v4832_v50 = vld [vmem:[#allocation7 + $0x36c] ss:$16 sps:$4 sm:$0xff]   ;;  %689 = vmatprep.mubr.bf16.mxu0 %v5504_v48  ;;  %802 = vmatprep.mubr.bf16.mxu1 %v5504_v48  ;;  %v4835_v52 = vld [vmem:[#allocation7 + $0x368] ss:$16 sps:$4 sm:$0xff]  }
  0x52   :  { %666 = vmatpush1.bf16.msra.mxu0 %v4786_v18  ;;  %779 = vmatpush1.bf16.msra.mxu1 %v4787_v19  ;;  %v4836_v53 = vld [vmem:[#allocation7 + $0x344] ss:$16 sps:$4 sm:$0xff]   ;;  %v4838_v54 = vld [vmem:[#allocation7 + $0x34c] ss:$16 sps:$4 sm:$0xff]   ;;  %v4840_v55 = vld [vmem:[#allocation7 + $0x340] ss:$16 sps:$4 sm:$0xff]  }
  0x53   :  { %667 = vmatprep.subr.bf16.mxu0 %v4788_v20  ;;  %780 = vmatprep.subr.bf16.mxu1 %v4790_v21  ;;  %v4841_v56 = vld [vmem:[#allocation7 + $0x348] ss:$16 sps:$4 sm:$0xff]   ;;  %v4842_v57 = vld [vmem:[#allocation7 + $0x324] ss:$16 sps:$4 sm:$0xff]   ;;  %v4844_v58 = vld [vmem:[#allocation7 + $0x32c] ss:$16 sps:$4 sm:$0xff]  }
  0x54   :  { %v4846_v59 = vld [vmem:[#allocation7 + $0x320] ss:$16 sps:$4 sm:$0xff]   ;;  %v4847_v60 = vld [vmem:[#allocation7 + $0x328] ss:$16 sps:$4 sm:$0xff]   ;;  %v4848_v61 = vld [vmem:[#allocation7 + $0x304] ss:$16 sps:$4 sm:$0xff]  }
  0x55   :  { %v4850_v62 = vld [vmem:[#allocation7 + $0x30c] ss:$16 sps:$4 sm:$0xff]   ;;  %v4852_v63 = vld [vmem:[#allocation7 + $0x300] ss:$16 sps:$4 sm:$0xff]   ;;  %v4853_v0 = vld [vmem:[#allocation7 + $0x308] ss:$16 sps:$4 sm:$0xff]  }
  0x56   :  { %668 = vmatpush1.bf16.msra.mxu0 %v4792_v22  ;;  %781 = vmatpush1.bf16.msra.mxu1 %v4793_v23  ;;  %v4859_v1 = vld [vmem:[#allocation7 + $0xe4] ss:$16 sps:$4 sm:$0xff]   ;;  %v4862_v2 = vld [vmem:[#allocation7 + $0xec] ss:$16 sps:$4 sm:$0xff]   ;;  %v5508_v3 = vld [vmem:[#allocation4 + $0x10] ss:$8 sps:$4 sm:$0xff]  }
  0x57   :  { %669 = vmatprep.subr.bf16.mxu0 %v4794_v24  ;;  %782 = vmatprep.subr.bf16.mxu1 %v4796_v25  ;;  %v4857_v4 = vld [vmem:[#allocation7 + $0xe0] ss:$16 sps:$4 sm:$0xff]   ;;  %v4860_v5 = vld [vmem:[#allocation7 + $0xe8] ss:$16 sps:$4 sm:$0xff]   ;;  %v4865_v6 = vld [vmem:[#allocation7 + $0xc4] ss:$16 sps:$4 sm:$0xff]  }
  0x58   :  { %v4868_v7 = vld [vmem:[#allocation7 + $0xcc] ss:$16 sps:$4 sm:$0xff]   ;;  %v4863_v9 = vld [vmem:[#allocation7 + $0xc0] ss:$16 sps:$4 sm:$0xff]   ;;  %v4866_v10 = vld [vmem:[#allocation7 + $0xc8] ss:$16 sps:$4 sm:$0xff]  }
  0x59   :  { %v5510_v8 = vld [vmem:[#allocation4 + $0x24] ss:$8 sps:$4 sm:$0xff]   ;;  %v5516_v13 = vld [vmem:[#allocation4 + $0x20] ss:$8 sps:$4 sm:$0xff]   ;;  %v5518_v18 = vld [vmem:[#allocation4 + $0x34] ss:$8 sps:$4 sm:$0xff]  }
  0x5a   :  { %670 = vmatpush1.bf16.msra.mxu0 %v4798_v26  ;;  %783 = vmatpush1.bf16.msra.mxu1 %v4799_v27  ;;  %v4874_v11 = vld [vmem:[#allocation7 + $0xa4] ss:$16 sps:$4 sm:$0xff]   ;;  %v4877_v12 = vld [vmem:[#allocation7 + $0xac] ss:$16 sps:$4 sm:$0xff]   ;;  %v4872_v14 = vld [vmem:[#allocation7 + $0xa0] ss:$16 sps:$4 sm:$0xff]  }
  0x5b   :  { %671 = vmatprep.subr.bf16.mxu0 %v4800_v28  ;;  %784 = vmatprep.subr.bf16.mxu1 %v4802_v29  ;;  %v4875_v15 = vld [vmem:[#allocation7 + $0xa8] ss:$16 sps:$4 sm:$0xff]   ;;  %v4880_v16 = vld [vmem:[#allocation7 + $0x84] ss:$16 sps:$4 sm:$0xff]   ;;  %v4883_v17 = vld [vmem:[#allocation7 + $0x8c] ss:$16 sps:$4 sm:$0xff]  }
  0x5c   :  { %v4878_v19 = vld [vmem:[#allocation7 + $0x80] ss:$16 sps:$4 sm:$0xff]   ;;  %v4881_v20 = vld [vmem:[#allocation7 + $0x88] ss:$16 sps:$4 sm:$0xff]   ;;  %v4889_v21 = vld [vmem:[#allocation7 + $0x64] ss:$16 sps:$4 sm:$0xff]  }
  0x5d   :  { %v4892_v22 = vld [vmem:[#allocation7 + $0x6c] ss:$16 sps:$4 sm:$0xff]   ;;  %v5524_v23 = vld [vmem:[#allocation4 + $0x30] ss:$8 sps:$4 sm:$0xff]   ;;  %v4895_v26 = vld [vmem:[#allocation7 + $0x44] ss:$16 sps:$4 sm:$0xff]  }
  0x5e   :  { %672 = vmatpush1.bf16.msra.mxu0 %v4804_v30  ;;  %785 = vmatpush1.bf16.msra.mxu1 %v4805_v31  ;;  %v4887_v24 = vld [vmem:[#allocation7 + $0x60] ss:$16 sps:$4 sm:$0xff]   ;;  %v4890_v25 = vld [vmem:[#allocation7 + $0x68] ss:$16 sps:$4 sm:$0xff]   ;;  %v4898_v27 = vld [vmem:[#allocation7 + $0x4c] ss:$16 sps:$4 sm:$0xff]  }
  0x5f   :  { %673 = vmatprep.subr.bf16.mxu0 %v4806_v32  ;;  %786 = vmatprep.subr.bf16.mxu1 %v4808_v33  ;;  %v5526_v28 = vld [vmem:[#allocation4 + $0x44] ss:$8 sps:$4 sm:$0xff]   ;;  %v4893_v29 = vld [vmem:[#allocation7 + $0x40] ss:$16 sps:$4 sm:$0xff]   ;;  %v4896_v30 = vld [vmem:[#allocation7 + $0x48] ss:$16 sps:$4 sm:$0xff]  }
  0x60   :  { %v4904_v31 = vld [vmem:[#allocation7 + $0x24] ss:$16 sps:$4 sm:$0xff]   ;;  %v4907_v32 = vld [vmem:[#allocation7 + $0x2c] ss:$16 sps:$4 sm:$0xff]   ;;  %v5532_v33 = vld [vmem:[#allocation4 + $0x40] ss:$8 sps:$4 sm:$0xff]  }
  0x61   :  { %vm5422_vm0 = vmmov 0   ;;  %s5423_s19 = smov [#allocation13]  }
  0x62   :  { %674 = vmatpush2.bf16.msra.mxu0 %v4810_v34  ;;  %787 = vmatpush2.bf16.msra.mxu1 %v4811_v35  ;;  %v4902_v34 = vld [vmem:[#allocation7 + $0x20] ss:$16 sps:$4 sm:$0xff]   ;;  %v4905_v35 = vld [vmem:[#allocation7 + $0x28] ss:$16 sps:$4 sm:$0xff]   ;;  %s4141_s20 = sshll.u32 %s5423_s19, 4  ;;  %s4142_s20 = int_to_ptr.vmem [resolvable:$true] %s4141_s20 }
  0x63   :  { %675 = vmatprep.subr.bf16.mxu0 %v4812_v36  ;;  %788 = vmatprep.subr.bf16.mxu1 %v4814_v37  ;;  %v4910_v36 = vld [vmem:[#allocation7 + $0x4] ss:$16 sps:$4 sm:$0xff]   ;;  %v4913_v37 = vld [vmem:[#allocation7 + $0xc] ss:$16 sps:$4 sm:$0xff]   ;;  %s5381_s21 = scalar_lea.vmem %s4142_s20, 256  ;;  %p5386_p12 = scmp.lt.s32.totalorder %s4142_s20, %s4142_s20 }
  0x64   :  { %p5382_p11 = scmp.ne.s32.totalorder %s4142_s20, %s5381_s21  ;;  %p5387_p13 = scmp.lt.s32.totalorder %s5381_s21, %s5381_s21 }
  0x66   :  { %676 = vmatpush2.bf16.msra.mxu0 %v4816_v38  ;;  %789 = vmatpush2.bf16.msra.mxu1 %v4817_v39  ;;  %v5534_v38 = vld [vmem:[#allocation4 + $0x54] ss:$8 sps:$4 sm:$0xff]   ;;  %v4908_v39 = vld [vmem:[#allocation7] ss:$16 sps:$4 sm:$0xff]   ;;  %p5388_p0 = por %p5387_p13, %p5386_p12 }
  0x67   :  { %677 = vmatprep.subr.bf16.mxu0 %v4818_v40  ;;  %790 = vmatprep.subr.bf16.mxu1 %v4820_v41  ;;  %v4911_v40 = vld [vmem:[#allocation7 + $0x8] ss:$16 sps:$4 sm:$0xff]   ;;  %v4919_v41 = vld [vmem:[#allocation7 + $0x1e4] ss:$16 sps:$4 sm:$0xff]  }
  0x68   :  { %p5389_p1 = pnand %p5388_p0, %p5382_p11 }
  0x6a   :  { %678 = vmatpush2.bf16.msra.mxu0 %v4822_v42  ;;  %791 = vmatpush2.bf16.msra.mxu1 %v4823_v43  ;;  %v4922_v42 = vld [vmem:[#allocation7 + $0x1ec] ss:$16 sps:$4 sm:$0xff]   ;;  %v5540_v43 = vld [vmem:[#allocation4 + $0x50] ss:$8 sps:$4 sm:$0xff]  }
  0x6b   :  { %679 = vmatprep.subr.bf16.mxu0 %v4824_v44  ;;  %792 = vmatprep.subr.bf16.mxu1 %v4826_v45  ;;  %v4917_v44 = vld [vmem:[#allocation7 + $0x1e0] ss:$16 sps:$4 sm:$0xff]   ;;  %v4920_v45 = vld [vmem:[#allocation7 + $0x1e8] ss:$16 sps:$4 sm:$0xff]  }
  0x6e   :  { %680 = vmatpush2.bf16.msra.mxu0 %v4828_v46  ;;  %793 = vmatpush2.bf16.msra.mxu1 %v4829_v47  ;;  %v4925_v46 = vld [vmem:[#allocation7 + $0x1c4] ss:$16 sps:$4 sm:$0xff]   ;;  %v4928_v47 = vld [vmem:[#allocation7 + $0x1cc] ss:$16 sps:$4 sm:$0xff]  }
  0x6f   :  { %681 = vmatprep.subr.bf16.mxu0 %v4830_v49  ;;  %794 = vmatprep.subr.bf16.mxu1 %v4832_v50  ;;  %v5542_v49 = vld [vmem:[#allocation4 + $0x64] ss:$8 sps:$4 sm:$0xff]   ;;  %v4923_v50 = vld [vmem:[#allocation7 + $0x1c0] ss:$16 sps:$4 sm:$0xff]  }
  0x72   :  { %682 = vmatpush2.bf16.msra.mxu0 %v4834_v51  ;;  %795 = vmatpush2.bf16.msra.mxu1 %v4835_v52  ;;  %v4926_v51 = vld [vmem:[#allocation7 + $0x1c8] ss:$16 sps:$4 sm:$0xff]   ;;  %v4934_v52 = vld [vmem:[#allocation7 + $0x1a4] ss:$16 sps:$4 sm:$0xff]  }
  0x73   :  { %683 = vmatprep.subr.bf16.mxu0 %v4836_v53  ;;  %796 = vmatprep.subr.bf16.mxu1 %v4838_v54  ;;  %v4937_v53 = vld [vmem:[#allocation7 + $0x1ac] ss:$16 sps:$4 sm:$0xff]   ;;  %v5548_v54 = vld [vmem:[#allocation4 + $0x60] ss:$8 sps:$4 sm:$0xff]  }
  0x76   :  { %684 = vmatpush2.bf16.msra.mxu0 %v4840_v55  ;;  %797 = vmatpush2.bf16.msra.mxu1 %v4841_v56  ;;  %v4932_v55 = vld [vmem:[#allocation7 + $0x1a0] ss:$16 sps:$4 sm:$0xff]   ;;  %v4935_v56 = vld [vmem:[#allocation7 + $0x1a8] ss:$16 sps:$4 sm:$0xff]  }
  0x77   :  { %685 = vmatprep.subr.bf16.mxu0 %v4842_v57  ;;  %798 = vmatprep.subr.bf16.mxu1 %v4844_v58  ;;  %v4940_v57 = vld [vmem:[#allocation7 + $0x184] ss:$16 sps:$4 sm:$0xff]   ;;  %v4943_v58 = vld [vmem:[#allocation7 + $0x18c] ss:$16 sps:$4 sm:$0xff]  }
  0x7a   :  { %686 = vmatpush2.bf16.msra.mxu0 %v4846_v59  ;;  %799 = vmatpush2.bf16.msra.mxu1 %v4847_v60  ;;  %v5550_v59 = vld [vmem:[#allocation4 + $0x74] ss:$8 sps:$4 sm:$0xff]   ;;  %v4938_v60 = vld [vmem:[#allocation7 + $0x180] ss:$16 sps:$4 sm:$0xff]  }
  0x7b   :  { %687 = vmatprep.subr.bf16.mxu0 %v4848_v61  ;;  %800 = vmatprep.subr.bf16.mxu1 %v4850_v62  ;;  %v4941_v61 = vld [vmem:[#allocation7 + $0x188] ss:$16 sps:$4 sm:$0xff]   ;;  %v4949_v62 = vld [vmem:[#allocation7 + $0x164] ss:$16 sps:$4 sm:$0xff]  }
  0x7e   :  { %688 = vmatpush2.bf16.msra.mxu0 %v4852_v63  ;;  %801 = vmatpush2.bf16.msra.mxu1 %v4853_v0  ;;  %v4952_v63 = vld [vmem:[#allocation7 + $0x16c] ss:$16 sps:$4 sm:$0xff]   ;;  %v5556_v0 = vld [vmem:[#allocation4 + $0x70] ss:$8 sps:$4 sm:$0xff]  }
  0x7f   :  { %1213 = vmatprep.subr.bf16.mxu0 %v4859_v1  ;;  %1326 = vmatprep.subr.bf16.mxu1 %v4862_v2  ;;  %v4947_v1 = vld [vmem:[#allocation7 + $0x160] ss:$16 sps:$4 sm:$0xff]   ;;  %v4950_v2 = vld [vmem:[#allocation7 + $0x168] ss:$16 sps:$4 sm:$0xff]  }
  0x81   :  { %690 = vmatmul.mubr.bf16.vlgmr.msra.gmra.mxu0 %v5508_v3  ;;  %803 = vmatmul.mubr.bf16.vlgmr.msra.gmra.mxu1 %v5508_v3 }
  0x82   :  { %1214 = vmatpush1.bf16.msra.mxu0 %v4857_v4  ;;  %1327 = vmatpush1.bf16.msra.mxu1 %v4860_v5  ;;  %v4955_v4 = vld [vmem:[#allocation7 + $0x144] ss:$16 sps:$4 sm:$0xff]   ;;  %v4958_v5 = vld [vmem:[#allocation7 + $0x14c] ss:$16 sps:$4 sm:$0xff]  }
  0x83   :  { %1215 = vmatprep.subr.bf16.mxu0 %v4865_v6  ;;  %1328 = vmatprep.subr.bf16.mxu1 %v4868_v7  ;;  %v5558_v6 = vld [vmem:[#allocation4 + $0x84] ss:$8 sps:$4 sm:$0xff]   ;;  %v4953_v7 = vld [vmem:[#allocation7 + $0x140] ss:$16 sps:$4 sm:$0xff]  }
  0x84   :  { %699 = vmatprep.mubr.bf16.mxu0 %v5510_v8  ;;  %812 = vmatprep.mubr.bf16.mxu1 %v5510_v8 }
  0x86   :  { %1216 = vmatpush1.bf16.msra.mxu0 %v4863_v9  ;;  %1329 = vmatpush1.bf16.msra.mxu1 %v4866_v10  ;;  %v4956_v9 = vld [vmem:[#allocation7 + $0x148] ss:$16 sps:$4 sm:$0xff]   ;;  %v4964_v10 = vld [vmem:[#allocation7 + $0x124] ss:$16 sps:$4 sm:$0xff]  }
  0x87   :  { %1217 = vmatprep.subr.bf16.mxu0 %v4874_v11  ;;  %1330 = vmatprep.subr.bf16.mxu1 %v4877_v12  ;;  %v4967_v11 = vld [vmem:[#allocation7 + $0x12c] ss:$16 sps:$4 sm:$0xff]   ;;  %v5564_v12 = vld [vmem:[#allocation4 + $0x80] ss:$8 sps:$4 sm:$0xff]  }
  0x89   :  { %700 = vmatmul.mubr.bf16.gmra.mxu0 %v5516_v13  ;;  %813 = vmatmul.mubr.bf16.gmra.mxu1 %v5516_v13 }
  0x8a   :  { %1218 = vmatpush1.bf16.msra.mxu0 %v4872_v14  ;;  %1331 = vmatpush1.bf16.msra.mxu1 %v4875_v15  ;;  %v4962_v14 = vld [vmem:[#allocation7 + $0x120] ss:$16 sps:$4 sm:$0xff]   ;;  %v4965_v15 = vld [vmem:[#allocation7 + $0x128] ss:$16 sps:$4 sm:$0xff]  }
  0x8b   :  { %1219 = vmatprep.subr.bf16.mxu0 %v4880_v16  ;;  %1332 = vmatprep.subr.bf16.mxu1 %v4883_v17  ;;  %v4970_v16 = vld [vmem:[#allocation7 + $0x104] ss:$16 sps:$4 sm:$0xff]   ;;  %v4973_v17 = vld [vmem:[#allocation7 + $0x10c] ss:$16 sps:$4 sm:$0xff]  }
  0x8c   :  { %709 = vmatprep.mubr.bf16.mxu0 %v5518_v18  ;;  %822 = vmatprep.mubr.bf16.mxu1 %v5518_v18 }
  0x8e   :  { %1220 = vmatpush1.bf16.msra.mxu0 %v4878_v19  ;;  %1333 = vmatpush1.bf16.msra.mxu1 %v4881_v20  ;;  %v4976_v19 = vld [vmem:[#allocation4 + $0x4] ss:$8 sps:$4 sm:$0xff]   ;;  %v4968_v20 = vld [vmem:[#allocation7 + $0x100] ss:$16 sps:$4 sm:$0xff]  }
  0x8f   :  { %1221 = vmatprep.subr.bf16.mxu0 %v4889_v21  ;;  %1334 = vmatprep.subr.bf16.mxu1 %v4892_v22  ;;  %v4971_v21 = vld [vmem:[#allocation7 + $0x108] ss:$16 sps:$4 sm:$0xff]   ;;  %v4979_v22 = vld [vmem:[#allocation7 + $0x4e4] ss:$16 sps:$4 sm:$0xff]  }
  0x91   :  { %710 = vmatmul.mubr.bf16.gmra.mxu0 %v5524_v23  ;;  %823 = vmatmul.mubr.bf16.gmra.mxu1 %v5524_v23 }
  0x92   :  { %1222 = vmatpush1.bf16.msra.mxu0 %v4887_v24  ;;  %1335 = vmatpush1.bf16.msra.mxu1 %v4890_v25  ;;  %v4982_v24 = vld [vmem:[#allocation7 + $0x4ec] ss:$16 sps:$4 sm:$0xff]   ;;  %v4974_v25 = vld [vmem:[#allocation4] ss:$8 sps:$4 sm:$0xff]  }
  0x93   :  { %1223 = vmatprep.subr.bf16.mxu0 %v4895_v26  ;;  %1336 = vmatprep.subr.bf16.mxu1 %v4898_v27  ;;  %v4977_v26 = vld [vmem:[#allocation7 + $0x4e0] ss:$16 sps:$4 sm:$0xff]   ;;  %v4980_v27 = vld [vmem:[#allocation7 + $0x4e8] ss:$16 sps:$4 sm:$0xff]  }
  0x94   :  { %719 = vmatprep.mubr.bf16.mxu0 %v5526_v28  ;;  %832 = vmatprep.mubr.bf16.mxu1 %v5526_v28 }
  0x96   :  { %1224 = vmatpush1.bf16.msra.mxu0 %v4893_v29  ;;  %1337 = vmatpush1.bf16.msra.mxu1 %v4896_v30  ;;  %v4985_v29 = vld [vmem:[#allocation7 + $0x4c4] ss:$16 sps:$4 sm:$0xff]   ;;  %v4988_v30 = vld [vmem:[#allocation7 + $0x4cc] ss:$16 sps:$4 sm:$0xff]  }
  0x97   :  { %1225 = vmatprep.subr.bf16.mxu0 %v4904_v31  ;;  %1338 = vmatprep.subr.bf16.mxu1 %v4907_v32  ;;  %v4983_v31 = vld [vmem:[#allocation7 + $0x4c0] ss:$16 sps:$4 sm:$0xff]   ;;  %v4986_v32 = vld [vmem:[#allocation7 + $0x4c8] ss:$16 sps:$4 sm:$0xff]  }
  0x99   :  { %720 = vmatmul.mubr.bf16.gmra.mxu0 %v5532_v33  ;;  %833 = vmatmul.mubr.bf16.gmra.mxu1 %v5532_v33 }
  0x9a   :  { %1226 = vmatpush1.bf16.msra.mxu0 %v4902_v34  ;;  %1339 = vmatpush1.bf16.msra.mxu1 %v4905_v35  ;;  %v4991_v34 = vld [vmem:[#allocation7 + $0x4a4] ss:$16 sps:$4 sm:$0xff]   ;;  %v4994_v35 = vld [vmem:[#allocation7 + $0x4ac] ss:$16 sps:$4 sm:$0xff]  }
  0x9b   :  { %1227 = vmatprep.subr.bf16.mxu0 %v4910_v36  ;;  %1340 = vmatprep.subr.bf16.mxu1 %v4913_v37  ;;  %v4989_v36 = vld [vmem:[#allocation7 + $0x4a0] ss:$16 sps:$4 sm:$0xff]   ;;  %v4992_v37 = vld [vmem:[#allocation7 + $0x4a8] ss:$16 sps:$4 sm:$0xff]  }
  0x9c   :  { %729 = vmatprep.mubr.bf16.mxu0 %v5534_v38  ;;  %842 = vmatprep.mubr.bf16.mxu1 %v5534_v38 }
  0x9e   :  { %1228 = vmatpush1.bf16.msra.mxu0 %v4908_v39  ;;  %1341 = vmatpush1.bf16.msra.mxu1 %v4911_v40  ;;  %v4997_v39 = vld [vmem:[#allocation7 + $0x484] ss:$16 sps:$4 sm:$0xff]   ;;  %v5000_v40 = vld [vmem:[#allocation7 + $0x48c] ss:$16 sps:$4 sm:$0xff]  }
  0x9f   :  { %1229 = vmatprep.subr.bf16.mxu0 %v4919_v41  ;;  %1342 = vmatprep.subr.bf16.mxu1 %v4922_v42  ;;  %v4995_v41 = vld [vmem:[#allocation7 + $0x480] ss:$16 sps:$4 sm:$0xff]   ;;  %v4998_v42 = vld [vmem:[#allocation7 + $0x488] ss:$16 sps:$4 sm:$0xff]  }
  0xa1   :  { %730 = vmatmul.mubr.bf16.gmra.mxu0 %v5540_v43  ;;  %843 = vmatmul.mubr.bf16.gmra.mxu1 %v5540_v43 }
  0xa2   :  { %1230 = vmatpush2.bf16.msra.mxu0 %v4917_v44  ;;  %1343 = vmatpush2.bf16.msra.mxu1 %v4920_v45  ;;  %v5003_v44 = vld [vmem:[#allocation7 + $0x464] ss:$16 sps:$4 sm:$0xff]   ;;  %v5001_v45 = vld [vmem:[#allocation7 + $0x460] ss:$16 sps:$4 sm:$0xff]  }
  0xa3   :  { %1231 = vmatprep.subr.bf16.mxu0 %v4925_v46  ;;  %1344 = vmatprep.subr.bf16.mxu1 %v4928_v47  ;;  %v5004_v46 = vld [vmem:[#allocation7 + $0x468] ss:$16 sps:$4 sm:$0xff]   ;;  %v5009_v47 = vld [vmem:[#allocation7 + $0x444] ss:$16 sps:$4 sm:$0xff]  }
  0xa4   :  { %739 = vmatprep.mubr.bf16.mxu0 %v5542_v49  ;;  %852 = vmatprep.mubr.bf16.mxu1 %v5542_v49 }
  0xa6   :  { %1232 = vmatpush2.bf16.msra.mxu0 %v4923_v50  ;;  %1345 = vmatpush2.bf16.msra.mxu1 %v4926_v51  ;;  %v5012_v50 = vld [vmem:[#allocation7 + $0x44c] ss:$16 sps:$4 sm:$0xff]   ;;  %v5010_v51 = vld [vmem:[#allocation7 + $0x448] ss:$16 sps:$4 sm:$0xff]  }
  0xa7   :  { %1233 = vmatprep.subr.bf16.mxu0 %v4934_v52  ;;  %1346 = vmatprep.subr.bf16.mxu1 %v4937_v53  ;;  %v5015_v52 = vld [vmem:[#allocation7 + $0x424] ss:$16 sps:$4 sm:$0xff]   ;;  %v5018_v53 = vld [vmem:[#allocation7 + $0x42c] ss:$16 sps:$4 sm:$0xff]  }
  0xa9   :  { %740 = vmatmul.mubr.bf16.gmra.mxu0 %v5548_v54  ;;  %853 = vmatmul.mubr.bf16.gmra.mxu1 %v5548_v54 }
  0xaa   :  { %1234 = vmatpush2.bf16.msra.mxu0 %v4932_v55  ;;  %1347 = vmatpush2.bf16.msra.mxu1 %v4935_v56  ;;  %v5016_v55 = vld [vmem:[#allocation7 + $0x428] ss:$16 sps:$4 sm:$0xff]   ;;  %v5021_v56 = vld [vmem:[#allocation7 + $0x404] ss:$16 sps:$4 sm:$0xff]  }
  0xab   :  { %1235 = vmatprep.subr.bf16.mxu0 %v4940_v57  ;;  %1348 = vmatprep.subr.bf16.mxu1 %v4943_v58  ;;  %v5024_v57 = vld [vmem:[#allocation7 + $0x40c] ss:$16 sps:$4 sm:$0xff]   ;;  %v5019_v58 = vld [vmem:[#allocation7 + $0x400] ss:$16 sps:$4 sm:$0xff]  }
  0xac   :  { %749 = vmatprep.mubr.bf16.mxu0 %v5550_v59  ;;  %862 = vmatprep.mubr.bf16.mxu1 %v5550_v59 }
  0xae   :  { %1236 = vmatpush2.bf16.msra.mxu0 %v4938_v60  ;;  %1349 = vmatpush2.bf16.msra.mxu1 %v4941_v61  ;;  %v5027_v60 = vld [vmem:[#allocation7 + $0x5e4] ss:$16 sps:$4 sm:$0xff]   ;;  %v5030_v61 = vld [vmem:[#allocation7 + $0x5ec] ss:$16 sps:$4 sm:$0xff]  }
  0xaf   :  { %1237 = vmatprep.subr.bf16.mxu0 %v4949_v62  ;;  %1350 = vmatprep.subr.bf16.mxu1 %v4952_v63  ;;  %v5028_v62 = vld [vmem:[#allocation7 + $0x5e8] ss:$16 sps:$4 sm:$0xff]   ;;  %v5033_v63 = vld [vmem:[#allocation7 + $0x5c4] ss:$16 sps:$4 sm:$0xff]  }
  0xb1   :  { %750 = vmatmul.mubr.bf16.gmra.mxu0 %v5556_v0  ;;  %863 = vmatmul.mubr.bf16.gmra.mxu1 %v5556_v0 }
  0xb2   :  { %1238 = vmatpush2.bf16.msra.mxu0 %v4947_v1  ;;  %1351 = vmatpush2.bf16.msra.mxu1 %v4950_v2  ;;  %v5036_v1 = vld [vmem:[#allocation7 + $0x5cc] ss:$16 sps:$4 sm:$0xff]   ;;  %v5031_v2 = vld [vmem:[#allocation7 + $0x5c0] ss:$16 sps:$4 sm:$0xff]  }
  0xb3   :  { %1239 = vmatprep.subr.bf16.mxu0 %v4955_v4  ;;  %1352 = vmatprep.subr.bf16.mxu1 %v4958_v5  ;;  %v5039_v4 = vld [vmem:[#allocation7 + $0x5a4] ss:$16 sps:$4 sm:$0xff]   ;;  %v5042_v5 = vld [vmem:[#allocation7 + $0x5ac] ss:$16 sps:$4 sm:$0xff]  }
  0xb4   :  { %759 = vmatprep.mubr.bf16.mxu0 %v5558_v6  ;;  %872 = vmatprep.mubr.bf16.mxu1 %v5558_v6 }
  0xb6   :  { %1240 = vmatpush2.bf16.msra.mxu0 %v4953_v7  ;;  %1353 = vmatpush2.bf16.msra.mxu1 %v4956_v9  ;;  %v5040_v7 = vld [vmem:[#allocation7 + $0x5a8] ss:$16 sps:$4 sm:$0xff]   ;;  %v5045_v9 = vld [vmem:[#allocation7 + $0x584] ss:$16 sps:$4 sm:$0xff]  }
  0xb7   :  { %1241 = vmatprep.subr.bf16.mxu0 %v4964_v10  ;;  %1354 = vmatprep.subr.bf16.mxu1 %v4967_v11  ;;  %v5048_v10 = vld [vmem:[#allocation7 + $0x58c] ss:$16 sps:$4 sm:$0xff]   ;;  %v5043_v11 = vld [vmem:[#allocation7 + $0x580] ss:$16 sps:$4 sm:$0xff]  }
  0xb9   :  { %760 = vmatmul.mubr.bf16.gmra.mxu0 %v5564_v12  ;;  %873 = vmatmul.mubr.bf16.gmra.mxu1 %v5564_v12 }
  0xba   :  { %1242 = vmatpush2.bf16.msra.mxu0 %v4962_v14  ;;  %1355 = vmatpush2.bf16.msra.mxu1 %v4965_v15  ;;  %v5051_v14 = vld [vmem:[#allocation7 + $0x564] ss:$16 sps:$4 sm:$0xff]   ;;  %v5054_v15 = vld [vmem:[#allocation7 + $0x56c] ss:$16 sps:$4 sm:$0xff]  }
  0xbb   :  { %1243 = vmatprep.subr.bf16.mxu0 %v4970_v16  ;;  %1356 = vmatprep.subr.bf16.mxu1 %v4973_v17  ;;  %v5052_v16 = vld [vmem:[#allocation7 + $0x568] ss:$16 sps:$4 sm:$0xff]   ;;  %v5057_v17 = vld [vmem:[#allocation7 + $0x544] ss:$16 sps:$4 sm:$0xff]  }
  0xbc   :  { %1245 = vmatprep.mubr.bf16.mxu0 %v4976_v19  ;;  %1358 = vmatprep.mubr.bf16.mxu1 %v4976_v19  ;;  %v5060_v19 = vld [vmem:[#allocation7 + $0x54c] ss:$16 sps:$4 sm:$0xff]  }
  0xbe   :  { %1244 = vmatpush2.bf16.msra.mxu0 %v4968_v20  ;;  %1357 = vmatpush2.bf16.msra.mxu1 %v4971_v21  ;;  %v5055_v20 = vld [vmem:[#allocation7 + $0x540] ss:$16 sps:$4 sm:$0xff]   ;;  %v5058_v21 = vld [vmem:[#allocation7 + $0x548] ss:$16 sps:$4 sm:$0xff]  }
  0xbf   :  { %1920 = vmatprep.subr.bf16.mxu0 %v4979_v22  ;;  %2033 = vmatprep.subr.bf16.mxu1 %v4982_v24  ;;  %v5063_v22 = vld [vmem:[#allocation7 + $0x524] ss:$16 sps:$4 sm:$0xff]   ;;  %v5066_v24 = vld [vmem:[#allocation7 + $0x52c] ss:$16 sps:$4 sm:$0xff]  }
  0xc1   :  { %1246 = vmatmul.mubr.bf16.vlgmr.msra.gmra.mxu0 %v4974_v25  ;;  %1359 = vmatmul.mubr.bf16.vlgmr.msra.gmra.mxu1 %v4974_v25  ;;  %v5061_v25 = vld [vmem:[#allocation7 + $0x520] ss:$16 sps:$4 sm:$0xff]  }
  0xc2   :  { %1921 = vmatpush1.bf16.msra.mxu0 %v4977_v26  ;;  %2034 = vmatpush1.bf16.msra.mxu1 %v4980_v27  ;;  %v5064_v26 = vld [vmem:[#allocation7 + $0x528] ss:$16 sps:$4 sm:$0xff]   ;;  %v5069_v27 = vld [vmem:[#allocation7 + $0x504] ss:$16 sps:$4 sm:$0xff]  }
  0xc3   :  { %1922 = vmatprep.subr.bf16.mxu0 %v4985_v29  ;;  %2035 = vmatprep.subr.bf16.mxu1 %v4988_v30  ;;  %v5072_v29 = vld [vmem:[#allocation7 + $0x50c] ss:$16 sps:$4 sm:$0xff]   ;;  %v5067_v30 = vld [vmem:[#allocation7 + $0x500] ss:$16 sps:$4 sm:$0xff]  }
  0xc4   :  { %1255 = vmatprep.mubr.bf16.mxu0 %v5504_v48  ;;  %1368 = vmatprep.mubr.bf16.mxu1 %v5504_v48  ;;  %v5006_v48 = vld [vmem:[#allocation7 + $0x46c] ss:$16 sps:$4 sm:$0xff]  }
  0xc6   :  { %1923 = vmatpush1.bf16.msra.mxu0 %v4983_v31  ;;  %2036 = vmatpush1.bf16.msra.mxu1 %v4986_v32  ;;  %v5070_v31 = vld [vmem:[#allocation7 + $0x508] ss:$16 sps:$4 sm:$0xff]   ;;  %v5274_v32 = vld [vmem:[#allocation4 + $0x24] ss:$8 sps:$4 sm:$0xff]  }
  0xc7   :  { %1924 = vmatprep.subr.bf16.mxu0 %v4991_v34  ;;  %2037 = vmatprep.subr.bf16.mxu1 %v4994_v35  ;;  %v5275_v34 = vld [vmem:[#allocation4 + $0x20] ss:$8 sps:$4 sm:$0xff]   ;;  %v5276_v35 = vld [vmem:[#allocation4 + $0x34] ss:$8 sps:$4 sm:$0xff]  }
  0xc9   :  { %1256 = vmatmul.mubr.bf16.gmra.mxu0 %v5508_v3  ;;  %1369 = vmatmul.mubr.bf16.gmra.mxu1 %v5508_v3  ;;  %v5007_v3 = vld [vmem:[#allocation7 + $0x440] ss:$16 sps:$4 sm:$0xff]  }
  0xca   :  { %1925 = vmatpush1.bf16.msra.mxu0 %v4989_v36  ;;  %2038 = vmatpush1.bf16.msra.mxu1 %v4992_v37  ;;  %v5277_v36 = vld [vmem:[#allocation4 + $0x30] ss:$8 sps:$4 sm:$0xff]   ;;  %v5278_v37 = vld [vmem:[#allocation4 + $0x44] ss:$8 sps:$4 sm:$0xff]  }
  0xcb   :  { %1926 = vmatprep.subr.bf16.mxu0 %v4997_v39  ;;  %2039 = vmatprep.subr.bf16.mxu1 %v5000_v40  ;;  %v5279_v39 = vld [vmem:[#allocation4 + $0x40] ss:$8 sps:$4 sm:$0xff]   ;;  %v5280_v40 = vld [vmem:[#allocation4 + $0x54] ss:$8 sps:$4 sm:$0xff]  }
  0xcc   :  { %1265 = vmatprep.mubr.bf16.mxu0 %v5510_v8  ;;  %1378 = vmatprep.mubr.bf16.mxu1 %v5510_v8  ;;  %v5013_v8 = vld [vmem:[#allocation7 + $0x420] ss:$16 sps:$4 sm:$0xff]  }
  0xce   :  { %1927 = vmatpush1.bf16.msra.mxu0 %v4995_v41  ;;  %2040 = vmatpush1.bf16.msra.mxu1 %v4998_v42  ;;  %v5076_v41 = vld [vmem:[#allocation9 + $0x1e0] ss:$16 sps:$4 sm:$0xff]  }
  0xcf   :  { %1928 = vmatprep.subr.bf16.mxu0 %v5003_v44  ;;  %2041 = vmatprep.subr.bf16.mxu1 %v5006_v48 }
  0xd1   :  { %1266 = vmatmul.mubr.bf16.gmra.mxu0 %v5516_v13  ;;  %1379 = vmatmul.mubr.bf16.gmra.mxu1 %v5516_v13  ;;  %v5022_v13 = vld [vmem:[#allocation7 + $0x408] ss:$16 sps:$4 sm:$0xff]  }
  0xd2   :  { %1929 = vmatpush1.bf16.msra.mxu0 %v5001_v45  ;;  %2042 = vmatpush1.bf16.msra.mxu1 %v5004_v46  ;;  %v5081_v46 = vld [vmem:[#allocation9 + $0x1ec] ss:$16 sps:$4 sm:$0xff]  }
  0xd3   :  { %1930 = vmatprep.subr.bf16.mxu0 %v5009_v47  ;;  %2043 = vmatprep.subr.bf16.mxu1 %v5012_v50  ;;  %v5079_v47 = vld [vmem:[#allocation9 + $0x1e8] ss:$16 sps:$4 sm:$0xff]  }
  0xd4   :  { %1275 = vmatprep.mubr.bf16.mxu0 %v5518_v18  ;;  %1388 = vmatprep.mubr.bf16.mxu1 %v5518_v18  ;;  %v5025_v18 = vld [vmem:[#allocation7 + $0x5e0] ss:$16 sps:$4 sm:$0xff]  }
  0xd6   :  { %1931 = vmatpush1.bf16.msra.mxu0 %v5007_v3  ;;  %2044 = vmatpush1.bf16.msra.mxu1 %v5010_v51 }
  0xd7   :  { %1932 = vmatprep.subr.bf16.mxu0 %v5015_v52  ;;  %2045 = vmatprep.subr.bf16.mxu1 %v5018_v53  ;;  %v5084_v53 = vld [vmem:[#allocation9 + $0x1c4] ss:$16 sps:$4 sm:$0xff]  }
  0xd9   :  { %1276 = vmatmul.mubr.bf16.gmra.mxu0 %v5524_v23  ;;  %1389 = vmatmul.mubr.bf16.gmra.mxu1 %v5524_v23  ;;  %v5034_v23 = vld [vmem:[#allocation7 + $0x5c8] ss:$16 sps:$4 sm:$0xff]  }
  0xda   :  { %1933 = vmatpush1.bf16.msra.mxu0 %v5013_v8  ;;  %2046 = vmatpush1.bf16.msra.mxu1 %v5016_v55  ;;  %v5087_v8 = vld [vmem:[#allocation9 + $0x1cc] ss:$16 sps:$4 sm:$0xff]   ;;  %v5082_v55 = vld [vmem:[#allocation9 + $0x1c0] ss:$16 sps:$4 sm:$0xff]  }
  0xdb   :  { %1934 = vmatprep.subr.bf16.mxu0 %v5021_v56  ;;  %2047 = vmatprep.subr.bf16.mxu1 %v5024_v57  ;;  %v5085_v56 = vld [vmem:[#allocation9 + $0x1c8] ss:$16 sps:$4 sm:$0xff]  }
  0xdc   :  { %1285 = vmatprep.mubr.bf16.mxu0 %v5526_v28  ;;  %1398 = vmatprep.mubr.bf16.mxu1 %v5526_v28  ;;  %v5037_v28 = vld [vmem:[#allocation7 + $0x5a0] ss:$16 sps:$4 sm:$0xff]  }
  0xde   :  { %1935 = vmatpush1.bf16.msra.mxu0 %v5019_v58  ;;  %2048 = vmatpush1.bf16.msra.mxu1 %v5022_v13 }
  0xdf   :  { %1936 = vmatprep.subr.bf16.mxu0 %v5027_v60  ;;  %2049 = vmatprep.subr.bf16.mxu1 %v5030_v61  ;;  %v5090_v61 = vld [vmem:[#allocation9 + $0x1a4] ss:$16 sps:$4 sm:$0xff]  }
  0xe1   :  { %1286 = vmatmul.mubr.bf16.gmra.mxu0 %v5532_v33  ;;  %1399 = vmatmul.mubr.bf16.gmra.mxu1 %v5532_v33  ;;  %v5046_v33 = vld [vmem:[#allocation7 + $0x588] ss:$16 sps:$4 sm:$0xff]  }
  0xe2   :  { %1937 = vmatpush2.bf16.msra.mxu0 %v5025_v18  ;;  %2050 = vmatpush2.bf16.msra.mxu1 %v5028_v62  ;;  %v5093_v18 = vld [vmem:[#allocation9 + $0x1ac] ss:$16 sps:$4 sm:$0xff]   ;;  %v5088_v62 = vld [vmem:[#allocation9 + $0x1a0] ss:$16 sps:$4 sm:$0xff]  }
  0xe3   :  { %1938 = vmatprep.subr.bf16.mxu0 %v5033_v63  ;;  %2051 = vmatprep.subr.bf16.mxu1 %v5036_v1  ;;  %v5091_v63 = vld [vmem:[#allocation9 + $0x1a8] ss:$16 sps:$4 sm:$0xff]  }
  0xe4   :  { %1295 = vmatprep.mubr.bf16.mxu0 %v5534_v38  ;;  %1408 = vmatprep.mubr.bf16.mxu1 %v5534_v38  ;;  %v5049_v38 = vld [vmem:[#allocation7 + $0x560] ss:$16 sps:$4 sm:$0xff]  }
  0xe6   :  { %1939 = vmatpush2.bf16.msra.mxu0 %v5031_v2  ;;  %2052 = vmatpush2.bf16.msra.mxu1 %v5034_v23 }
  0xe7   :  { %1940 = vmatprep.subr.bf16.mxu0 %v5039_v4  ;;  %2053 = vmatprep.subr.bf16.mxu1 %v5042_v5  ;;  %v5096_v5 = vld [vmem:[#allocation9 + $0x184] ss:$16 sps:$4 sm:$0xff]  }
  0xe9   :  { %1296 = vmatmul.mubr.bf16.gmra.mxu0 %v5540_v43  ;;  %1409 = vmatmul.mubr.bf16.gmra.mxu1 %v5540_v43 }
  0xea   :  { %1941 = vmatpush2.bf16.msra.mxu0 %v5037_v28  ;;  %2054 = vmatpush2.bf16.msra.mxu1 %v5040_v7  ;;  %v5099_v28 = vld [vmem:[#allocation9 + $0x18c] ss:$16 sps:$4 sm:$0xff]  }
  0xeb   :  { %1942 = vmatprep.subr.bf16.mxu0 %v5045_v9  ;;  %2055 = vmatprep.subr.bf16.mxu1 %v5048_v10  ;;  %v5094_v10 = vld [vmem:[#allocation9 + $0x180] ss:$16 sps:$4 sm:$0xff]  }
  0xec   :  { %1305 = vmatprep.mubr.bf16.mxu0 %v5542_v49  ;;  %1418 = vmatprep.mubr.bf16.mxu1 %v5542_v49 }
  0xee   :  { %1943 = vmatpush2.bf16.msra.mxu0 %v5043_v11  ;;  %2056 = vmatpush2.bf16.msra.mxu1 %v5046_v33  ;;  %v5097_v11 = vld [vmem:[#allocation9 + $0x188] ss:$16 sps:$4 sm:$0xff]  }
  0xef   :  { %1944 = vmatprep.subr.bf16.mxu0 %v5051_v14  ;;  %2057 = vmatprep.subr.bf16.mxu1 %v5054_v15  ;;  %v5102_v15 = vld [vmem:[#allocation9 + $0x164] ss:$16 sps:$4 sm:$0xff]  }
  0xf1   :  { %1306 = vmatmul.mubr.bf16.gmra.mxu0 %v5548_v54  ;;  %1419 = vmatmul.mubr.bf16.gmra.mxu1 %v5548_v54 }
  0xf2   :  { %1945 = vmatpush2.bf16.msra.mxu0 %v5049_v38  ;;  %2058 = vmatpush2.bf16.msra.mxu1 %v5052_v16  ;;  %v5105_v38 = vld [vmem:[#allocation9 + $0x16c] ss:$16 sps:$4 sm:$0xff]  }
  0xf3   :  { %1946 = vmatprep.subr.bf16.mxu0 %v5057_v17  ;;  %2059 = vmatprep.subr.bf16.mxu1 %v5060_v19  ;;  %v5100_v19 = vld [vmem:[#allocation9 + $0x160] ss:$16 sps:$4 sm:$0xff]  }
  0xf4   :  { %1315 = vmatprep.mubr.bf16.mxu0 %v5550_v59  ;;  %1428 = vmatprep.mubr.bf16.mxu1 %v5550_v59 }
  0xf6   :  { %1947 = vmatpush2.bf16.msra.mxu0 %v5055_v20  ;;  %2060 = vmatpush2.bf16.msra.mxu1 %v5058_v21  ;;  %v5103_v20 = vld [vmem:[#allocation9 + $0x168] ss:$16 sps:$4 sm:$0xff]  }
  0xf7   :  { %1948 = vmatprep.subr.bf16.mxu0 %v5063_v22  ;;  %2061 = vmatprep.subr.bf16.mxu1 %v5066_v24  ;;  %v5108_v24 = vld [vmem:[#allocation9 + $0x144] ss:$16 sps:$4 sm:$0xff]  }
  0xf9   :  { %1316 = vmatmul.mubr.bf16.gmra.mxu0 %v5556_v0  ;;  %1429 = vmatmul.mubr.bf16.gmra.mxu1 %v5556_v0 }
  0xfa   :  { %1949 = vmatpush2.bf16.msra.mxu0 %v5061_v25  ;;  %2062 = vmatpush2.bf16.msra.mxu1 %v5064_v26  ;;  %v5111_v25 = vld [vmem:[#allocation9 + $0x14c] ss:$16 sps:$4 sm:$0xff]  }
  0xfb   :  { %1950 = vmatprep.subr.bf16.mxu0 %v5069_v27  ;;  %2063 = vmatprep.subr.bf16.mxu1 %v5072_v29  ;;  %v5106_v29 = vld [vmem:[#allocation9 + $0x140] ss:$16 sps:$4 sm:$0xff]  }
  0xfc   :  { %1952 = vmatprep.mubr.bf16.mxu0 %v5274_v32  ;;  %2065 = vmatprep.mubr.bf16.mxu1 %v5274_v32 }
  0xfe   :  { %1951 = vmatpush2.bf16.msra.mxu0 %v5067_v30  ;;  %2064 = vmatpush2.bf16.msra.mxu1 %v5070_v31  ;;  %v5109_v30 = vld [vmem:[#allocation9 + $0x148] ss:$16 sps:$4 sm:$0xff]  }
  0xff   :  { %2661 = vmatprep.subr.bf16.mxu1 %v5081_v46 }
 0x101   :  { %1953 = vmatmul.mubr.bf16.vlgmr.msra.gmra.mxu0 %v5275_v34  ;;  %2066 = vmatmul.mubr.bf16.vlgmr.msra.gmra.mxu1 %v5275_v34  ;;  %v5114_v34 = vld [vmem:[#allocation9 + $0x124] ss:$16 sps:$4 sm:$0xff]  }
 0x102   :  { %1962 = vmatprep.mubr.bf16.mxu0 %v5276_v35  ;;  %2075 = vmatprep.mubr.bf16.mxu1 %v5276_v35  ;;  %v5117_v35 = vld [vmem:[#allocation9 + $0x12c] ss:$16 sps:$4 sm:$0xff]  }
 0x103   :  { %2662 = vmatpush1.bf16.msra.mxu1 %v5079_v47 }
 0x104   :  { %2663 = vmatprep.subr.bf16.mxu1 %v5087_v8  ;;  %v5121_v8 = vld [vmem:[#allocation9 + $0x108] ss:$16 sps:$4 sm:$0xff]  }
 0x107   :  { %2664 = vmatpush1.bf16.msra.mxu1 %v5085_v56 }
 0x108   :  { %2665 = vmatprep.subr.bf16.mxu1 %v5093_v18 }
 0x109   :  { %1963 = vmatmul.mubr.bf16.gmra.mxu0 %v5277_v36  ;;  %2076 = vmatmul.mubr.bf16.gmra.mxu1 %v5277_v36 }
 0x10a   :  { %1972 = vmatprep.mubr.bf16.mxu0 %v5278_v37  ;;  %2085 = vmatprep.mubr.bf16.mxu1 %v5278_v37 }
 0x10b   :  { %2666 = vmatpush1.bf16.msra.mxu1 %v5091_v63 }
 0x10c   :  { %2667 = vmatprep.subr.bf16.mxu1 %v5099_v28 }
 0x10f   :  { %2668 = vmatpush1.bf16.msra.mxu1 %v5097_v11 }
 0x110   :  { %2669 = vmatprep.subr.bf16.mxu1 %v5105_v38 }
 0x111   :  { %1973 = vmatmul.mubr.bf16.gmra.mxu0 %v5279_v39  ;;  %2086 = vmatmul.mubr.bf16.gmra.mxu1 %v5279_v39  ;;  %v5112_v39 = vld [vmem:[#allocation9 + $0x120] ss:$16 sps:$4 sm:$0xff]  }
 0x112   :  { %1982 = vmatprep.mubr.bf16.mxu0 %v5280_v40  ;;  %2095 = vmatprep.mubr.bf16.mxu1 %v5280_v40  ;;  %v5115_v40 = vld [vmem:[#allocation9 + $0x128] ss:$16 sps:$4 sm:$0xff]  }
 0x113   :  { %2670 = vmatpush1.bf16.msra.mxu1 %v5103_v20 }
 0x114   :  { %2671 = vmatprep.subr.bf16.mxu1 %v5111_v25 }
 0x117   :  { %2672 = vmatpush1.bf16.msra.mxu1 %v5109_v30 }
 0x118   :  { %2673 = vmatprep.subr.bf16.mxu1 %v5117_v35 }
 0x119   :  { %1983 = vmatmul.mubr.bf16.gmra.mxu0 %v5540_v43  ;;  %2096 = vmatmul.mubr.bf16.gmra.mxu1 %v5540_v43  ;;  %v5073_v43 = vld [vmem:[#allocation4 + $0x94] ss:$8 sps:$4 sm:$0xff]  }
 0x11a   :  { %1992 = vmatprep.mubr.bf16.mxu0 %v5542_v49  ;;  %2105 = vmatprep.mubr.bf16.mxu1 %v5542_v49  ;;  %v5075_v49 = vld [vmem:[#allocation4 + $0x90] ss:$8 sps:$4 sm:$0xff]  }
 0x11b   :  { %2674 = vmatpush1.bf16.msra.mxu1 %v5115_v40 }
 0x121   :  { %1993 = vmatmul.mubr.bf16.gmra.mxu0 %v5548_v54  ;;  %2106 = vmatmul.mubr.bf16.gmra.mxu1 %v5548_v54 }
 0x122   :  { %2002 = vmatprep.mubr.bf16.mxu0 %v5550_v59  ;;  %2115 = vmatprep.mubr.bf16.mxu1 %v5550_v59 }
 0x129   :  { %2003 = vmatmul.mubr.bf16.gmra.mxu0 %v5556_v0  ;;  %2116 = vmatmul.mubr.bf16.gmra.mxu1 %v5556_v0  ;;  %v5078_v0 = vld [vmem:[#allocation9 + $0x1e4] ss:$16 sps:$4 sm:$0xff]  }
 0x12a   :  { %2012 = vmatprep.mubr.bf16.mxu0 %v5558_v6  ;;  %2125 = vmatprep.mubr.bf16.mxu1 %v5558_v6 }
 0x12b   :  { %2588 = vmatprep.subr.bf16.mxu0 %v5078_v0  ;;  %v5123_v0 = vld [vmem:[#allocation9 + $0x10c] ss:$16 sps:$4 sm:$0xff]  }
 0x12c   :  { %2589 = vmatpush1.bf16.msra.mxu0 %v5076_v41  ;;  %v5120_v41 = vld [vmem:[#allocation9 + $0x104] ss:$16 sps:$4 sm:$0xff]   ;;  %2675 = vmatprep.subr.bf16.mxu1 %v5123_v0 }
 0x12d   :  { %2590 = vmatprep.subr.bf16.mxu0 %v5084_v53  ;;  %v5118_v53 = vld [vmem:[#allocation9 + $0x100] ss:$16 sps:$4 sm:$0xff]   ;;  %2676 = vmatpush1.bf16.msra.mxu1 %v5121_v8 }
 0x130   :  { %2591 = vmatpush1.bf16.msra.mxu0 %v5082_v55 }
 0x131   :  { %2013 = vmatmul.mubr.bf16.gmra.mxu0 %v5564_v12  ;;  %2126 = vmatmul.mubr.bf16.gmra.mxu1 %v5564_v12 }
 0x132   :  { %2022 = vmatprep.mubr.bf16.mxu0 %v5073_v43  ;;  %2135 = vmatprep.mubr.bf16.mxu1 %v5073_v43 }
 0x133   :  { %2592 = vmatprep.subr.bf16.mxu0 %v5090_v61 }
 0x134   :  { %2593 = vmatpush1.bf16.msra.mxu0 %v5088_v62  ;;  %v6260_v62 = vmov 0  }
 0x135   :  { %2594 = vmatprep.subr.bf16.mxu0 %v5096_v5  ;;  %102 = vst [vmem:[#allocation2] sm:$0xf] %v6260_v62  ;;  %103 = vst [vmem:[#allocation2 + $0x4] sm:$0xf] %v6260_v62 }
 0x136   :  { %104 = vst [vmem:[#allocation2 + $0x28] sm:$0xf] %v6260_v62  ;;  %105 = vst [vmem:[#allocation2 + $0x2c] sm:$0xf] %v6260_v62 }
 0x137   :  { %106 = vst [vmem:[#allocation3] sm:$0xf] %v6260_v62  ;;  %107 = vst [vmem:[#allocation3 + $0x4] sm:$0xf] %v6260_v62 }
 0x138   :  { %2595 = vmatpush1.bf16.msra.mxu0 %v5094_v10  ;;  %108 = vst [vmem:[#allocation3 + $0x18] sm:$0xf] %v6260_v62  ;;  %109 = vst [vmem:[#allocation3 + $0x1c] sm:$0xf] %v6260_v62 }
 0x139   :  { %2023 = vmatmul.mubr.bf16.gmra.mxu0 %v5075_v49  ;;  %2136 = vmatmul.mubr.bf16.gmra.mxu1 %v5075_v49 }
 0x13a   :  { %2596 = vmatprep.subr.bf16.mxu0 %v5102_v15  ;;  %2620 = vmatprep.mubr.bf16.mxu0 %v6260_v62 }
 0x13b   :  { %2693 = vmatprep.mubr.bf16.mxu1 %v6260_v62 }
 0x13c   :  { %2597 = vmatpush1.bf16.msra.mxu0 %v5100_v19 }
 0x13d   :  { %2598 = vmatprep.subr.bf16.mxu0 %v5108_v24 }
 0x140   :  { %2599 = vmatpush1.bf16.msra.mxu0 %v5106_v29 }
 0x141   :  { %v5610_v54 = vpop.f32.mrf.mxu0  ;;  %v5612_v59 = vpop.f32.mrf.mxu1  ;;  %2600 = vmatprep.subr.bf16.mxu0 %v5114_v34 }
 0x143   :  { %v5614_v42 = vpop.f32.mrf.mxu0  ;;  %v5616_v44 = vpop.f32.mrf.mxu1 }
 0x144   :  { %2601 = vmatpush1.bf16.msra.mxu0 %v5112_v39 }
 0x145   :  { %v5618_v6 = vpop.f32.mrf.mxu0  ;;  %v5620_v48 = vpop.f32.mrf.mxu1  ;;  %2602 = vmatprep.subr.bf16.mxu0 %v5120_v41 }
 0x147   :  { %v5622_v12 = vpop.f32.mrf.mxu0  ;;  %v5624_v45 = vpop.f32.mrf.mxu1 }
 0x148   :  { %2603 = vmatpush1.bf16.msra.mxu0 %v5118_v53 }
 0x149   :  { %v5626_v50 = vpop.f32.mrf.mxu0  ;;  %v5628_v3 = vpop.f32.mrf.mxu1 }
 0x14b   :  { %v5630_v51 = vpop.f32.mrf.mxu0  ;;  %v5632_v52 = vpop.f32.mrf.mxu1 }
 0x14d   :  { %v5634_v57 = vpop.f32.mrf.mxu0  ;;  %v5636_v58 = vpop.f32.mrf.mxu1 }
 0x14f   :  { %v5638_v13 = vpop.f32.mrf.mxu0  ;;  %v5640_v60 = vpop.f32.mrf.mxu1 }
 0x150   :  { %6263 = vst [vmem:[#allocation18_spill] sm:$0xff] %v5640_v60 }
 0x151   :  { %v5642_v1 = vpop.f32.mrf.mxu0  ;;  %v5644_v2 = vpop.f32.mrf.mxu1 }
 0x153   :  { %v5646_v23 = vpop.f32.mrf.mxu0  ;;  %v5648_v4 = vpop.f32.mrf.mxu1 }
 0x155   :  { %v5650_v7 = vpop.f32.mrf.mxu0  ;;  %v5652_v9 = vpop.f32.mrf.mxu1 }
 0x157   :  { %v5654_v33 = vpop.f32.mrf.mxu0  ;;  %v5656_v14 = vpop.f32.mrf.mxu1 }
 0x158   :  { %6264 = vst [vmem:[#allocation19_spill] sm:$0xff] %v5654_v33  ;;  %6265 = vst [vmem:[#allocation20_spill] sm:$0xff] %v5656_v14 }
 0x159   :  { %v5658_v16 = vpop.f32.mrf.mxu0  ;;  %v5660_v17 = vpop.f32.mrf.mxu1 }
 0x15b   :  { %v5662_v21 = vpop.f32.mrf.mxu0  ;;  %v5664_v22 = vpop.f32.mrf.mxu1 }
 0x15d   :  { %v5666_v26 = vpop.f32.mrf.mxu0  ;;  %v5668_v27 = vpop.f32.mrf.mxu1 }
 0x15e   :  { %6266 = vst [vmem:[#allocation21_spill] sm:$0xff] %v5668_v27 }
 0x15f   :  { %v5670_v31 = vpop.f32.mrf.mxu0  ;;  %v5672_v32 = vpop.f32.mrf.mxu1 }
 0x160   :  { %6267 = vst [vmem:[#allocation22_spill] sm:$0xff] %v5670_v31  ;;  %6268 = vst [vmem:[#allocation23_spill] sm:$0xff] %v5672_v32 }
 0x161   :  { %v5674_v36 = vpop.f32.mrf.mxu0  ;;  %v5676_v37 = vpop.f32.mrf.mxu1 }
 0x163   :  { %v5678_v43 = vpop.f32.mrf.mxu0  ;;  %v5680_v49 = vpop.f32.mrf.mxu1 }
 0x165   :  { %v5682_v46 = vpop.f32.mrf.mxu0  ;;  %v5684_v47 = vpop.f32.mrf.mxu1 }
 0x167   :  { %v5686_v55 = vpop.f32.mrf.mxu0  ;;  %v5688_v56 = vpop.f32.mrf.mxu1 }
 0x168   :  { %6269 = vst [vmem:[#allocation24_spill] sm:$0xff] %v5686_v55  ;;  %6270 = vst [vmem:[#allocation25_spill] sm:$0xff] %v5688_v56 }
 0x169   :  { %v5690_v61 = vpop.f32.mrf.mxu0  ;;  %v5692_v18 = vpop.f32.mrf.mxu1 }
 0x16b   :  { %v5704_v63 = vpop.f32.mrf.mxu0  ;;  %v5706_v5 = vpop.f32.mrf.mxu1 }
 0x16d   :  { %v5708_v28 = vpop.f32.mrf.mxu0  ;;  %v5710_v10 = vpop.f32.mrf.mxu1 }
 0x16e   :  { %6271 = vst [vmem:[#allocation26_spill] sm:$0xff] %v5710_v10 }
 0x16f   :  { %v5712_v11 = vpop.f32.mrf.mxu0  ;;  %v5714_v15 = vpop.f32.mrf.mxu1 }
 0x170   :  { %6272 = vst [vmem:[#allocation27_spill] sm:$0xff] %v5712_v11  ;;  %6273 = vst [vmem:[#allocation28_spill] sm:$0xff] %v5714_v15  ;;  %v5128_v15 = vld [vmem:[#allocation9 + $0xe4] ss:$16 sps:$4 sm:$0xff]  }
 0x171   :  { %v5716_v38 = vpop.f32.mrf.mxu0  ;;  %v5718_v19 = vpop.f32.mrf.mxu1  ;;  %2900 = vmatprep.subr.bf16.mxu0 %v5128_v15 }
 0x173   :  { %v5720_v20 = vpop.f32.mrf.mxu0  ;;  %v5722_v24 = vpop.f32.mrf.mxu1 }
 0x175   :  { %v5724_v25 = vpop.f32.mrf.mxu0  ;;  %v5726_v29 = vpop.f32.mrf.mxu1 }
 0x177   :  { %v5728_v30 = vpop.f32.mrf.mxu0  ;;  %v5730_v34 = vpop.f32.mrf.mxu1 }
 0x178   :  { %6274 = vst [vmem:[#allocation29_spill] sm:$0xff] %v5728_v30  ;;  %6275 = vst [vmem:[#allocation30_spill] sm:$0xff] %v5730_v34  ;;  %v5131_v30 = vld [vmem:[#allocation9 + $0xec] ss:$16 sps:$4 sm:$0xff]  }
 0x179   :  { %v5732_v35 = vpop.f32.mrf.mxu0  ;;  %v5734_v39 = vpop.f32.mrf.mxu1  ;;  %2973 = vmatprep.subr.bf16.mxu1 %v5131_v30 }
 0x17b   :  { %v5736_v40 = vpop.f32.mrf.mxu0  ;;  %v5738_v41 = vpop.f32.mrf.mxu1 }
 0x17d   :  { %v5740_v0 = vpop.f32.mrf.mxu0  ;;  %v5742_v53 = vpop.f32.mrf.mxu1 }
 0x17e   :  { %6276 = vst [vmem:[#allocation31_spill] sm:$0xff] %v5742_v53 }
 0x17f   :  { %v5744_v8 = vpop.f32.mrf.mxu0  ;;  %v5746_v62 = vpop.f32.mrf.mxu1 }
 0x180   :  { %6277 = vst [vmem:[#allocation32_spill] sm:$0xff] %v5744_v8  ;;  %6278 = vst [vmem:[#allocation33_spill] sm:$0xff] %v5746_v62 }
 0x181   :  { %v1247_v10 = vpop.f32.mrf.mxu0  ;;  %v1360_v34 = vpop.f32.mrf.mxu1 }
 0x182   :  { %v5749_v11 = vadd.f32 %v1247_v10, %v5610_v54  ;;  %v5752_v56 = vadd.f32 %v1360_v34, %v5612_v59 }
 0x183   :  { %v1249_v55 = vpop.f32.mrf.mxu0  ;;  %v1362_v32 = vpop.f32.mrf.mxu1 }
 0x184   :  { %v5755_v53 = vadd.f32 %v1249_v55, %v5614_v42  ;;  %v5758_v8 = vadd.f32 %v1362_v32, %v5616_v44 }
 0x185   :  { %v1251_v62 = vpop.f32.mrf.mxu0  ;;  %v1364_v27 = vpop.f32.mrf.mxu1 }
 0x186   :  { %v5761_v31 = vadd.f32 %v1251_v62, %v5618_v6  ;;  %v5764_v54 = vadd.f32 %v1364_v27, %v5620_v48 }
 0x187   :  { %v5766_v59 = vpop.f32.mrf.mxu0  ;;  %v5768_v10 = vpop.f32.mrf.mxu1 }
 0x189   :  { %v1257_v15 = vpop.f32.mrf.mxu0  ;;  %v1370_v30 = vpop.f32.mrf.mxu1 }
 0x18a   :  { %v5771_v42 = vadd.f32 %v1257_v15, %v5626_v50  ;;  %v5774_v44 = vadd.f32 %v1370_v30, %v5628_v3 }
 0x18b   :  { %v1259_v32 = vpop.f32.mrf.mxu0  ;;  %v1372_v55 = vpop.f32.mrf.mxu1 }
 0x18c   :  { %v5777_v6 = vadd.f32 %v1259_v32, %v5630_v51  ;;  %v5780_v48 = vadd.f32 %v1372_v55, %v5632_v52 }
 0x18d   :  { %v1261_v27 = vpop.f32.mrf.mxu0  ;;  %v5782_v62 = vpop.f32.mrf.mxu1 }
 0x18e   :  { %v5785_v34 = vadd.f32 %v1261_v27, %v5634_v57 }
 0x18f   :  { %v5787_v14 = vpop.f32.mrf.mxu0  ;;  %v5789_v50 = vpop.f32.mrf.mxu1 }
 0x190   :  { %6279 = vst [vmem:[#allocation34_spill] sm:$0xff] %v5789_v50 }
 0x191   :  { %v1267_v3 = vpop.f32.mrf.mxu0  ;;  %v1380_v15 = vpop.f32.mrf.mxu1 }
 0x192   :  { %v5792_v30 = vadd.f32 %v1267_v3, %v5642_v1  ;;  %v5795_v51 = vadd.f32 %v1380_v15, %v5644_v2 }
 0x193   :  { %v1269_v52 = vpop.f32.mrf.mxu0  ;;  %v1382_v32 = vpop.f32.mrf.mxu1 }
 0x194   :  { %v5798_v55 = vadd.f32 %v1269_v52, %v5646_v23  ;;  %v5801_v57 = vadd.f32 %v1382_v32, %v5648_v4 }
 0x195   :  { %v1271_v27 = vpop.f32.mrf.mxu0  ;;  %v1384_v33 = vpop.f32.mrf.mxu1 }
 0x196   :  { %v5804_v50 = vadd.f32 %v1271_v27, %v5650_v7  ;;  %v5807_v60 = vadd.f32 %v1384_v33, %v5652_v9 }
 0x197   :  { %v5809_v1 = vpop.f32.mrf.mxu0  ;;  %v5811_v2 = vpop.f32.mrf.mxu1 }
 0x198   :  { %6280 = vst [vmem:[#allocation35_spill] sm:$0xff] %v5807_v60  ;;  %6281 = vst [vmem:[#allocation36_spill] sm:$0xff] %v5811_v2 }
 0x199   :  { %v1277_v3 = vpop.f32.mrf.mxu0  ;;  %v1390_v15 = vpop.f32.mrf.mxu1 }
 0x19a   :  { %v5814_v23 = vadd.f32 %v1277_v3, %v5658_v16  ;;  %v5817_v4 = vadd.f32 %v1390_v15, %v5660_v17 }
 0x19b   :  { %v1279_v52 = vpop.f32.mrf.mxu0  ;;  %v1392_v32 = vpop.f32.mrf.mxu1 }
 0x19c   :  { %v5820_v7 = vadd.f32 %v1279_v52, %v5662_v21  ;;  %v5823_v9 = vadd.f32 %v1392_v32, %v5664_v22 }
 0x19d   :  { %v1281_v33 = vpop.f32.mrf.mxu0  ;;  %v5825_v27 = vpop.f32.mrf.mxu1 }
 0x19e   :  { %6282 = vst [vmem:[#allocation37_spill] sm:$0xff] %v5823_v9  ;;  %v5828_v60 = vadd.f32 %v1281_v33, %v5666_v26 }
 0x19f   :  { %v5830_v2 = vpop.f32.mrf.mxu0  ;;  %v5832_v16 = vpop.f32.mrf.mxu1 }
 0x1a0   :  { %6283 = vst [vmem:[#allocation38_spill] sm:$0xff] %v5828_v60  ;;  %6284 = vst [vmem:[#allocation39_spill] sm:$0xff] %v5832_v16 }
 0x1a1   :  { %v1287_v17 = vpop.f32.mrf.mxu0  ;;  %v1400_v3 = vpop.f32.mrf.mxu1 }
 0x1a2   :  { %v5835_v15 = vadd.f32 %v1287_v17, %v5674_v36  ;;  %v5838_v21 = vadd.f32 %v1400_v3, %v5676_v37 }
 0x1a3   :  { %v1289_v22 = vpop.f32.mrf.mxu0  ;;  %v1402_v52 = vpop.f32.mrf.mxu1 }
 0x1a4   :  { %v5841_v32 = vadd.f32 %v1289_v22, %v5678_v43  ;;  %v5844_v26 = vadd.f32 %v1402_v52, %v5680_v49 }
 0x1a5   :  { %v1291_v33 = vpop.f32.mrf.mxu0  ;;  %v1404_v60 = vpop.f32.mrf.mxu1 }
 0x1a6   :  { %v5847_v16 = vadd.f32 %v1291_v33, %v5682_v46  ;;  %v5850_v9 = vadd.f32 %v1404_v60, %v5684_v47 }
 0x1a7   :  { %v5852_v36 = vpop.f32.mrf.mxu0  ;;  %v5854_v37 = vpop.f32.mrf.mxu1 }
 0x1a8   :  { %6285 = vst [vmem:[#allocation40_spill] sm:$0xff] %v5850_v9  ;;  %6286 = vst [vmem:[#allocation41_spill] sm:$0xff] %v5854_v37 }
 0x1a9   :  { %v1297_v17 = vpop.f32.mrf.mxu0  ;;  %v1410_v3 = vpop.f32.mrf.mxu1 }
 0x1aa   :  { %v5857_v43 = vadd.f32 %v1297_v17, %v5690_v61  ;;  %v5860_v49 = vadd.f32 %v1410_v3, %v5692_v18 }
 0x1ab   :  { %v1299_v22 = vpop.f32.mrf.mxu0  ;;  %v1412_v52 = vpop.f32.mrf.mxu1 }
 0x1ac   :  { %v5863_v46 = vadd.f32 %v1299_v22, %v5704_v63  ;;  %v5866_v60 = vadd.f32 %v1412_v52, %v5706_v5 }
 0x1ad   :  { %v1301_v47 = vpop.f32.mrf.mxu0  ;;  %v5868_v33 = vpop.f32.mrf.mxu1 }
 0x1ae   :  { %6287 = vst [vmem:[#allocation42_spill] sm:$0xff] %v5866_v60  ;;  %v5871_v9 = vadd.f32 %v1301_v47, %v5708_v28 }
 0x1af   :  { %v5873_v37 = vpop.f32.mrf.mxu0  ;;  %v5875_v61 = vpop.f32.mrf.mxu1 }
 0x1b0   :  { %6288 = vst [vmem:[#allocation43_spill] sm:$0xff] %v5871_v9  ;;  %6289 = vst [vmem:[#allocation44_spill] sm:$0xff] %v5875_v61 }
 0x1b1   :  { %v1307_v18 = vpop.f32.mrf.mxu0  ;;  %v1420_v17 = vpop.f32.mrf.mxu1 }
 0x1b2   :  { %v5878_v3 = vadd.f32 %v1307_v18, %v5716_v38  ;;  %v5881_v63 = vadd.f32 %v1420_v17, %v5718_v19 }
 0x1b3   :  { %v1309_v5 = vpop.f32.mrf.mxu0  ;;  %v1422_v22 = vpop.f32.mrf.mxu1 }
 0x1b4   :  { %6290 = vst [vmem:[#allocation45_spill] sm:$0xff] %v5881_v63  ;;  %v5884_v52 = vadd.f32 %v1309_v5, %v5720_v20  ;;  %v5887_v28 = vadd.f32 %v1422_v22, %v5722_v24 }
 0x1b5   :  { %v1311_v47 = vpop.f32.mrf.mxu0  ;;  %v1424_v9 = vpop.f32.mrf.mxu1 }
 0x1b6   :  { %6291 = vst [vmem:[#allocation46_spill] sm:$0xff] %v5887_v28  ;;  %v5890_v61 = vadd.f32 %v1311_v47, %v5724_v25  ;;  %v5893_v60 = vadd.f32 %v1424_v9, %v5726_v29 }
 0x1b7   :  { %v5895_v38 = vpop.f32.mrf.mxu0  ;;  %v5897_v19 = vpop.f32.mrf.mxu1 }
 0x1b8   :  { %6292 = vst [vmem:[#allocation47_spill] sm:$0xff] %v5890_v61  ;;  %6293 = vst [vmem:[#allocation48_spill] sm:$0xff] %v5893_v60 }
 0x1b9   :  { %6294 = vst [vmem:[#allocation49_spill] sm:$0xff] %v5897_v19  ;;  %v1317_v18 = vpop.f32.mrf.mxu0  ;;  %v1430_v17 = vpop.f32.mrf.mxu1 }
 0x1ba   :  { %v5900_v20 = vadd.f32 %v1317_v18, %v5732_v35  ;;  %v5903_v24 = vadd.f32 %v1430_v17, %v5734_v39 }
 0x1bb   :  { %v1319_v5 = vpop.f32.mrf.mxu0  ;;  %v1432_v22 = vpop.f32.mrf.mxu1 }
 0x1bc   :  { %6295 = vst [vmem:[#allocation50_spill] sm:$0xff] %v5900_v20  ;;  %6296 = vst [vmem:[#allocation51_spill] sm:$0xff] %v5903_v24  ;;  %v5906_v25 = vadd.f32 %v1319_v5, %v5736_v40  ;;  %v5909_v29 = vadd.f32 %v1432_v22, %v5738_v41 }
 0x1bd   :  { %v1321_v9 = vpop.f32.mrf.mxu0  ;;  %v5911_v47 = vpop.f32.mrf.mxu1 }
 0x1be   :  { %6297 = vst [vmem:[#allocation52_spill] sm:$0xff] %v5906_v25  ;;  %6298 = vst [vmem:[#allocation53_spill] sm:$0xff] %v5909_v29  ;;  %v5914_v60 = vadd.f32 %v1321_v9, %v5740_v0  ;;  %v1254_v29 = vadd.f32 %v5766_v59, %v5622_v12 }
 0x1bf   :  { %6299 = vst [vmem:[#allocation54_spill] sm:$0xff] %v5911_v47  ;;  %v5916_v19 = vpop.f32.mrf.mxu0  ;;  %v5918_v35 = vpop.f32.mrf.mxu1 }
 0x1c0   :  { %6300 = vst [vmem:[#allocation55_spill] sm:$0xff] %v5914_v60  ;;  %6301 = vst [vmem:[#allocation56_spill] sm:$0xff] %v5916_v19 }
 0x1c1   :  { %6302 = vst [vmem:[#allocation57_spill] sm:$0xff] %v5918_v35  ;;  %v1954_v39 = vpop.f32.mrf.mxu0  ;;  %v2067_v18 = vpop.f32.mrf.mxu1 }
 0x1c2   :  { %v2146_v40 = vadd.f32 %v1954_v39, %v5749_v11  ;;  %v2148_v0 = vadd.f32 %v2067_v18, %v5752_v56 }
 0x1c3   :  { %v1956_v17 = vpop.f32.mrf.mxu0  ;;  %v2069_v24 = vpop.f32.mrf.mxu1 }
 0x1c4   :  { %v2147_v5 = vadd.f32 %v1956_v17, %v5755_v53  ;;  %v2149_v35 = vadd.f32 %v2069_v24, %v5758_v8  ;;  %v1264_v8 = vadd.f32 %v5787_v14, %v5638_v13 }
 0x1c5   :  { %v1958_v41 = vpop.f32.mrf.mxu0  ;;  %v2071_v22 = vpop.f32.mrf.mxu1 }
 0x1c6   :  { %v2210_v9 = vmax.f32 %v2146_v40, %v2147_v5  ;;  %v2150_v25 = vadd.f32 %v1958_v41, %v5761_v31  ;;  %v2152_v53 = vadd.f32 %v2071_v22, %v5764_v54 }
 0x1c7   :  { %v1960_v60 = vpop.f32.mrf.mxu0  ;;  %v2073_v47 = vpop.f32.mrf.mxu1 }
 0x1c8   :  { %v2226_v19 = vmax.f32 %v2210_v9, %v2148_v0  ;;  %v2151_v20 = vadd.f32 %v1960_v60, %v1254_v29  ;;  %v6304_v29 = vld [vmem:[#allocation34_spill] sm:$0xff]  ;;  %v6305_v9 = vld [vmem:[#allocation19_spill] sm:$0xff] }
 0x1c9   :  { %v1964_v61 = vpop.f32.mrf.mxu0  ;;  %v2077_v11 = vpop.f32.mrf.mxu1 }
 0x1ca   :  { %v2242_v39 = vmax.f32 %v2226_v19, %v2149_v35  ;;  %v2211_v17 = vmax.f32 %v2150_v25, %v2151_v20  ;;  %v2154_v56 = vadd.f32 %v1964_v61, %v5771_v42  ;;  %v2156_v31 = vadd.f32 %v2077_v11, %v5774_v44 }
 0x1cb   :  { %v1966_v28 = vpop.f32.mrf.mxu0  ;;  %v2079_v63 = vpop.f32.mrf.mxu1  ;;  %v1375_v19 = vadd.f32 %v5782_v62, %v5636_v58  ;;  %v1274_v11 = vadd.f32 %v5809_v1, %v6305_v9  ;;  %v6307_v1 = vld [vmem:[#allocation36_spill] sm:$0xff] }
 0x1cc   :  { %v2227_v12 = vmax.f32 %v2211_v17, %v2152_v53  ;;  %v2155_v59 = vadd.f32 %v1966_v28, %v5777_v6  ;;  %v2157_v24 = vadd.f32 %v2079_v63, %v5780_v48  ;;  %v1367_v6 = vadd.f32 %v5768_v10, %v5624_v45  ;;  %v6303_v28 = vld [vmem:[#allocation18_spill] sm:$0xff] }
 0x1cd   :  { %v1968_v18 = vpop.f32.mrf.mxu0  ;;  %v2081_v40 = vpop.f32.mrf.mxu1  ;;  %v1377_v13 = vadd.f32 %v6304_v29, %v6303_v28 }
 0x1ce   :  { %v2212_v60 = vmax.f32 %v2154_v56, %v2155_v59  ;;  %v2158_v42 = vadd.f32 %v1968_v18, %v5785_v34  ;;  %v2160_v5 = vadd.f32 %v2081_v40, %v1375_v19  ;;  %v2153_v58 = vadd.f32 %v2073_v47, %v1367_v6  ;;  %v5944_v34 = vld [vmem:[%s6252_s2] ss:$0 sm:$0xff] }
 0x1cf   :  { %v1970_v54 = vpop.f32.mrf.mxu0  ;;  %v2083_v20 = vpop.f32.mrf.mxu1 }
 0x1d0   :  { %v2228_v25 = vmax.f32 %v2212_v60, %v2156_v31  ;;  %v2159_v61 = vadd.f32 %v1970_v54, %v1264_v8  ;;  %v2161_v62 = vadd.f32 %v2083_v20, %v1377_v13  ;;  %v2243_v47 = vmax.f32 %v2227_v12, %v2153_v58  ;;  %v6306_v54 = vld [vmem:[#allocation20_spill] sm:$0xff] }
 0x1d1   :  { %v1974_v14 = vpop.f32.mrf.mxu0  ;;  %v2087_v44 = vpop.f32.mrf.mxu1  ;;  %v1387_v20 = vadd.f32 %v6307_v1, %v6306_v54 }
 0x1d2   :  { %v2244_v35 = vmax.f32 %v2228_v25, %v2157_v24  ;;  %v2213_v41 = vmax.f32 %v2158_v42, %v2159_v61  ;;  %v2162_v45 = vadd.f32 %v1974_v14, %v5792_v30  ;;  %v2164_v59 = vadd.f32 %v2087_v44, %v5795_v51  ;;  %v6308_v42 = vld [vmem:[#allocation35_spill] sm:$0xff] }
 0x1d3   :  { %v1976_v22 = vpop.f32.mrf.mxu0  ;;  %v2089_v0 = vpop.f32.mrf.mxu1 }
 0x1d4   :  { %v2258_v48 = vmax.f32 %v2242_v39, %v2244_v35  ;;  %v2229_v63 = vmax.f32 %v2213_v41, %v2160_v5  ;;  %v2163_v10 = vadd.f32 %v1976_v22, %v5798_v55  ;;  %v2165_v40 = vadd.f32 %v2089_v0, %v5801_v57  ;;  %v6309_v5 = vld [vmem:[#allocation22_spill] sm:$0xff] }
 0x1d5   :  { %v1978_v53 = vpop.f32.mrf.mxu0  ;;  %v2091_v17 = vpop.f32.mrf.mxu1  ;;  %v1284_v41 = vadd.f32 %v5830_v2, %v6309_v5  ;;  %v6313_v2 = vld [vmem:[#allocation23_spill] sm:$0xff]  ;;  %v6317_v5 = vld [vmem:[#allocation41_spill] sm:$0xff] }
 0x1d6   :  { %v2245_v56 = vmax.f32 %v2229_v63, %v2161_v62  ;;  %v2214_v39 = vmax.f32 %v2162_v45, %v2163_v10  ;;  %v2273_v18 = vadd.f32 %v5944_v34, %v2258_v48  ;;  %v2166_v55 = vadd.f32 %v1978_v53, %v5804_v50  ;;  %v6310_v45 = vld [vmem:[#allocation21_spill] sm:$0xff] }
 0x1d7   :  { %v1980_v8 = vpop.f32.mrf.mxu0  ;;  %v2093_v31 = vpop.f32.mrf.mxu1  ;;  %v2168_v61 = vadd.f32 %v2091_v17, %v6308_v42  ;;  %v1395_v10 = vadd.f32 %v5825_v27, %v6310_v45  ;;  %v6311_v53 = vld [vmem:[#allocation37_spill] sm:$0xff]  ;;  %v6319_v45 = vmov 0  }
 0x1d8   :  { %v2259_v60 = vmax.f32 %v2243_v47, %v2245_v56  ;;  %v2230_v30 = vmax.f32 %v2214_v39, %v2164_v59  ;;  %v2167_v19 = vadd.f32 %v1980_v8, %v1274_v11  ;;  %v2281_v28 = vmax.f32 %v2273_v18, 0.0  ;;  %v6314_v59 = vld [vmem:[#allocation39_spill] sm:$0xff] }
 0x1d9   :  { %v1984_v24 = vpop.f32.mrf.mxu0  ;;  %v2097_v12 = vpop.f32.mrf.mxu1  ;;  %v2169_v57 = vadd.f32 %v2093_v31, %v1387_v20  ;;  %v1397_v39 = vadd.f32 %v6314_v59, %v6313_v2  ;;  %v5135_v2 = vld [vmem:[#allocation9 + $0xc8] ss:$16 sps:$4 sm:$0xff]   ;;  %v5141_v59 = vld [vmem:[#allocation9 + $0xa4] ss:$16 sps:$4 sm:$0xff]  }
 0x1da   :  { %v2274_v25 = vadd.f32 %v5944_v34, %v2259_v60  ;;  %v2246_v51 = vmax.f32 %v2230_v30, %v2165_v40  ;;  %v2215_v6 = vmax.f32 %v2166_v55, %v2167_v19  ;;  %v2170_v50 = vadd.f32 %v1984_v24, %v5814_v23 }
 0x1db   :  { %v1986_v29 = vpop.f32.mrf.mxu0  ;;  %v2099_v13 = vpop.f32.mrf.mxu1  ;;  %v2172_v48 = vadd.f32 %v2097_v12, %v5817_v4  ;;  %v6315_v12 = vld [vmem:[#allocation24_spill] sm:$0xff] }
 0x1dc   :  { %v2282_v14 = vmax.f32 %v2274_v25, 0.0  ;;  %v2231_v44 = vmax.f32 %v2215_v6, %v2168_v61  ;;  %v2171_v35 = vadd.f32 %v1986_v29, %v5820_v7  ;;  %v2173_v23 = vadd.f32 %v2099_v13, %v6311_v53  ;;  %v6312_v7 = vld [vmem:[#allocation38_spill] sm:$0xff] }
 0x1dd   :  { %v1988_v58 = vpop.f32.mrf.mxu0  ;;  %v2101_v62 = vpop.f32.mrf.mxu1  ;;  %v1294_v25 = vadd.f32 %v5852_v36, %v6315_v12 }
 0x1de   :  { %v4562_v22 = vpack.c.bf16 %v2282_v14, %v2281_v28  ;;  %v2247_v0 = vmax.f32 %v2231_v44, %v2169_v57  ;;  %v2216_v63 = vmax.f32 %v2170_v50, %v2171_v35  ;;  %v2174_v47 = vadd.f32 %v1988_v58, %v6312_v7  ;;  %v5126_v28 = vld [vmem:[#allocation9 + $0xe0] ss:$16 sps:$4 sm:$0xff]   ;;  %v5129_v50 = vld [vmem:[#allocation9 + $0xe8] ss:$16 sps:$4 sm:$0xff]   ;;  %v5134_v35 = vld [vmem:[#allocation9 + $0xc4] ss:$16 sps:$4 sm:$0xff]  }
 0x1df   :  { %v1990_v9 = vpop.f32.mrf.mxu0  ;;  %v2103_v11 = vpop.f32.mrf.mxu1  ;;  %v2176_v4 = vadd.f32 %v2101_v62, %v1395_v10 }
 0x1e0   :  { %4589 = vst [vmem:[#allocation2 + $0x8] sm:$0xff] %v4562_v22   ;;  %v2232_v17 = vmax.f32 %v2216_v63, %v2172_v48  ;;  %v2175_v56 = vadd.f32 %v1990_v9, %v1284_v41  ;;  %v2177_v60 = vadd.f32 %v2103_v11, %v1397_v39  ;;  %v6318_v48 = vld [vmem:[#allocation40_spill] sm:$0xff]  ;;  %v6320_v39 = vld [vmem:[#allocation27_spill] sm:$0xff] }
 0x1e1   :  { %v1994_v18 = vpop.f32.mrf.mxu0  ;;  %v2107_v40 = vpop.f32.mrf.mxu1 }
 0x1e2   :  { %v2248_v8 = vmax.f32 %v2232_v17, %v2173_v23  ;;  %v2217_v31 = vmax.f32 %v2174_v47, %v2175_v56  ;;  %v2178_v54 = vadd.f32 %v1994_v18, %v5835_v15  ;;  %v2180_v61 = vadd.f32 %v2107_v40, %v5838_v21  ;;  %v6316_v21 = vld [vmem:[#allocation25_spill] sm:$0xff]  ;;  %v5132_v23 = vld [vmem:[#allocation9 + $0xc0] ss:$16 sps:$4 sm:$0xff]  }
 0x1e3   :  { %v1996_v30 = vpop.f32.mrf.mxu0  ;;  %v2109_v27 = vpop.f32.mrf.mxu1  ;;  %v1407_v41 = vadd.f32 %v6317_v5, %v6316_v21  ;;  %v1304_v18 = vadd.f32 %v5873_v37, %v6320_v39  ;;  %v5139_v37 = vld [vmem:[#allocation9 + $0xa0] ss:$16 sps:$4 sm:$0xff]  }
 0x1e4   :  { %v2260_v55 = vmax.f32 %v2246_v51, %v2248_v8  ;;  %v2233_v19 = vmax.f32 %v2217_v31, %v2176_v4  ;;  %v2179_v1 = vadd.f32 %v1996_v30, %v5841_v32  ;;  %v5976_v29 = vadd.f32 %v2109_v27, %v5844_v26  ;;  %v5137_v26 = vld [vmem:[#allocation9 + $0xcc] ss:$16 sps:$4 sm:$0xff]   ;;  %v6321_v27 = vld [vmem:[#allocation26_spill] sm:$0xff] }
 0x1e5   :  { %v1998_v20 = vpop.f32.mrf.mxu0  ;;  %v2111_v24 = vpop.f32.mrf.mxu1  ;;  %v5144_v4 = vld [vmem:[#allocation9 + $0xac] ss:$16 sps:$4 sm:$0xff]  }
 0x1e6   :  { %v2249_v42 = vmax.f32 %v2233_v19, %v2177_v60  ;;  %v2218_v6 = vmax.f32 %v2178_v54, %v2179_v1  ;;  %v2275_v57 = vadd.f32 %v5944_v34, %v2260_v55  ;;  %v2182_v44 = vadd.f32 %v1998_v20, %v5847_v16  ;;  %v6322_v55 = vld [vmem:[#allocation42_spill] sm:$0xff] }
 0x1e7   :  { %v2000_v51 = vpop.f32.mrf.mxu0  ;;  %v2113_v13 = vpop.f32.mrf.mxu1  ;;  %v5978_v15 = vld [vmem:[#allocation2 + $0x8] sm:$0xff]   ;;  %v2184_v16 = vadd.f32 %v2111_v24, %v6318_v48  ;;  %v6326_v48 = vld [vmem:[#allocation29_spill] sm:$0xff] }
 0x1e8   :  { %v2261_v32 = vmax.f32 %v2247_v0, %v2249_v42  ;;  %v5980_v14 = vmax.f32 %v2218_v6, %v2180_v61  ;;  %v2183_v36 = vadd.f32 %v2000_v51, %v1294_v25  ;;  %2621 = vmatmul.mubr.bf16.vlgmr.msra.gmra.mxu0 %v5978_v15  ;;  %2694 = vmatmul.mubr.bf16.vlgmr.msra.gmra.mxu1 %v5978_v15  ;;  %v2283_v10 = vmax.f32 %v2275_v57, 0.0  ;;  %v6323_v24 = vld [vmem:[#allocation43_spill] sm:$0xff]  ;;  %v6324_v61 = vld [vmem:[#allocation28_spill] sm:$0xff] }
 0x1e9   :  { %v2004_v58 = vpop.f32.mrf.mxu0  ;;  %v2117_v62 = vpop.f32.mrf.mxu1  ;;  %2630 = vmatprep.mubr.bf16.mxu0 %v6319_v45  ;;  %v5992_v9 = vadd.f32 %v2113_v13, %v1407_v41  ;;  %2703 = vmatprep.mubr.bf16.mxu1 %v6319_v45  ;;  %v5142_v42 = vld [vmem:[#allocation9 + $0xa8] ss:$16 sps:$4 sm:$0xff]  }
 0x1ea   :  { %v2276_v22 = vadd.f32 %v5944_v34, %v2261_v32  ;;  %v2250_v0 = vmax.f32 %v5980_v14, %v5976_v29  ;;  %v2219_v63 = vmax.f32 %v2182_v44, %v2183_v36  ;;  %2901 = vmatpush1.bf16.msra.mxu0 %v5126_v28  ;;  %v2186_v47 = vadd.f32 %v2004_v58, %v5857_v43  ;;  %v5150_v29 = vld [vmem:[#allocation9 + $0x8c] ss:$16 sps:$4 sm:$0xff]   ;;  %v5148_v58 = vld [vmem:[#allocation9 + $0x88] ss:$16 sps:$4 sm:$0xff]  }
 0x1eb   :  { %v2006_v11 = vpop.f32.mrf.mxu0  ;;  %v2119_v53 = vpop.f32.mrf.mxu1  ;;  %2974 = vmatpush1.bf16.msra.mxu1 %v5129_v50  ;;  %2902 = vmatprep.subr.bf16.mxu0 %v5134_v35  ;;  %v2188_v30 = vadd.f32 %v2117_v62, %v5860_v49  ;;  %v6325_v49 = vld [vmem:[#allocation44_spill] sm:$0xff] }
 0x1ec   :  { %v2284_v17 = vmax.f32 %v2276_v22, 0.0  ;;  %v5995_v7 = vmax.f32 %v2219_v63, %v2184_v16  ;;  %v2187_v56 = vadd.f32 %v2006_v11, %v5863_v46  ;;  %2975 = vmatprep.subr.bf16.mxu1 %v5137_v26  ;;  %v1415_v46 = vadd.f32 %v5868_v33, %v6321_v27  ;;  %v5147_v33 = vld [vmem:[#allocation9 + $0x84] ss:$16 sps:$4 sm:$0xff]   ;;  %v5145_v50 = vld [vmem:[#allocation9 + $0x80] ss:$16 sps:$4 sm:$0xff]  }
 0x1ed   :  { %v2008_v40 = vpop.f32.mrf.mxu0  ;;  %v2121_v8 = vpop.f32.mrf.mxu1  ;;  %v2189_v19 = vadd.f32 %v2119_v53, %v6322_v55  ;;  %v1417_v6 = vadd.f32 %v6325_v49, %v6324_v61  ;;  %v5153_v62 = vld [vmem:[#allocation9 + $0x64] ss:$16 sps:$4 sm:$0xff]   ;;  %v1314_v16 = vadd.f32 %v5895_v38, %v6326_v48  ;;  %v5156_v53 = vld [vmem:[#allocation9 + $0x6c] ss:$16 sps:$4 sm:$0xff]  }
 0x1ee   :  { %v4567_v31 = vpack.c.bf16 %v2284_v17, %v2283_v10  ;;  %v2251_v60 = vmax.f32 %v5995_v7, %v5992_v9  ;;  %v2220_v43 = vmax.f32 %v2186_v47, %v2187_v56  ;;  %2903 = vmatpush1.bf16.msra.mxu0 %v5132_v23  ;;  %v2190_v12 = vadd.f32 %v2008_v40, %v6323_v24  ;;  %v6327_v10 = vld [vmem:[#allocation45_spill] sm:$0xff]  ;;  %v6328_v23 = vld [vmem:[#allocation46_spill] sm:$0xff]  ;;  %v6329_v17 = vld [vmem:[#allocation47_spill] sm:$0xff] }
 0x1ef   :  { %v2010_v54 = vpop.f32.mrf.mxu0  ;;  %v2123_v1 = vpop.f32.mrf.mxu1  ;;  %2976 = vmatpush1.bf16.msra.mxu1 %v5135_v2  ;;  %2904 = vmatprep.subr.bf16.mxu0 %v5141_v59  ;;  %v2192_v13 = vadd.f32 %v2121_v8, %v1415_v46  ;;  %v6330_v40 = vld [vmem:[#allocation30_spill] sm:$0xff]  ;;  %v6331_v8 = vld [vmem:[#allocation49_spill] sm:$0xff]  ;;  %v6332_v55 = vld [vmem:[#allocation48_spill] sm:$0xff] }
 0x1f0   :  { %4590 = vst [vmem:[#allocation2 + $0x10] sm:$0xff] %v4567_v31   ;;  %v2236_v20 = vmax.f32 %v2220_v43, %v2188_v30  ;;  %v2191_v25 = vadd.f32 %v2010_v54, %v1304_v18  ;;  %2977 = vmatprep.subr.bf16.mxu1 %v5144_v4  ;;  %v2193_v14 = vadd.f32 %v2123_v1, %v1417_v6  ;;  %v5154_v18 = vld [vmem:[#allocation9 + $0x68] ss:$16 sps:$4 sm:$0xff]   ;;  %v5159_v43 = vld [vmem:[#allocation9 + $0x44] ss:$16 sps:$4 sm:$0xff]  }
 0x1f1   :  { %v2014_v28 = vpop.f32.mrf.mxu0  ;;  %v2127_v57 = vpop.f32.mrf.mxu1  ;;  %v1427_v4 = vadd.f32 %v6331_v8, %v6330_v40  ;;  %v5162_v27 = vld [vmem:[#allocation9 + $0x4c] ss:$16 sps:$4 sm:$0xff]   ;;  %v6334_v49 = vld [vmem:[#allocation52_spill] sm:$0xff]  ;;  %v5173_v8 = vld [vmem:[#allocation9 + $0x8] ss:$16 sps:$4 sm:$0xff]  }
 0x1f2   :  { %v2252_v51 = vmax.f32 %v2236_v20, %v2189_v19  ;;  %v2221_v32 = vmax.f32 %v2190_v12, %v2191_v25  ;;  %2905 = vmatpush1.bf16.msra.mxu0 %v5139_v37  ;;  %v2194_v5 = vadd.f32 %v2014_v28, %v5878_v3  ;;  %v2196_v9 = vadd.f32 %v2127_v57, %v6327_v10  ;;  %v5157_v28 = vld [vmem:[#allocation9 + $0x40] ss:$16 sps:$4 sm:$0xff]   ;;  %v5160_v57 = vld [vmem:[#allocation9 + $0x48] ss:$16 sps:$4 sm:$0xff]  }
 0x1f3   :  { %v2016_v44 = vpop.f32.mrf.mxu0  ;;  %v2129_v36 = vpop.f32.mrf.mxu1  ;;  %2978 = vmatpush1.bf16.msra.mxu1 %v5142_v42  ;;  %2906 = vmatprep.subr.bf16.mxu0 %v5147_v33  ;;  %v6333_v42 = vld [vmem:[#allocation50_spill] sm:$0xff]  ;;  %v6335_v33 = vld [vmem:[#allocation32_spill] sm:$0xff] }
 0x1f4   :  { %v2262_v35 = vmax.f32 %v2250_v0, %v2252_v51  ;;  %v2237_v21 = vmax.f32 %v2221_v32, %v2192_v13  ;;  %v2195_v41 = vadd.f32 %v2016_v44, %v5884_v52  ;;  %2979 = vmatprep.subr.bf16.mxu1 %v5150_v29  ;;  %v5151_v0 = vld [vmem:[#allocation9 + $0x60] ss:$16 sps:$4 sm:$0xff]   ;;  %v6017_v52 = vadd.f32 %v2129_v36, %v6328_v23  ;;  %v5169_v44 = vld [vmem:[#allocation9 + $0x2c] ss:$16 sps:$4 sm:$0xff]  }
 0x1f5   :  { %v2018_v26 = vpop.f32.mrf.mxu0  ;;  %v2131_v22 = vpop.f32.mrf.mxu1  ;;  %v6336_v29 = vld [vmem:[#allocation56_spill] sm:$0xff]  ;;  %v5175_v23 = vld [vmem:[#allocation9 + $0xc] ss:$16 sps:$4 sm:$0xff]  }
 0x1f6   :  { %v2253_v63 = vmax.f32 %v2237_v21, %v2193_v14  ;;  %v2222_v11 = vmax.f32 %v2194_v5, %v2195_v41  ;;  %v2277_v3 = vadd.f32 %v5944_v34, %v2262_v35  ;;  %v2198_v7 = vadd.f32 %v2018_v26, %v6329_v17  ;;  %2907 = vmatpush1.bf16.msra.mxu0 %v5145_v50  ;;  %v5166_v14 = vld [vmem:[#allocation9 + $0x24] ss:$16 sps:$4 sm:$0xff]   ;;  %v6337_v35 = vld [vmem:[#allocation51_spill] sm:$0xff]  ;;  %v6340_v26 = vld [vmem:[#allocation53_spill] sm:$0xff] }
 0x1f7   :  { %v2020_v47 = vpop.f32.mrf.mxu0  ;;  %v2133_v56 = vpop.f32.mrf.mxu1  ;;  %v6020_v2 = vld [vmem:[#allocation2 + $0x10] sm:$0xff]   ;;  %2980 = vmatpush1.bf16.msra.mxu1 %v5148_v58  ;;  %2908 = vmatprep.subr.bf16.mxu0 %v5153_v62  ;;  %v2200_v19 = vadd.f32 %v2131_v22, %v6332_v55  ;;  %v1324_v51 = vadd.f32 %v6336_v29, %v6335_v33  ;;  %v6338_v41 = vld [vmem:[#allocation31_spill] sm:$0xff]  ;;  %v6339_v58 = vld [vmem:[#allocation54_spill] sm:$0xff] }
 0x1f8   :  { %v2263_v59 = vmax.f32 %v2251_v60, %v2253_v63  ;;  %v6022_v38 = vmax.f32 %v2222_v11, %v2196_v9  ;;  %v2199_v39 = vadd.f32 %v2020_v47, %v1314_v16  ;;  %2631 = vmatmul.mubr.bf16.gmra.mxu0 %v6020_v2  ;;  %2704 = vmatmul.mubr.bf16.gmra.mxu1 %v6020_v2  ;;  %v2285_v1 = vmax.f32 %v2277_v3, 0.0  ;;  %v6341_v63 = vld [vmem:[#allocation55_spill] sm:$0xff]  ;;  %v5164_v11 = vld [vmem:[#allocation9 + $0x20] ss:$16 sps:$4 sm:$0xff]   ;;  %v5172_v3 = vld [vmem:[#allocation9 + $0x4] ss:$16 sps:$4 sm:$0xff]  }
 0x1f9   :  { %v2024_v31 = vpop.f32.mrf.mxu0  ;;  %v2137_v30 = vpop.f32.mrf.mxu1  ;;  %2640 = vmatprep.mubr.bf16.mxu0 %v6319_v45  ;;  %v2201_v37 = vadd.f32 %v2133_v56, %v1427_v4  ;;  %2713 = vmatprep.mubr.bf16.mxu1 %v6319_v45  ;;  %v1435_v62 = vadd.f32 %v6339_v58, %v6338_v41  ;;  %v6343_v17 = vld [vmem:[#allocation57_spill] sm:$0xff]  ;;  %v5170_v40 = vld [vmem:[#allocation9] ss:$16 sps:$4 sm:$0xff]  }
 0x1fa   :  { %v2278_v46 = vadd.f32 %v5944_v34, %v2263_v59  ;;  %v2254_v60 = vmax.f32 %v6022_v38, %v6017_v52  ;;  %v2223_v54 = vmax.f32 %v2198_v7, %v2199_v39  ;;  %2981 = vmatprep.subr.bf16.mxu1 %v5156_v53  ;;  %v2202_v61 = vadd.f32 %v2024_v31, %v6333_v42  ;;  %v6342_v52 = vld [vmem:[#allocation33_spill] sm:$0xff]  ;;  %v5179_v31 = vld [vmem:[#allocation9 + $0x2e4] ss:$16 sps:$4 sm:$0xff]   ;;  %v5195_v29 = vld [vmem:[#allocation9 + $0x280] ss:$16 sps:$4 sm:$0xff]  }
 0x1fb   :  { %v2026_v20 = vpop.f32.mrf.mxu0  ;;  %v2139_v24 = vpop.f32.mrf.mxu1  ;;  %2909 = vmatpush1.bf16.msra.mxu0 %v5151_v0  ;;  %2982 = vmatpush1.bf16.msra.mxu1 %v5154_v18  ;;  %v2204_v21 = vadd.f32 %v2137_v30, %v6337_v35  ;;  %v5167_v0 = vld [vmem:[#allocation9 + $0x28] ss:$16 sps:$4 sm:$0xff]   ;;  %v1437_v7 = vadd.f32 %v6343_v17, %v6342_v52  ;;  %v5182_v30 = vld [vmem:[#allocation9 + $0x2ec] ss:$16 sps:$4 sm:$0xff]   ;;  %v5213_v41 = vld [vmem:[#allocation9 + $0x220] ss:$16 sps:$4 sm:$0xff]  }
 0x1fc   :  { %v2286_v12 = vmax.f32 %v2278_v46, 0.0  ;;  %v2239_v25 = vmax.f32 %v2223_v54, %v2200_v19  ;;  %v2203_v6 = vadd.f32 %v2026_v20, %v6334_v49  ;;  %2910 = vmatprep.subr.bf16.mxu0 %v5159_v43  ;;  %2983 = vmatprep.subr.bf16.mxu1 %v5162_v27  ;;  %v2205_v22 = vadd.f32 %v2139_v24, %v6340_v26  ;;  %v5177_v20 = vld [vmem:[#allocation9 + $0x2e0] ss:$16 sps:$4 sm:$0xff]   ;;  %v5185_v24 = vld [vmem:[#allocation9 + $0x2c4] ss:$16 sps:$4 sm:$0xff]   ;;  %v5237_v17 = vld [vmem:[#allocation10 + $0x68] sm:$0xff]  }
 0x1fd   :  { %v2028_v13 = vpop.f32.mrf.mxu0  ;;  %v2141_v32 = vpop.f32.mrf.mxu1  ;;  %v5186_v42 = vld [vmem:[#allocation9 + $0x2c8] ss:$16 sps:$4 sm:$0xff]   ;;  %v5194_v49 = vld [vmem:[#allocation9 + $0x2ac] ss:$16 sps:$4 sm:$0xff]   ;;  %v5219_v26 = vld [vmem:[#allocation9 + $0x200] ss:$16 sps:$4 sm:$0xff]  }
 0x1fe   :  { %v4572_v36 = vpack.c.bf16 %v2286_v12, %v2285_v1  ;;  %v2255_v50 = vmax.f32 %v2239_v25, %v2201_v37  ;;  %v2224_v5 = vmax.f32 %v2202_v61, %v2203_v6  ;;  %v2206_v10 = vadd.f32 %v2028_v13, %v6341_v63  ;;  %v5176_v37 = vld [vmem:[#allocation2] sm:$0xff]   ;;  %v5188_v12 = vld [vmem:[#allocation9 + $0x2cc] ss:$16 sps:$4 sm:$0xff]   ;;  %v5210_v35 = vld [vmem:[#allocation9 + $0x248] ss:$16 sps:$4 sm:$0xff]  }
 0x1ff   :  { %v2030_v48 = vpop.f32.mrf.mxu0  ;;  %2911 = vmatpush1.bf16.msra.mxu0 %v5157_v28  ;;  %2984 = vmatpush1.bf16.msra.mxu1 %v5160_v57  ;;  %v2143_v53 = vpop.f32.mrf.mxu1  ;;  %v2208_v56 = vadd.f32 %v2141_v32, %v1435_v62  ;;  %v5183_v25 = vld [vmem:[#allocation9 + $0x2c0] ss:$16 sps:$4 sm:$0xff]   ;;  %v5191_v61 = vld [vmem:[#allocation9 + $0x2a4] ss:$16 sps:$4 sm:$0xff]   ;;  %v5192_v28 = vld [vmem:[#allocation9 + $0x2a8] ss:$16 sps:$4 sm:$0xff]  }
 0x200   :  { %4591 = vst [vmem:[#allocation2 + $0x18] sm:$0xff] %v4572_v36   ;;  %v2240_v16 = vmax.f32 %v2224_v5, %v2204_v21  ;;  %v2207_v9 = vadd.f32 %v2030_v48, %v1324_v51  ;;  %2912 = vmatprep.subr.bf16.mxu0 %v5166_v14  ;;  %2985 = vmatprep.subr.bf16.mxu1 %v5169_v44  ;;  %v5189_v6 = vld [vmem:[#allocation9 + $0x2a0] ss:$16 sps:$4 sm:$0xff]   ;;  %v5197_v57 = vld [vmem:[#allocation9 + $0x284] ss:$16 sps:$4 sm:$0xff]  }
 0x201   :  { %v2209_v39 = vadd.f32 %v2143_v53, %v1437_v7  ;;  %v5200_v33 = vld [vmem:[#allocation9 + $0x28c] ss:$16 sps:$4 sm:$0xff]   ;;  %v5198_v51 = vld [vmem:[#allocation9 + $0x288] ss:$16 sps:$4 sm:$0xff]   ;;  %v5203_v13 = vld [vmem:[#allocation9 + $0x264] ss:$16 sps:$4 sm:$0xff]  }
 0x202   :  { %v2256_v47 = vmax.f32 %v2240_v16, %v2205_v22  ;;  %v2225_v59 = vmax.f32 %v2206_v10, %v2207_v9  ;;  %v5206_v32 = vld [vmem:[#allocation9 + $0x26c] ss:$16 sps:$4 sm:$0xff]   ;;  %v5201_v14 = vld [vmem:[#allocation9 + $0x260] ss:$16 sps:$4 sm:$0xff]   ;;  %v5204_v44 = vld [vmem:[#allocation9 + $0x268] ss:$16 sps:$4 sm:$0xff]  }
 0x203   :  { %2913 = vmatpush1.bf16.msra.mxu0 %v5164_v11  ;;  %2986 = vmatpush1.bf16.msra.mxu1 %v5167_v0  ;;  %v5209_v36 = vld [vmem:[#allocation9 + $0x244] ss:$16 sps:$4 sm:$0xff]   ;;  %v5218_v5 = vld [vmem:[#allocation9 + $0x22c] ss:$16 sps:$4 sm:$0xff]   ;;  %v5216_v58 = vld [vmem:[#allocation9 + $0x228] ss:$16 sps:$4 sm:$0xff]  }
 0x204   :  { %v2264_v38 = vmax.f32 %v2254_v60, %v2256_v47  ;;  %v2241_v18 = vmax.f32 %v2225_v59, %v2208_v56  ;;  %2914 = vmatprep.subr.bf16.mxu0 %v5172_v3  ;;  %2987 = vmatprep.subr.bf16.mxu1 %v5175_v23  ;;  %v5215_v21 = vld [vmem:[#allocation9 + $0x224] ss:$16 sps:$4 sm:$0xff]   ;;  %v5222_v22 = vld [vmem:[#allocation9 + $0x208] ss:$16 sps:$4 sm:$0xff]  }
 0x205   :  { %v5221_v62 = vld [vmem:[#allocation9 + $0x204] ss:$16 sps:$4 sm:$0xff]   ;;  %v5228_v10 = vld [vmem:[#allocation2 + $0x28] sm:$0xff]   ;;  %v5231_v0 = vld [vmem:[#allocation10 + $0x28] sm:$0xff]  }
 0x206   :  { %v2257_v4 = vmax.f32 %v2241_v18, %v2209_v39  ;;  %v2279_v27 = vadd.f32 %v5944_v34, %v2264_v38  ;;  %v5225_v48 = vld [vmem:[#allocation2 + $0x10] sm:$0xff]   ;;  %v5229_v9 = vld [vmem:[#allocation10 + $0x38] sm:$0xff]   ;;  %v5230_v11 = vld [vmem:[#allocation10 + $0x30] sm:$0xff]  }
 0x207   :  { %v6045_v43 = vld [vmem:[#allocation2 + $0x18] sm:$0xff]   ;;  %2915 = vmatpush1.bf16.msra.mxu0 %v5170_v40  ;;  %2988 = vmatpush1.bf16.msra.mxu1 %v5173_v8  ;;  %v5232_v53 = vld [vmem:[#allocation10 + $0x20] sm:$0xff]   ;;  %v5233_v3 = vld [vmem:[#allocation10 + $0x78] sm:$0xff]  }
 0x208   :  { %v2265_v46 = vmax.f32 %v2255_v50, %v2257_v4  ;;  %2641 = vmatmul.mubr.bf16.gmra.mxu0 %v6045_v43  ;;  %2714 = vmatmul.mubr.bf16.gmra.mxu1 %v6045_v43  ;;  %v2287_v55 = vmax.f32 %v2279_v27, 0.0  ;;  %v5207_v50 = vld [vmem:[#allocation9 + $0x240] ss:$16 sps:$4 sm:$0xff]   ;;  %v5226_v16 = vld [vmem:[#allocation2 + $0x18] sm:$0xff]   ;;  %v5234_v23 = vld [vmem:[#allocation10 + $0x18] sm:$0xff]  }
 0x209   :  { %2650 = vmatprep.mubr.bf16.mxu0 %v6319_v45  ;;  %2723 = vmatprep.mubr.bf16.mxu1 %v6319_v45  ;;  %v5236_v52 = vld [vmem:[#allocation10 + $0x10] sm:$0xff]   ;;  %v5238_v7 = vld [vmem:[#allocation10 + $0x8] sm:$0xff]   ;;  %v5239_v47 = vld [vmem:[#allocation10 + $0x60] sm:$0xff]  }
 0x20a   :  { %v2280_v60 = vadd.f32 %v5944_v34, %v2265_v46  ;;  %3271 = vmatprep.subr.bf16.mxu0 %v5179_v31  ;;  %3344 = vmatprep.subr.bf16.mxu1 %v5182_v30  ;;  %v5180_v34 = vld [vmem:[#allocation9 + $0x2e8] ss:$16 sps:$4 sm:$0xff]   ;;  %v5240_v56 = vld [vmem:[#allocation10] sm:$0xff]   ;;  %v5244_v39 = vld [vmem:[#allocation10 + $0x50] sm:$0xff]  }
 0x20b   :  { %v5241_v59 = vld [vmem:[#allocation10 + $0x58] sm:$0xff]   ;;  %v5242_v38 = vld [vmem:[#allocation3] sm:$0xff]   ;;  %v5245_v8 = vld [vmem:[#allocation10 + $0x48] sm:$0xff]  }
 0x20c   :  { %v2288_v19 = vmax.f32 %v2280_v60, 0.0  ;;  %v5246_v4 = vld [vmem:[#allocation10 + $0x40] sm:$0xff]  }
 0x20e   :  { %v4577_v54 = vpack.c.bf16 %v2288_v19, %v2287_v55 }
 0x210   :  { %4592 = vst [vmem:[#allocation2 + $0x20] sm:$0xff] %v4577_v54  }
 0x217   :  { %v5163_v1 = vld [vmem:[#allocation2 + $0x20] sm:$0xff]  }
 0x218   :  { %2651 = vmatmul.mubr.bf16.gmra.mxu0 %v5163_v1  ;;  %2724 = vmatmul.mubr.bf16.gmra.mxu1 %v5163_v1  ;;  %v5227_v63 = vld [vmem:[#allocation2 + $0x20] sm:$0xff]  }
 0x219   :  { %2932 = vmatprep.mubr.bf16.mxu0 %v6319_v45  ;;  %3005 = vmatprep.mubr.bf16.mxu1 %v6319_v45 }
 0x220   :  { %2933 = vmatmul.mubr.bf16.vlgmr.msra.gmra.mxu0 %v5176_v37  ;;  %3006 = vmatmul.mubr.bf16.vlgmr.msra.gmra.mxu1 %v5176_v37 }
 0x221   :  { %3272 = vmatpush1.bf16.msra.mxu0 %v5177_v20  ;;  %3345 = vmatpush1.bf16.msra.mxu1 %v5180_v34 }
 0x222   :  { %3273 = vmatprep.subr.bf16.mxu0 %v5185_v24  ;;  %3346 = vmatprep.subr.bf16.mxu1 %v5188_v12 }
 0x223   :  { %2942 = vmatprep.mubr.bf16.mxu0 %v6319_v45  ;;  %3015 = vmatprep.mubr.bf16.mxu1 %v6319_v45 }
 0x225   :  { %3274 = vmatpush1.bf16.msra.mxu0 %v5183_v25  ;;  %3347 = vmatpush1.bf16.msra.mxu1 %v5186_v42 }
 0x226   :  { %3275 = vmatprep.subr.bf16.mxu0 %v5191_v61  ;;  %3348 = vmatprep.subr.bf16.mxu1 %v5194_v49 }
 0x228   :  { %2943 = vmatmul.mubr.bf16.gmra.mxu0 %v5978_v15  ;;  %3016 = vmatmul.mubr.bf16.gmra.mxu1 %v5978_v15  ;;  %v5212_v15 = vld [vmem:[#allocation9 + $0x24c] ss:$16 sps:$4 sm:$0xff]  }
 0x229   :  { %3276 = vmatpush1.bf16.msra.mxu0 %v5189_v6  ;;  %3349 = vmatpush1.bf16.msra.mxu1 %v5192_v28 }
 0x22a   :  { %3277 = vmatprep.subr.bf16.mxu0 %v5197_v57  ;;  %3350 = vmatprep.subr.bf16.mxu1 %v5200_v33 }
 0x22b   :  { %2952 = vmatprep.mubr.bf16.mxu0 %v6319_v45  ;;  %3025 = vmatprep.mubr.bf16.mxu1 %v6319_v45 }
 0x22d   :  { %3278 = vmatpush1.bf16.msra.mxu0 %v5195_v29  ;;  %3351 = vmatpush1.bf16.msra.mxu1 %v5198_v51 }
 0x22e   :  { %3279 = vmatprep.subr.bf16.mxu0 %v5203_v13  ;;  %3352 = vmatprep.subr.bf16.mxu1 %v5206_v32 }
 0x230   :  { %2953 = vmatmul.mubr.bf16.gmra.mxu0 %v6020_v2  ;;  %3026 = vmatmul.mubr.bf16.gmra.mxu1 %v6020_v2  ;;  %v5224_v2 = vld [vmem:[#allocation9 + $0x20c] ss:$16 sps:$4 sm:$0xff]  }
 0x231   :  { %3280 = vmatpush1.bf16.msra.mxu0 %v5201_v14  ;;  %3353 = vmatpush1.bf16.msra.mxu1 %v5204_v44 }
 0x232   :  { %3281 = vmatprep.subr.bf16.mxu0 %v5209_v36  ;;  %3354 = vmatprep.subr.bf16.mxu1 %v5212_v15 }
 0x233   :  { %2962 = vmatprep.mubr.bf16.mxu0 %v6319_v45  ;;  %3035 = vmatprep.mubr.bf16.mxu1 %v6319_v45 }
 0x235   :  { %3282 = vmatpush1.bf16.msra.mxu0 %v5207_v50  ;;  %3355 = vmatpush1.bf16.msra.mxu1 %v5210_v35 }
 0x236   :  { %3283 = vmatprep.subr.bf16.mxu0 %v5215_v21  ;;  %3356 = vmatprep.subr.bf16.mxu1 %v5218_v5 }
 0x238   :  { %2963 = vmatmul.mubr.bf16.gmra.mxu0 %v6045_v43  ;;  %3036 = vmatmul.mubr.bf16.gmra.mxu1 %v6045_v43  ;;  %v6083_v43 = vld [vmem:[#allocation10 + $0xb8] sm:$0xff]  }
 0x239   :  { %3284 = vmatpush1.bf16.msra.mxu0 %v5213_v41  ;;  %3357 = vmatpush1.bf16.msra.mxu1 %v5216_v58  ;;  %6344 = vst [vmem:[#allocation18_spill] sm:$0xff] %v6083_v43 }
 0x23a   :  { %3285 = vmatprep.subr.bf16.mxu0 %v5221_v62  ;;  %3358 = vmatprep.subr.bf16.mxu1 %v5224_v2 }
 0x23b   :  { %3303 = vmatprep.mubr.bf16.mxu0 %v6319_v45  ;;  %3376 = vmatprep.mubr.bf16.mxu1 %v6319_v45 }
 0x23d   :  { %3286 = vmatpush1.bf16.msra.mxu0 %v5219_v26  ;;  %3359 = vmatpush1.bf16.msra.mxu1 %v5222_v22 }
 0x23e   :  { %4663 = vmatprep.subr.bf16.mxu1 %v5229_v9  ;;  %4643 = vmatprep.subr.bf16.mxu0 %v5233_v3 }
 0x240   :  { %3304 = vmatmul.mubr.bf16.vlgmr.msra.gmra.mxu0 %v5225_v48  ;;  %3377 = vmatmul.mubr.bf16.vlgmr.msra.gmra.mxu1 %v5225_v48 }
 0x241   :  { %3313 = vmatprep.mubr.bf16.mxu0 %v6319_v45  ;;  %3386 = vmatprep.mubr.bf16.mxu1 %v6319_v45 }
 0x242   :  { %4664 = vmatpush3.bf16.msra.mxu1 %v5229_v9  ;;  %4644 = vmatpush3.bf16.msra.mxu0 %v5233_v3 }
 0x243   :  { %4665 = vmatprep.subr.bf16.mxu1 %v5230_v11 }
 0x246   :  { %4666 = vmatpush3.bf16.msra.mxu1 %v5230_v11 }
 0x247   :  { %4667 = vmatprep.subr.bf16.mxu1 %v5231_v0 }
 0x248   :  { %3314 = vmatmul.mubr.bf16.gmra.mxu0 %v5226_v16  ;;  %3387 = vmatmul.mubr.bf16.gmra.mxu1 %v5226_v16 }
 0x249   :  { %3323 = vmatprep.mubr.bf16.mxu0 %v6319_v45  ;;  %3396 = vmatprep.mubr.bf16.mxu1 %v6319_v45 }
 0x24a   :  { %4668 = vmatpush3.bf16.msra.mxu1 %v5231_v0 }
 0x24b   :  { %4669 = vmatprep.subr.bf16.mxu1 %v5232_v53 }
 0x24e   :  { %4670 = vmatpush3.bf16.msra.mxu1 %v5232_v53 }
 0x24f   :  { %4671 = vmatprep.subr.bf16.mxu1 %v5234_v23 }
 0x250   :  { %3324 = vmatmul.mubr.bf16.gmra.mxu0 %v5227_v63  ;;  %3397 = vmatmul.mubr.bf16.gmra.mxu1 %v5227_v63 }
 0x251   :  { %3333 = vmatprep.mubr.bf16.mxu0 %v6319_v45  ;;  %3406 = vmatprep.mubr.bf16.mxu1 %v6319_v45  ;;  %v5235_v45 = vld [vmem:[#allocation10 + $0x70] sm:$0xff]  }
 0x252   :  { %4672 = vmatpush3.bf16.msra.mxu1 %v5234_v23  ;;  %4645 = vmatprep.subr.bf16.mxu0 %v5235_v45 }
 0x253   :  { %4646 = vmatpush3.bf16.msra.mxu0 %v5235_v45  ;;  %4673 = vmatprep.subr.bf16.mxu1 %v5236_v52 }
 0x254   :  { %4647 = vmatprep.subr.bf16.mxu0 %v5237_v17 }
 0x256   :  { %4674 = vmatpush3.bf16.msra.mxu1 %v5236_v52 }
 0x257   :  { %4648 = vmatpush3.bf16.msra.mxu0 %v5237_v17  ;;  %4675 = vmatprep.subr.bf16.mxu1 %v5238_v7 }
 0x258   :  { %3334 = vmatmul.mubr.bf16.gmra.mxu0 %v5228_v10  ;;  %3407 = vmatmul.mubr.bf16.gmra.mxu1 %v5228_v10 }
 0x259   :  { %4649 = vmatprep.subr.bf16.mxu0 %v5239_v47  ;;  %4679 = vmatprep.mubr.bf16.mxu1 %v5242_v38 }
 0x25a   :  { %4676 = vmatpush3.bf16.msra.mxu1 %v5238_v7 }
 0x25b   :  { %4650 = vmatpush3.bf16.msra.mxu0 %v5239_v47  ;;  %4677 = vmatprep.subr.bf16.mxu1 %v5240_v56 }
 0x25c   :  { %4651 = vmatprep.subr.bf16.mxu0 %v5241_v59 }
 0x25e   :  { %4678 = vmatpush3.bf16.msra.mxu1 %v5240_v56 }
 0x25f   :  { %4652 = vmatpush3.bf16.msra.mxu0 %v5241_v59 }
 0x260   :  { %4653 = vmatprep.subr.bf16.mxu0 %v5244_v39 }
 0x263   :  { %4654 = vmatpush3.bf16.msra.mxu0 %v5244_v39 }
 0x264   :  { %4655 = vmatprep.subr.bf16.mxu0 %v5245_v8 }
 0x267   :  { %4656 = vmatpush3.bf16.msra.mxu0 %v5245_v8 }
 0x268   :  { %4657 = vmatprep.subr.bf16.mxu0 %v5246_v4 }
 0x26b   :  { %4658 = vmatpush3.bf16.msra.mxu0 %v5246_v4 }
 0x26c   :  { %4683 = vmatprep.subr.bf16.mxu0 %v6083_v43 }
 0x2a8   :  { %v6075_v18 = vpop.f32.mrf.mxu0  ;;  %v6077_v40 = vpop.f32.mrf.mxu1 }
 0x2aa   :  { %v6079_v31 = vpop.f32.mrf.mxu0  ;;  %v6081_v30 = vpop.f32.mrf.mxu1 }
 0x2ac   :  { %v6085_v27 = vpop.f32.mrf.mxu0  ;;  %v6087_v46 = vpop.f32.mrf.mxu1 }
 0x2ae   :  { %v6090_v60 = vpop.f32.mrf.mxu0  ;;  %v6092_v55 = vpop.f32.mrf.mxu1 }
 0x2b8   :  { %v6094_v19 = vpop.f32.mrf.mxu0  ;;  %v6096_v54 = vpop.f32.mrf.mxu1 }
 0x2ba   :  { %v6098_v1 = vpop.f32.mrf.mxu0  ;;  %v6100_v37 = vpop.f32.mrf.mxu1 }
 0x2bc   :  { %v6102_v20 = vpop.f32.mrf.mxu0  ;;  %v6104_v34 = vpop.f32.mrf.mxu1 }
 0x2be   :  { %v6106_v24 = vpop.f32.mrf.mxu0  ;;  %v6108_v12 = vpop.f32.mrf.mxu1 }
 0x2c8   :  { %v6110_v25 = vpop.f32.mrf.mxu0  ;;  %v6112_v42 = vpop.f32.mrf.mxu1 }
 0x2ca   :  { %v6114_v61 = vpop.f32.mrf.mxu0  ;;  %v6116_v49 = vpop.f32.mrf.mxu1 }
 0x2cc   :  { %v6118_v6 = vpop.f32.mrf.mxu0  ;;  %v6120_v28 = vpop.f32.mrf.mxu1 }
 0x2ce   :  { %v6122_v57 = vpop.f32.mrf.mxu0  ;;  %v6124_v33 = vpop.f32.mrf.mxu1 }
 0x2cf   :  { %6345 = vst [vmem:[#allocation34_spill] sm:$0xff] %v6124_v33 }
 0x2d8   :  { %v6126_v29 = vpop.f32.mrf.mxu0  ;;  %v6128_v51 = vpop.f32.mrf.mxu1 }
 0x2d9   :  { %6346 = vst [vmem:[#allocation19_spill] sm:$0xff] %v6126_v29  ;;  %6347 = vst [vmem:[#allocation20_spill] sm:$0xff] %v6128_v51 }
 0x2da   :  { %v6130_v13 = vpop.f32.mrf.mxu0  ;;  %v6132_v32 = vpop.f32.mrf.mxu1 }
 0x2db   :  { %6348 = vst [vmem:[#allocation36_spill] sm:$0xff] %v6130_v13  ;;  %6349 = vst [vmem:[#allocation35_spill] sm:$0xff] %v6132_v32 }
 0x2dc   :  { %v6134_v14 = vpop.f32.mrf.mxu0  ;;  %v6136_v44 = vpop.f32.mrf.mxu1 }
 0x2dd   :  { %6350 = vst [vmem:[#allocation22_spill] sm:$0xff] %v6134_v14  ;;  %6351 = vst [vmem:[#allocation21_spill] sm:$0xff] %v6136_v44 }
 0x2de   :  { %v6138_v36 = vpop.f32.mrf.mxu0  ;;  %v6140_v15 = vpop.f32.mrf.mxu1 }
 0x2df   :  { %6352 = vst [vmem:[#allocation37_spill] sm:$0xff] %v6138_v36  ;;  %6353 = vst [vmem:[#allocation38_spill] sm:$0xff] %v6140_v15 }
 0x2e0   :  { %v2934_v50 = vpop.f32.mrf.mxu0  ;;  %v3007_v35 = vpop.f32.mrf.mxu1 }
 0x2e1   :  { %v2935_v36 = vadd.f32 %v2934_v50, %v6075_v18  ;;  %v3008_v51 = vadd.f32 %v3007_v35, %v6077_v40 }
 0x2e2   :  { %v2936_v21 = vpop.f32.mrf.mxu0  ;;  %v3009_v5 = vpop.f32.mrf.mxu1 }
 0x2e3   :  { %v2937_v14 = vadd.f32 %v2936_v21, %v6079_v31 }
 0x2e4   :  { %v2938_v41 = vpop.f32.mrf.mxu0  ;;  %v3011_v58 = vpop.f32.mrf.mxu1 }
 0x2e5   :  { %v3012_v18 = vadd.f32 %v3011_v58, %v6087_v46 }
 0x2e6   :  { %v2940_v62 = vpop.f32.mrf.mxu0  ;;  %v3013_v2 = vpop.f32.mrf.mxu1 }
 0x2e8   :  { %v2944_v26 = vpop.f32.mrf.mxu0  ;;  %v3017_v22 = vpop.f32.mrf.mxu1 }
 0x2ea   :  { %v2946_v48 = vpop.f32.mrf.mxu0  ;;  %v3019_v16 = vpop.f32.mrf.mxu1 }
 0x2ec   :  { %v2948_v63 = vpop.f32.mrf.mxu0  ;;  %v6142_v10 = vpop.f32.mrf.mxu1 }
 0x2ee   :  { %v2950_v9 = vpop.f32.mrf.mxu0  ;;  %v6144_v11 = vpop.f32.mrf.mxu1 }
 0x2f0   :  { %v6146_v0 = vpop.f32.mrf.mxu0  ;;  %v6148_v53 = vpop.f32.mrf.mxu1 }
 0x2f2   :  { %v6150_v3 = vpop.f32.mrf.mxu0  ;;  %v6152_v23 = vpop.f32.mrf.mxu1 }
 0x2f4   :  { %v6154_v45 = vpop.f32.mrf.mxu0  ;;  %v6156_v52 = vpop.f32.mrf.mxu1 }
 0x2f6   :  { %v6158_v17 = vpop.f32.mrf.mxu0  ;;  %v6160_v7 = vpop.f32.mrf.mxu1 }
 0x2f7   :  { %6354 = vst [vmem:[#allocation23_spill] sm:$0xff] %v6160_v7 }
 0x2f8   :  { %v6162_v47 = vpop.f32.mrf.mxu0  ;;  %v6164_v56 = vpop.f32.mrf.mxu1 }
 0x2f9   :  { %6355 = vst [vmem:[#allocation39_spill] sm:$0xff] %v6162_v47  ;;  %6356 = vst [vmem:[#allocation24_spill] sm:$0xff] %v6164_v56 }
 0x2fa   :  { %v6166_v59 = vpop.f32.mrf.mxu0  ;;  %v6168_v38 = vpop.f32.mrf.mxu1 }
 0x2fb   :  { %6357 = vst [vmem:[#allocation25_spill] sm:$0xff] %v6166_v59  ;;  %6358 = vst [vmem:[#allocation41_spill] sm:$0xff] %v6168_v38 }
 0x2fc   :  { %v6170_v39 = vpop.f32.mrf.mxu0  ;;  %v6172_v8 = vpop.f32.mrf.mxu1 }
 0x2fd   :  { %6359 = vst [vmem:[#allocation40_spill] sm:$0xff] %v6170_v39  ;;  %6360 = vst [vmem:[#allocation27_spill] sm:$0xff] %v6172_v8  ;;  %v3010_v39 = vadd.f32 %v3009_v5, %v6081_v30  ;;  %v2945_v30 = vadd.f32 %v2944_v26, %v6094_v19 }
 0x2fe   :  { %v6174_v4 = vpop.f32.mrf.mxu0  ;;  %v6176_v43 = vpop.f32.mrf.mxu1 }
 0x2ff   :  { %6361 = vst [vmem:[#allocation26_spill] sm:$0xff] %v6174_v4  ;;  %6362 = vst [vmem:[#allocation42_spill] sm:$0xff] %v6176_v43  ;;  %v2939_v4 = vadd.f32 %v2938_v41, %v6085_v27  ;;  %v2941_v43 = vadd.f32 %v2940_v62, %v6090_v60  ;;  %v2947_v27 = vadd.f32 %v2946_v48, %v6098_v1 }
 0x300   :  { %v3305_v15 = vpop.f32.mrf.mxu0  ;;  %v3378_v44 = vpop.f32.mrf.mxu1  ;;  %v2951_v62 = vadd.f32 %v2950_v9, %v6106_v24 }
 0x301   :  { %v3417_v59 = vadd.f32 %v3305_v15, %v2935_v36  ;;  %v3419_v47 = vadd.f32 %v3378_v44, %v3008_v51  ;;  %v3018_v44 = vadd.f32 %v3017_v22, %v6096_v54  ;;  %v3022_v54 = vadd.f32 %v6142_v10, %v6104_v34 }
 0x302   :  { %v3307_v32 = vpop.f32.mrf.mxu0  ;;  %v3380_v56 = vpop.f32.mrf.mxu1  ;;  %v3028_v10 = vadd.f32 %v6148_v53, %v6112_v42  ;;  %v2961_v53 = vadd.f32 %v6158_v17, %v6122_v57  ;;  %v6366_v57 = vld [vmem:[#allocation39_spill] sm:$0xff] }
 0x303   :  { %v3418_v38 = vadd.f32 %v3307_v32, %v2937_v14  ;;  %v3420_v21 = vadd.f32 %v3380_v56, %v3010_v39  ;;  %v3014_v32 = vadd.f32 %v3013_v2, %v6092_v55  ;;  %v2949_v55 = vadd.f32 %v2948_v63, %v6102_v20 }
 0x304   :  { %v3309_v13 = vpop.f32.mrf.mxu0  ;;  %v3382_v8 = vpop.f32.mrf.mxu1  ;;  %v2955_v20 = vadd.f32 %v6146_v0, %v6110_v25  ;;  %v2957_v63 = vadd.f32 %v6150_v3, %v6114_v61  ;;  %v3030_v61 = vadd.f32 %v6152_v23, %v6116_v49  ;;  %v2959_v3 = vadd.f32 %v6154_v45, %v6118_v6  ;;  %v6363_v45 = vld [vmem:[#allocation34_spill] sm:$0xff] }
 0x305   :  { %v3449_v29 = vmax.f32 %v3417_v59, %v3418_v38  ;;  %v3421_v33 = vadd.f32 %v3309_v13, %v2939_v4  ;;  %v3423_v60 = vadd.f32 %v3382_v8, %v3012_v18 }
 0x306   :  { %v3311_v50 = vpop.f32.mrf.mxu0  ;;  %v3384_v31 = vpop.f32.mrf.mxu1 }
 0x307   :  { %v3457_v7 = vmax.f32 %v3449_v29, %v3419_v47  ;;  %v3422_v40 = vadd.f32 %v3311_v50, %v2941_v43  ;;  %v3424_v5 = vadd.f32 %v3384_v31, %v3014_v32  ;;  %v3020_v43 = vadd.f32 %v3019_v16, %v6100_v37 }
 0x308   :  { %v3315_v14 = vpop.f32.mrf.mxu0  ;;  %v3388_v36 = vpop.f32.mrf.mxu1  ;;  %v3024_v37 = vadd.f32 %v6144_v11, %v6108_v12  ;;  %v6205_v12 = vld [vmem:[%s6254_s4] ss:$0 sm:$0xff] }
 0x309   :  { %v3465_v15 = vmax.f32 %v3457_v7, %v3420_v21  ;;  %v3450_v51 = vmax.f32 %v3421_v33, %v3422_v40  ;;  %v3425_v29 = vadd.f32 %v3315_v14, %v2945_v30  ;;  %v3427_v2 = vadd.f32 %v3388_v36, %v3018_v44  ;;  %v6367_v44 = vld [vmem:[#allocation36_spill] sm:$0xff] }
 0x30a   :  { %v3317_v46 = vpop.f32.mrf.mxu0  ;;  %v3390_v35 = vpop.f32.mrf.mxu1  ;;  %v3032_v40 = vadd.f32 %v6156_v52, %v6120_v28 }
 0x30b   :  { %v3458_v41 = vmax.f32 %v3450_v51, %v3423_v60  ;;  %v3426_v13 = vadd.f32 %v3317_v46, %v2947_v27  ;;  %v3428_v48 = vadd.f32 %v3390_v35, %v3020_v43  ;;  %v6365_v51 = vld [vmem:[#allocation19_spill] sm:$0xff]  ;;  %v6368_v46 = vld [vmem:[#allocation25_spill] sm:$0xff]  ;;  %v6369_v43 = vld [vmem:[#allocation20_spill] sm:$0xff] }
 0x30c   :  { %v3319_v19 = vpop.f32.mrf.mxu0  ;;  %v3392_v58 = vpop.f32.mrf.mxu1  ;;  %v2965_v17 = vadd.f32 %v6366_v57, %v6365_v51  ;;  %v2967_v35 = vadd.f32 %v6368_v46, %v6367_v44  ;;  %v5250_v57 = vld [vmem:[#allocation10 + $0xb0] sm:$0xff]  }
 0x30d   :  { %v3466_v1 = vmax.f32 %v3458_v41, %v3424_v5  ;;  %v3451_v26 = vmax.f32 %v3425_v29, %v3426_v13  ;;  %v3429_v47 = vadd.f32 %v3319_v19, %v2949_v55  ;;  %v3431_v59 = vadd.f32 %v3392_v58, %v3022_v54  ;;  %v6370_v55 = vld [vmem:[#allocation24_spill] sm:$0xff]  ;;  %v6381_v46 = vld [vmem:[#allocation18_spill] sm:$0xff] }
 0x30e   :  { %v3321_v33 = vpop.f32.mrf.mxu0  ;;  %v3394_v22 = vpop.f32.mrf.mxu1  ;;  %v3038_v19 = vadd.f32 %v6370_v55, %v6369_v43  ;;  %v5259_v43 = vld [vmem:[#allocation12 + $0x38] sm:$0xff]   ;;  %v5421_v55 = vmov 0.0  }
 0x30f   :  { %v3459_v7 = vmax.f32 %v3451_v26, %v3427_v2  ;;  %v3430_v56 = vadd.f32 %v3321_v33, %v2951_v62  ;;  %v3432_v38 = vadd.f32 %v3394_v22, %v3024_v37  ;;  %v6374_v37 = vld [vmem:[#allocation40_spill] sm:$0xff]  ;;  %4703 = vmatprep.subr.bf16.mxu1 %v5421_v55 }
 0x310   :  { %v3325_v16 = vpop.f32.mrf.mxu0  ;;  %v3398_v24 = vpop.f32.mrf.mxu1 }
 0x311   :  { %v3467_v9 = vmax.f32 %v3459_v7, %v3428_v48  ;;  %v3452_v34 = vmax.f32 %v3429_v47, %v3430_v56  ;;  %v3433_v11 = vadd.f32 %v3325_v16, %v2955_v20  ;;  %v3435_v31 = vadd.f32 %v3398_v24, %v3028_v10  ;;  %v6371_v48 = vld [vmem:[#allocation35_spill] sm:$0xff]  ;;  %v6372_v7 = vld [vmem:[#allocation41_spill] sm:$0xff]  ;;  %v6373_v56 = vld [vmem:[#allocation22_spill] sm:$0xff] }
 0x312   :  { %v3327_v39 = vpop.f32.mrf.mxu0  ;;  %v3400_v8 = vpop.f32.mrf.mxu1  ;;  %v3040_v47 = vadd.f32 %v6372_v7, %v6371_v48  ;;  %v2969_v20 = vadd.f32 %v6374_v37, %v6373_v56  ;;  %v6375_v16 = vld [vmem:[#allocation37_spill] sm:$0xff]  ;;  %v6376_v24 = vld [vmem:[#allocation26_spill] sm:$0xff]  ;;  %v5272_v56 = vld [vmem:[#allocation12 + $0x40] sm:$0xff]  }
 0x313   :  { %v3473_v4 = vmax.f32 %v3465_v15, %v3467_v9  ;;  %v3460_v25 = vmax.f32 %v3452_v34, %v3431_v59  ;;  %v3434_v0 = vadd.f32 %v3327_v39, %v2957_v63  ;;  %v3436_v30 = vadd.f32 %v3400_v8, %v3030_v61  ;;  %v6364_v15 = vld [vmem:[#allocation23_spill] sm:$0xff]  ;;  %v6377_v8 = vld [vmem:[#allocation21_spill] sm:$0xff]  ;;  %v5269_v48 = vld [vmem:[#allocation12 + $0x10] sm:$0xff]  }
 0x314   :  { %v3329_v18 = vpop.f32.mrf.mxu0  ;;  %v3402_v42 = vpop.f32.mrf.mxu1  ;;  %v3034_v60 = vadd.f32 %v6364_v15, %v6363_v45  ;;  %v2971_v63 = vadd.f32 %v6376_v24, %v6375_v16  ;;  %v5270_v7 = vld [vmem:[#allocation12 + $0x48] sm:$0xff]   ;;  %v5273_v37 = vld [vmem:[#allocation12] sm:$0xff]  }
 0x315   :  { %v3468_v50 = vmax.f32 %v3460_v25, %v3432_v38  ;;  %v3453_v21 = vmax.f32 %v3433_v11, %v3434_v0  ;;  %v3484_v32 = vadd.f32 %v6205_v12, %v3473_v4  ;;  %v3437_v27 = vadd.f32 %v3329_v18, %v2959_v3  ;;  %v6378_v4 = vld [vmem:[#allocation27_spill] sm:$0xff] }
 0x316   :  { %v3331_v14 = vpop.f32.mrf.mxu0  ;;  %v3404_v36 = vpop.f32.mrf.mxu1  ;;  %v3439_v29 = vadd.f32 %v3402_v42, %v3032_v40  ;;  %v3042_v25 = vadd.f32 %v6378_v4, %v6377_v8  ;;  %v4529_v4 = vld [vmem:[%s6256_s6] ss:$0 sm:$0xff] }
 0x317   :  { %v3474_v49 = vmax.f32 %v3466_v1, %v3468_v50  ;;  %v3461_v23 = vmax.f32 %v3453_v21, %v3435_v31  ;;  %v3438_v6 = vadd.f32 %v3331_v14, %v2961_v53  ;;  %v3488_v58 = vmax.f32 %v3484_v32, 0.0  ;;  %v6379_v53 = vld [vmem:[#allocation38_spill] sm:$0xff] }
 0x318   :  { %v3335_v5 = vpop.f32.mrf.mxu0  ;;  %v3408_v28 = vpop.f32.mrf.mxu1  ;;  %v3440_v62 = vadd.f32 %v3404_v36, %v3034_v60  ;;  %v6380_v50 = vld [vmem:[#allocation42_spill] sm:$0xff] }
 0x319   :  { %v3485_v52 = vadd.f32 %v6205_v12, %v3474_v49  ;;  %v3469_v41 = vmax.f32 %v3461_v23, %v3436_v30  ;;  %v3454_v13 = vmax.f32 %v3437_v27, %v3438_v6  ;;  %v3441_v33 = vadd.f32 %v3335_v5, %v2965_v17  ;;  %v5252_v5 = vld [vmem:[#allocation10 + $0xa0] sm:$0xff]  }
 0x31a   :  { %v3337_v1 = vpop.f32.mrf.mxu0  ;;  %v3410_v2 = vpop.f32.mrf.mxu1  ;;  %v3443_v38 = vadd.f32 %v3408_v28, %v3038_v19  ;;  %v3044_v31 = vadd.f32 %v6380_v50, %v6379_v53  ;;  %v5253_v28 = vld [vmem:[#allocation10 + $0x98] sm:$0xff]   ;;  %v5260_v19 = vld [vmem:[#allocation12 + $0x70] sm:$0xff]  }
 0x31b   :  { %v3489_v26 = vmax.f32 %v3485_v52, 0.0  ;;  %v3462_v54 = vmax.f32 %v3454_v13, %v3439_v29  ;;  %v3442_v22 = vadd.f32 %v3337_v1, %v2967_v35  ;;  %v3444_v0 = vadd.f32 %v3410_v2, %v3040_v47  ;;  %v5251_v35 = vld [vmem:[#allocation10 + $0xa8] sm:$0xff]   ;;  %v5257_v29 = vld [vmem:[#allocation3 + $0x18] sm:$0xff]   ;;  %v5264_v2 = vld [vmem:[#allocation12 + $0x60] sm:$0xff]  }
 0x31c   :  { %v3339_v9 = vpop.f32.mrf.mxu0  ;;  %v3412_v59 = vpop.f32.mrf.mxu1  ;;  %v5255_v52 = vld [vmem:[#allocation10 + $0x88] sm:$0xff]   ;;  %v5258_v13 = vld [vmem:[#allocation12 + $0x78] sm:$0xff]  }
 0x31d   :  { %v4582_v34 = vpack.c.bf16 %v3489_v26, %v3488_v58  ;;  %v3470_v10 = vmax.f32 %v3462_v54, %v3440_v62  ;;  %v3455_v39 = vmax.f32 %v3441_v33, %v3442_v22  ;;  %v3445_v3 = vadd.f32 %v3339_v9, %v2969_v20  ;;  %v5261_v58 = vld [vmem:[#allocation12 + $0x30] sm:$0xff]   ;;  %v5262_v62 = vld [vmem:[#allocation12 + $0x68] sm:$0xff]   ;;  %v5265_v26 = vld [vmem:[#allocation12 + $0x20] sm:$0xff]  }
 0x31e   :  { %v3341_v11 = vpop.f32.mrf.mxu0  ;;  %v3414_v42 = vpop.f32.mrf.mxu1  ;;  %v3447_v40 = vadd.f32 %v3412_v59, %v3042_v25  ;;  %v5263_v1 = vld [vmem:[#allocation12 + $0x28] sm:$0xff]   ;;  %v5266_v54 = vld [vmem:[#allocation12 + $0x58] sm:$0xff]   ;;  %v5268_v22 = vld [vmem:[#allocation12 + $0x50] sm:$0xff]  }
 0x31f   :  { %4593 = vst [vmem:[#allocation3 + $0x8] sm:$0xff] %v4582_v34   ;;  %v3463_v61 = vmax.f32 %v3455_v39, %v3443_v38  ;;  %v3446_v18 = vadd.f32 %v3341_v11, %v2971_v63  ;;  %v3448_v14 = vadd.f32 %v3414_v42, %v3044_v31  ;;  %v5267_v33 = vld [vmem:[#allocation12 + $0x18] sm:$0xff]   ;;  %v5271_v47 = vld [vmem:[#allocation12 + $0x8] sm:$0xff]  }
 0x321   :  { %v3471_v21 = vmax.f32 %v3463_v61, %v3444_v0  ;;  %v3456_v32 = vmax.f32 %v3445_v3, %v3446_v18 }
 0x323   :  { %v3475_v30 = vmax.f32 %v3469_v41, %v3471_v21  ;;  %v3464_v36 = vmax.f32 %v3456_v32, %v3447_v40  ;;  %v5256_v41 = vld [vmem:[#allocation10 + $0x80] sm:$0xff]  }
 0x325   :  { %v3472_v49 = vmax.f32 %v3464_v36, %v3448_v14  ;;  %v3486_v27 = vadd.f32 %v6205_v12, %v3475_v30 }
 0x326   :  { %v5243_v23 = vld [vmem:[#allocation3 + $0x8] sm:$0xff]  }
 0x327   :  { %v3476_v6 = vmax.f32 %v3470_v10, %v3472_v49  ;;  %4659 = vmatprep.mubr.bf16.mxu0 %v5243_v23  ;;  %4680 = vmatmul.mubr.bf16.vlgmr.msra.gmra.mxu1 %v5243_v23  ;;  %v3490_v15 = vmax.f32 %v3486_v27, 0.0 }
 0x328   :  { %4704 = vmatpush3.bf16.msra.mxu1 %v5258_v13  ;;  %4719 = vmatprep.mubr.msk.bf16.mxu1 %vm5422_vm0, %v5421_v55 }
 0x329   :  { %v3487_v45 = vadd.f32 %v6205_v12, %v3476_v6  ;;  %v5254_v12 = vld [vmem:[#allocation10 + $0x90] sm:$0xff]   ;;  %4705 = vmatprep.subr.bf16.mxu1 %v5421_v55 }
 0x32b   :  { %v3491_v60 = vmax.f32 %v3487_v45, 0.0 }
 0x32c   :  { %4706 = vmatpush3.bf16.msra.mxu1 %v5260_v19 }
 0x32d   :  { %v4587_v51 = vpack.c.bf16 %v3491_v60, %v3490_v15  ;;  %4707 = vmatprep.subr.bf16.mxu1 %v5421_v55  ;;  %v4546_v60 = vld [vmem:[%s6258_s8] ss:$0 sm:$0xff] }
 0x32f   :  { %4594 = vst [vmem:[#allocation3 + $0x10] sm:$0xff] %v4587_v51  }
 0x330   :  { %4708 = vmatpush3.bf16.msra.mxu1 %v5262_v62 }
 0x331   :  { %4709 = vmatprep.subr.bf16.mxu1 %v5421_v55 }
 0x334   :  { %4710 = vmatpush3.bf16.msra.mxu1 %v5264_v2 }
 0x335   :  { %4711 = vmatprep.subr.bf16.mxu1 %v5421_v55 }
 0x336   :  { %v5248_v17 = vld [vmem:[#allocation3 + $0x10] sm:$0xff]  }
 0x337   :  { %v5249_v44 = vld [vmem:[#allocation3 + $0x10] sm:$0xff]   ;;  %4660 = vmatmul.mubr.bf16.vlgmr.msra.gmra.mxu0 %v5248_v17 }
 0x338   :  { %4684 = vmatpush3.bf16.msra.mxu0 %v6381_v46  ;;  %4699 = vmatprep.mubr.bf16.mxu0 %v5249_v44 }
 0x339   :  { %4685 = vmatprep.subr.bf16.mxu0 %v5250_v57  ;;  %4712 = vmatpush3.bf16.msra.mxu1 %v5266_v54 }
 0x33a   :  { %4713 = vmatprep.subr.bf16.mxu1 %v5421_v55 }
 0x33c   :  { %4686 = vmatpush3.bf16.msra.mxu0 %v5250_v57 }
 0x33d   :  { %4687 = vmatprep.subr.bf16.mxu0 %v5251_v35  ;;  %4714 = vmatpush3.bf16.msra.mxu1 %v5268_v22 }
 0x33e   :  { %4715 = vmatprep.subr.bf16.mxu1 %v5421_v55 }
 0x340   :  { %4688 = vmatpush3.bf16.msra.mxu0 %v5251_v35 }
 0x341   :  { %4689 = vmatprep.subr.bf16.mxu0 %v5252_v5  ;;  %4716 = vmatpush3.bf16.msra.mxu1 %v5270_v7 }
 0x342   :  { %4717 = vmatprep.subr.bf16.mxu1 %v5421_v55 }
 0x344   :  { %4690 = vmatpush3.bf16.msra.mxu0 %v5252_v5 }
 0x345   :  { %4691 = vmatprep.subr.bf16.mxu0 %v5253_v28  ;;  %4718 = vmatpush3.bf16.msra.mxu1 %v5272_v56 }
 0x348   :  { %4692 = vmatpush3.bf16.msra.mxu0 %v5253_v28 }
 0x349   :  { %4693 = vmatprep.subr.bf16.mxu0 %v5254_v12 }
 0x34c   :  { %4694 = vmatpush3.bf16.msra.mxu0 %v5254_v12 }
 0x34d   :  { %4695 = vmatprep.subr.bf16.mxu0 %v5255_v52 }
 0x350   :  { %4696 = vmatpush3.bf16.msra.mxu0 %v5255_v52 }
 0x351   :  { %4697 = vmatprep.subr.bf16.mxu0 %v5256_v41 }
 0x354   :  { %4698 = vmatpush3.bf16.msra.mxu0 %v5256_v41 }
 0x355   :  { %4723 = vmatprep.subr.bf16.mxu0 %v5421_v55 }
 0x357   :  { %4700 = vmatmul.mubr.bf16.vlgmr.msra.gmra.mxu0 %v5257_v29 }
 0x358   :  { %4724 = vmatpush3.bf16.msra.mxu0 %v5259_v43  ;;  %4739 = vmatprep.mubr.msk.bf16.mxu0 %vm5422_vm0, %v5421_v55 }
 0x359   :  { %4725 = vmatprep.subr.bf16.mxu0 %v5421_v55 }
 0x35c   :  { %4726 = vmatpush3.bf16.msra.mxu0 %v5261_v58 }
 0x35d   :  { %4727 = vmatprep.subr.bf16.mxu0 %v5421_v55 }
 0x360   :  { %4728 = vmatpush3.bf16.msra.mxu0 %v5263_v1 }
 0x361   :  { %4729 = vmatprep.subr.bf16.mxu0 %v5421_v55 }
 0x364   :  { %4730 = vmatpush3.bf16.msra.mxu0 %v5265_v26 }
 0x365   :  { %4731 = vmatprep.subr.bf16.mxu0 %v5421_v55 }
 0x368   :  { %4732 = vmatpush3.bf16.msra.mxu0 %v5267_v33 }
 0x369   :  { %4733 = vmatprep.subr.bf16.mxu0 %v5421_v55 }
 0x36c   :  { %4734 = vmatpush3.bf16.msra.mxu0 %v5269_v48 }
 0x36d   :  { %4735 = vmatprep.subr.bf16.mxu0 %v5421_v55 }
 0x370   :  { %4736 = vmatpush3.bf16.msra.mxu0 %v5271_v47 }
 0x371   :  { %4737 = vmatprep.subr.bf16.mxu0 %v5421_v55 }
 0x374   :  { %4738 = vmatpush3.bf16.msra.mxu0 %v5273_v37 }
 0x3e7   :  { %v4681_v24 = vpop.f32.mrf.mxu1 }
 0x3e9   :  { %v3748_v9 = vpop.f32.mrf.mxu1 }
 0x3eb   :  { %v4682_v10 = vpop.f32.mrf.mxu1 }
 0x3ed   :  { %v3751_v61 = vpop.f32.mrf.mxu1 }
 0x3f7   :  { %v4661_v20 = vpop.f32.mrf.mxu0 }
 0x3f8   :  { %v3757_v34 = vadd.f32 %v4681_v24, %v4661_v20 }
 0x3f9   :  { %v3645_v16 = vpop.f32.mrf.mxu0 }
 0x3fa   :  { %v3749_v39 = vadd.f32 %v3748_v9, %v3645_v16 }
 0x3fb   :  { %v4662_v63 = vpop.f32.mrf.mxu0 }
 0x3fc   :  { %v3760_v11 = vadd.f32 %v4682_v10, %v4662_v63 }
 0x3fd   :  { %v3648_v59 = vpop.f32.mrf.mxu0 }
 0x3fe   :  { %v3752_v18 = vadd.f32 %v3751_v61, %v3648_v59 }
 0x417   :  { %v4701_v38 = vpop.f32.mrf.mxu0 }
 0x418   :  { %v3895_v8 = vadd.f32 %v4701_v38, %v3757_v34 }
 0x419   :  { %v3878_v25 = vpop.f32.mrf.mxu0 }
 0x41a   :  { %v3893_v0 = vadd.f32 %v3878_v25, %v3749_v39  ;;  %v3906_v42 = vadd.f32 %v4529_v4, %v3895_v8 }
 0x41b   :  { %v4702_v3 = vpop.f32.mrf.mxu0 }
 0x41c   :  { %v3896_v53 = vadd.f32 %v4702_v3, %v3760_v11  ;;  %v3904_v31 = vadd.f32 %v4529_v4, %v3893_v0  ;;  %v3910_v32 = vmax.f32 %v3906_v42, 0.0 }
 0x41d   :  { %v3881_v50 = vpop.f32.mrf.mxu0 }
 0x41e   :  { %v3907_v21 = vadd.f32 %v4529_v4, %v3896_v53  ;;  %v3894_v40 = vadd.f32 %v3881_v50, %v3752_v18  ;;  %v3908_v36 = vmax.f32 %v3904_v31, 0.0 }
 0x420   :  { %v3911_v30 = vmax.f32 %v3907_v21, 0.0  ;;  %v3905_v14 = vadd.f32 %v4529_v4, %v3894_v40 }
 0x422   :  { %v3913_v49 = vpack.c.bf16 %v3911_v30, %v3910_v32  ;;  %v3909_v23 = vmax.f32 %v3905_v14, 0.0 }
 0x424   :  { %v3912_v27 = vpack.c.bf16 %v3909_v23, %v3908_v36  ;;  %4720 = vmatmul.mubr.bf16.vlgmr.msra.gmra.mxu1 %v3913_v49 }
 0x426   :  { %4740 = vmatmul.mubr.bf16.vlgmr.msra.gmra.mxu0 %v3912_v27 }
 0x4e4   :  { %v4029_v6 = vpop.f32.mrf.mxu1 }
 0x4e6   :  { %v4721_v45 = vpop.f32.mrf.mxu1  ;;  %v4118_v15 = vpop.f32.mrf.mxu0 }
 0x4e7   :  { %v4119_v51 = vadd.f32 %v4118_v15, %v4029_v6 }
 0x4e8   :  { %v4032_v57 = vpop.f32.mrf.mxu1  ;;  %v4741_v17 = vpop.f32.mrf.mxu0 }
 0x4e9   :  { %v4132_v44 = vadd.f32 %v4546_v60, %v4119_v51 }
 0x4ea   :  { %v4722_v46 = vpop.f32.mrf.mxu1  ;;  %v4121_v35 = vpop.f32.mrf.mxu0 }
 0x4eb   :  { %4134 = vst [vmem:[#allocation13] sm:$0xff] %v4132_v44  ;;  %v4122_v5 = vadd.f32 %v4121_v35, %v4032_v57 }
 0x4ec   :  { %v4742_v28 = vpop.f32.mrf.mxu0 }
 0x4ed   :  { %v4133_v12 = vadd.f32 %v4546_v60, %v4122_v5 }
 0x4ef   :  { %4135 = vst [vmem:[#allocation13 + $0x8] sm:$0xff] %v4133_v12 }
 0x4f0   :  { %5392 = shalt.err (!%p5389_p1)
}
 0x4f1   :  { %4147 = dma.vmem_to_hbm [thread:$0]  %s4142_s20, 256, %s6259_s9, [#allocation6], %s5416_s25, %s5416_s25, %s5417_s26  }
 0x4f2   :  { %5407 = dma.done.wait [#allocation6], 256  }
 0x4f3   :  { %5408 = vsyncadd [#allocation6], 4294967040 }
 0x4f4   :  { %4151 = vsyncpa [#allocation5], 1 }
 0x4f5   :  { %4152 = vsyncpa [#allocation8], 1 }
 0x4f6   :  { %4153 = vsyncpa [#allocation11], 1 }
 0x4f7   :  { %4154 = vsyncpa [#allocation6], 1 }

</bundles_post_ra>
